<compile_context>
chip_gen: v5e
topology: v5e:2x2
jax: 0.10.0
libtpu: 0.0.40
codegen_flags: <defaults>
</compile_context>

<pallas_src>
import math
import jax
import jax.numpy as jnp
from jax.experimental import pallas as pl
from jax.experimental.pallas import tpu as pltpu

H1, H2, H3, H4 = 1024, 512, 256, 128
# Lane offsets of b1..b5 inside the packed bias row (all multiples of 128).
_B_OFF = (0, H1, H1 + H2, H1 + H2 + H3, H1 + H2 + H3 + H4)
_B_TOTAL = H1 + H2 + H3 + H4 + 1          # 1921


# ----------------------------------------------------------------------------
# Pallas kernel: one batch tile per grid step; all weights resident in VMEM.
# ----------------------------------------------------------------------------
def critic_kernel(state_ref, action_ref,
                  w1_ref, w2s_ref, w2a_ref, w3_ref, w4_ref, w5_ref,
                  b_ref, out_ref):
    f32, bf16 = jnp.float32, jnp.bfloat16

    b1 = b_ref[:, _B_OFF[0]:_B_OFF[1]]          # (1, 1024)
    b2 = b_ref[:, _B_OFF[1]:_B_OFF[2]]          # (1, 512)
    b3 = b_ref[:, _B_OFF[2]:_B_OFF[3]]          # (1, 256)
    b4 = b_ref[:, _B_OFF[3]:_B_OFF[4]]          # (1, 128)
    b5 = b_ref[:, _B_OFF[4]:_B_OFF[4] + 1]      # (1, 1)

    # layer 1: relu(state @ W1 + b1)                                (TM, 1024)
    h1 = jnp.dot(state_ref[...].astype(bf16), w1_ref[...],
                 preferred_element_type=f32)
    h1 = jnp.maximum(h1 + b1, 0.0)

    # layer 2: relu(concat(h1, action) @ W2 + b2)                   (TM, 512)
    #   - h1 half on the MXU (K=1024)
    #   - action half (K=action_size, tiny) as broadcast FMAs on the VPU.
    h2 = jnp.dot(h1.astype(bf16), w2s_ref[...], preferred_element_type=f32)
    act = action_ref[...].astype(f32)            # (TM, A)
    w2a = w2a_ref[...].astype(f32)               # (A, 512)
    for k in range(action_ref.shape[1]):         # tiny static unroll
        h2 = h2 + act[:, k:k + 1] * w2a[k:k + 1, :]
    h2 = jnp.maximum(h2 + b2, 0.0)

    # layers 3 / 4
    h3 = jnp.maximum(jnp.dot(h2.astype(bf16), w3_ref[...],
                             preferred_element_type=f32) + b3, 0.0)
    h4 = jnp.maximum(jnp.dot(h3.astype(bf16), w4_ref[...],
                             preferred_element_type=f32) + b4, 0.0)

    # layer 5 (out_features=1): contract W5 rows (8,128; row 0 is the real
    # weight, rows 1..7 are zero) with h4 (TM,128) over the feature dim
    # (q @ k.T pattern) -> (8, TM); keep row 0.  Produces a lane-dense
    # (1, TM) output row with no transpose and no masked (TM,1) stores.
    q_rows = jnp.einsum('od,td->ot', w5_ref[...], h4.astype(bf16),
                        preferred_element_type=f32)       # (8, TM)
    out_ref[...] = q_rows[0:1, :] + b5                     # (1, TM)


def _pick_tile(batch, block_m):
    """Batch tile: multiple of 8, capped at block_m; at batch >= ~256 ensure
    the grid has >= 2 steps so both v7x TensorCores engage."""
    rounded = pl.cdiv(batch, 8) * 8
    if rounded <= 128:
        return rounded
    half = pl.cdiv(pl.cdiv(rounded, 2), 128) * 128    # round half up to 128
    return max(128, min(block_m, half))


def critic_forward(state, action, params, *, block_m=256):
    """Fused Critic forward.  state: (B, S) fp32, action: (B, A) fp32 -> (B, 1)."""
    (w1, w2s, w2a, w3, w4, w5_rows, b_packed) = params
    batch, state_size = state.shape
    action_size = action.shape[1]

    tm = _pick_tile(batch, block_m)
    num_tiles = pl.cdiv(batch, tm)
    padded = num_tiles * tm        # no jnp.pad: ragged last tile is handled by Pallas

    row = lambda i: (i, 0)         # batch-tiled operands
    const = lambda i: (0, 0)       # weights/biases: same block every step -> VMEM resident

    flops = 2 * padded * (state_size * H1 + H1 * H2 + action_size * H2
                          + H2 * H3 + H3 * H4 + H4)
    bytes_accessed = (sum(int(p.size) * p.dtype.itemsize for p in params)
                      + batch * (state_size + action_size) * 4 + padded * 4)

    def make_call(single_buffer_consts):
        def cspec(shape):
            if single_buffer_consts:
                return pl.BlockSpec(shape, const, pipeline_mode=pl.Buffered(1))
            return pl.BlockSpec(shape, const)

        return pl.pallas_call(
            critic_kernel,
            out_shape=jax.ShapeDtypeStruct((1, padded), jnp.float32),
            grid_spec=pltpu.PrefetchScalarGridSpec(
                num_scalar_prefetch=0,
                grid=(num_tiles,),
                in_specs=[
                    pl.BlockSpec((tm, state_size), row),     # state
                    pl.BlockSpec((tm, action_size), row),    # action
                    cspec((state_size, H1)),                 # W1
                    cspec((H1, H2)),                         # W2 (state half)
                    cspec((action_size, H2)),                # W2 (action half)
                    cspec((H2, H3)),                         # W3
                    cspec((H3, H4)),                         # W4
                    cspec((8, H4)),                          # W5 rows (row 0 real)
                    cspec((1, _B_TOTAL)),                    # packed biases
                ],
                out_specs=pl.BlockSpec((1, tm), lambda i: (0, i)),  # lane-dense row
            ),
            compiler_params=pltpu.CompilerParams(
                dimension_semantics=("parallel",)),
            cost_estimate=pl.CostEstimate(
                flops=flops, transcendentals=0, bytes_accessed=bytes_accessed),
        )

    args = (state, action, w1, w2s, w2a, w3, w4, w5_rows, b_packed)
    try:
        out = make_call(True)(*args)
    except Exception:
        # pl.Buffered(1) not supported by this build -> default double buffering.
        out = make_call(False)(*args)

    return out.reshape(-1, 1)[:batch]


# ----------------------------------------------------------------------------
# Deterministic parameter init (mirrors Critic.reset_parameters: hidden
# weights ~ U(+-1/sqrt(out_features)) since hidden_init uses weight.size()[0];
# last layer ~ U(+-3e-3); biases keep the PyTorch default U(+-1/sqrt(in))).
# Weights stored bf16, biases fp32 and packed into one row.
# ----------------------------------------------------------------------------
def init_params(key, state_size, action_size):
    dims_in = [state_size, H1 + action_size, H2, H3, H4]
    dims_out = [H1, H2, H3, H4, 1]
    keys = jax.random.split(key, 10)
    weights, biases = [], []
    for i, (din, dout) in enumerate(zip(dims_in, dims_out)):
        lim_w = (1.0 / math.sqrt(dout)) if i < 4 else 3e-3
        lim_b = 1.0 / math.sqrt(din)
        w = jax.random.uniform(keys[2 * i], (din, dout), jnp.float32, -lim_w, lim_w)
        b = jax.random.uniform(keys[2 * i + 1], (1, dout), jnp.float32, -lim_b, lim_b)
        weights.append(w.astype(jnp.bfloat16))
        biases.append(b)

    w1, w2, w3, w4, w5 = weights
    w2s, w2a = w2[:H1], w2[H1:]                    # split concat(h1, action) @ W2
    w5_rows = jnp.zeros((8, H4), jnp.bfloat16).at[0:1].set(w5.T)   # (8, 128)
    b_packed = jnp.concatenate(biases, axis=1)     # (1, 1921) fp32
    return (w1, w2s, w2a, w3, w4, w5_rows, b_packed)


# Pure-JAX reference with matching numerics (bf16 weights, fp32 accumulation).
def critic_ref(state, action, params):
    (w1, w2s, w2a, w3, w4, w5_rows, b_packed) = params
    f32, bf16 = jnp.float32, jnp.bfloat16
    b1 = b_packed[:, _B_OFF[0]:_B_OFF[1]]
    b2 = b_packed[:, _B_OFF[1]:_B_OFF[2]]
    b3 = b_packed[:, _B_OFF[2]:_B_OFF[3]]
    b4 = b_packed[:, _B_OFF[3]:_B_OFF[4]]
    b5 = b_packed[:, _B_OFF[4]:_B_OFF[4] + 1]
    h1 = jax.nn.relu(jnp.dot(state.astype(bf16), w1, preferred_element_type=f32) + b1)
    h2 = (jnp.dot(h1.astype(bf16), w2s, preferred_element_type=f32)
          + jnp.dot(action, w2a.astype(f32)) + b2)
    h2 = jax.nn.relu(h2)
    h3 = jax.nn.relu(jnp.dot(h2.astype(bf16), w3, preferred_element_type=f32) + b3)
    h4 = jax.nn.relu(jnp.dot(h3.astype(bf16), w4, preferred_element_type=f32) + b4)
    return jnp.dot(h4.astype(bf16), w5_rows[0:1].T, preferred_element_type=f32) + b5


if __name__ == "__main__":
    STATE_SIZE = 32
    ACTION_SIZE = 4
    BATCH = 8

    key = jax.random.PRNGKey(0)
    k_state, k_action, k_params = jax.random.split(key, 3)

    state = jax.random.normal(k_state, (BATCH, STATE_SIZE), jnp.float32)
    action = jax.random.normal(k_action, (BATCH, ACTION_SIZE), jnp.float32)
    params = init_params(k_params, STATE_SIZE, ACTION_SIZE)

    out = jax.block_until_ready(critic_forward(state, action, params))

    ref = critic_ref(state, action, params)
    assert out.shape == (BATCH, 1)
    assert jnp.allclose(out, ref, atol=2e-3, rtol=2e-3), (out, ref)

    print("KERNEL_OK")
</pallas_src>

<mosaic_0001>
module attributes {stable_mosaic.version = 11 : i64} {
  func.func @critic_kernel(%arg0: i32, %arg1: memref<8x32xf32, #tpu.memory_space<vmem>>, %arg2: memref<8x4xf32, #tpu.memory_space<vmem>>, %arg3: memref<32x1024xbf16, #tpu.memory_space<vmem>>, %arg4: memref<1024x512xbf16, #tpu.memory_space<vmem>>, %arg5: memref<4x512xbf16, #tpu.memory_space<vmem>>, %arg6: memref<512x256xbf16, #tpu.memory_space<vmem>>, %arg7: memref<256x128xbf16, #tpu.memory_space<vmem>>, %arg8: memref<8x128xbf16, #tpu.memory_space<vmem>>, %arg9: memref<1x1921xf32, #tpu.memory_space<vmem>>, %arg10: memref<1x8xf32, #tpu.memory_space<vmem>>) attributes {dimension_semantics = [#tpu.dimension_semantics<parallel>], iteration_bounds = array<i64: 1>, scalar_prefetch = 0 : i64, scratch_operands = 0 : i64, tpu.core_type = #tpu.core_type<tc>, window_params = [{transform_indices = @transform_0, window_bounds = array<i64: 8, 32>}, {transform_indices = @transform_1, window_bounds = array<i64: 8, 4>}, {pipeline_mode = #tpu.pipeline_mode<synchronous>, transform_indices = @transform_2, window_bounds = array<i64: 32, 1024>}, {pipeline_mode = #tpu.pipeline_mode<synchronous>, transform_indices = @transform_3, window_bounds = array<i64: 1024, 512>}, {pipeline_mode = #tpu.pipeline_mode<synchronous>, transform_indices = @transform_4, window_bounds = array<i64: 4, 512>}, {pipeline_mode = #tpu.pipeline_mode<synchronous>, transform_indices = @transform_5, window_bounds = array<i64: 512, 256>}, {pipeline_mode = #tpu.pipeline_mode<synchronous>, transform_indices = @transform_6, window_bounds = array<i64: 256, 128>}, {pipeline_mode = #tpu.pipeline_mode<synchronous>, transform_indices = @transform_7, window_bounds = array<i64: 8, 128>}, {pipeline_mode = #tpu.pipeline_mode<synchronous>, transform_indices = @transform_8, window_bounds = array<i64: 1, 1921>}, {transform_indices = @transform_9, window_bounds = array<i64: 1, 8>}]} {
    %c0 = arith.constant 0 : index
    %c0_0 = arith.constant 0 : index
    %0 = vector.load %arg9[%c0, %c0_0] : memref<1x1921xf32, #tpu.memory_space<vmem>>, vector<1x1024xf32>
    %c0_1 = arith.constant 0 : index
    %c1024 = arith.constant 1024 : index
    %1 = vector.load %arg9[%c0_1, %c1024] : memref<1x1921xf32, #tpu.memory_space<vmem>>, vector<1x512xf32>
    %c0_2 = arith.constant 0 : index
    %c1536 = arith.constant 1536 : index
    %2 = vector.load %arg9[%c0_2, %c1536] : memref<1x1921xf32, #tpu.memory_space<vmem>>, vector<1x256xf32>
    %c0_3 = arith.constant 0 : index
    %c1792 = arith.constant 1792 : index
    %3 = vector.load %arg9[%c0_3, %c1792] : memref<1x1921xf32, #tpu.memory_space<vmem>>, vector<1x128xf32>
    %c0_4 = arith.constant 0 : index
    %c1920 = arith.constant 1920 : index
    %4 = vector.load %arg9[%c0_4, %c1920] : memref<1x1921xf32, #tpu.memory_space<vmem>>, vector<1x1xf32>
    %c0_5 = arith.constant 0 : index
    %c0_6 = arith.constant 0 : index
    %5 = vector.load %arg1[%c0_5, %c0_6] : memref<8x32xf32, #tpu.memory_space<vmem>>, vector<8x32xf32>
    %6 = arith.truncf %5 : vector<8x32xf32> to vector<8x32xbf16>
    %c0_7 = arith.constant 0 : index
    %c0_8 = arith.constant 0 : index
    %7 = vector.load %arg3[%c0_7, %c0_8] : memref<32x1024xbf16, #tpu.memory_space<vmem>>, vector<32x1024xbf16>
    %cst = arith.constant dense<0.000000e+00> : vector<8x1024xf32>
    %8 = tpu.matmul %6, %7, %cst {dimension_numbers = #tpu.dot_dimension_numbers<[1], [0], [0], [1], [0, 0, 1, 1], [], []>} : vector<8x32xbf16>, vector<32x1024xbf16>, vector<8x1024xf32> -> vector<8x1024xf32>
    %9 = vector.broadcast %0 : vector<1x1024xf32> to vector<8x1024xf32>
    %10 = arith.addf %8, %9 : vector<8x1024xf32>
    %cst_9 = arith.constant 0.000000e+00 : f32
    %11 = vector.broadcast %cst_9 : f32 to vector<8x1024xf32>
    %12 = arith.maximumf %10, %11 : vector<8x1024xf32>
    %13 = arith.truncf %12 : vector<8x1024xf32> to vector<8x1024xbf16>
    %c0_10 = arith.constant 0 : index
    %c0_11 = arith.constant 0 : index
    %14 = vector.load %arg4[%c0_10, %c0_11] : memref<1024x512xbf16, #tpu.memory_space<vmem>>, vector<1024x512xbf16>
    %cst_12 = arith.constant dense<0.000000e+00> : vector<8x512xf32>
    %15 = tpu.matmul %13, %14, %cst_12 {dimension_numbers = #tpu.dot_dimension_numbers<[1], [0], [0], [1], [0, 0, 1, 1], [], []>} : vector<8x1024xbf16>, vector<1024x512xbf16>, vector<8x512xf32> -> vector<8x512xf32>
    %c0_13 = arith.constant 0 : index
    %c0_14 = arith.constant 0 : index
    %16 = vector.load %arg2[%c0_13, %c0_14] : memref<8x4xf32, #tpu.memory_space<vmem>>, vector<8x4xf32>
    %c0_15 = arith.constant 0 : index
    %c0_16 = arith.constant 0 : index
    %17 = vector.load %arg5[%c0_15, %c0_16] : memref<4x512xbf16, #tpu.memory_space<vmem>>, vector<4x512xbf16>
    %18 = arith.extf %17 : vector<4x512xbf16> to vector<4x512xf32>
    %19 = vector.extract_strided_slice %16 {offsets = [0, 0], sizes = [8, 1], strides = [1, 1]} : vector<8x4xf32> to vector<8x1xf32>
    %20 = vector.extract_strided_slice %18 {offsets = [0, 0], sizes = [1, 512], strides = [1, 1]} : vector<4x512xf32> to vector<1x512xf32>
    %21 = vector.broadcast %19 : vector<8x1xf32> to vector<8x512xf32>
    %22 = vector.broadcast %20 : vector<1x512xf32> to vector<8x512xf32>
    %23 = arith.mulf %21, %22 : vector<8x512xf32>
    %24 = arith.addf %15, %23 : vector<8x512xf32>
    %25 = vector.extract_strided_slice %16 {offsets = [0, 1], sizes = [8, 1], strides = [1, 1]} : vector<8x4xf32> to vector<8x1xf32>
    %26 = vector.extract_strided_slice %18 {offsets = [1, 0], sizes = [1, 512], strides = [1, 1]} : vector<4x512xf32> to vector<1x512xf32>
    %27 = vector.broadcast %25 : vector<8x1xf32> to vector<8x512xf32>
    %28 = vector.broadcast %26 : vector<1x512xf32> to vector<8x512xf32>
    %29 = arith.mulf %27, %28 : vector<8x512xf32>
    %30 = arith.addf %24, %29 : vector<8x512xf32>
    %31 = vector.extract_strided_slice %16 {offsets = [0, 2], sizes = [8, 1], strides = [1, 1]} : vector<8x4xf32> to vector<8x1xf32>
    %32 = vector.extract_strided_slice %18 {offsets = [2, 0], sizes = [1, 512], strides = [1, 1]} : vector<4x512xf32> to vector<1x512xf32>
    %33 = vector.broadcast %31 : vector<8x1xf32> to vector<8x512xf32>
    %34 = vector.broadcast %32 : vector<1x512xf32> to vector<8x512xf32>
    %35 = arith.mulf %33, %34 : vector<8x512xf32>
    %36 = arith.addf %30, %35 : vector<8x512xf32>
    %37 = vector.extract_strided_slice %16 {offsets = [0, 3], sizes = [8, 1], strides = [1, 1]} : vector<8x4xf32> to vector<8x1xf32>
    %38 = vector.extract_strided_slice %18 {offsets = [3, 0], sizes = [1, 512], strides = [1, 1]} : vector<4x512xf32> to vector<1x512xf32>
    %39 = vector.broadcast %37 : vector<8x1xf32> to vector<8x512xf32>
    %40 = vector.broadcast %38 : vector<1x512xf32> to vector<8x512xf32>
    %41 = arith.mulf %39, %40 : vector<8x512xf32>
    %42 = arith.addf %36, %41 : vector<8x512xf32>
    %43 = vector.broadcast %1 : vector<1x512xf32> to vector<8x512xf32>
    %44 = arith.addf %42, %43 : vector<8x512xf32>
    %cst_17 = arith.constant 0.000000e+00 : f32
    %45 = vector.broadcast %cst_17 : f32 to vector<8x512xf32>
    %46 = arith.maximumf %44, %45 : vector<8x512xf32>
    %47 = arith.truncf %46 : vector<8x512xf32> to vector<8x512xbf16>
    %c0_18 = arith.constant 0 : index
    %c0_19 = arith.constant 0 : index
    %48 = vector.load %arg6[%c0_18, %c0_19] : memref<512x256xbf16, #tpu.memory_space<vmem>>, vector<512x256xbf16>
    %cst_20 = arith.constant dense<0.000000e+00> : vector<8x256xf32>
    %49 = tpu.matmul %47, %48, %cst_20 {dimension_numbers = #tpu.dot_dimension_numbers<[1], [0], [0], [1], [0, 0, 1, 1], [], []>} : vector<8x512xbf16>, vector<512x256xbf16>, vector<8x256xf32> -> vector<8x256xf32>
    %50 = vector.broadcast %2 : vector<1x256xf32> to vector<8x256xf32>
    %51 = arith.addf %49, %50 : vector<8x256xf32>
    %cst_21 = arith.constant 0.000000e+00 : f32
    %52 = vector.broadcast %cst_21 : f32 to vector<8x256xf32>
    %53 = arith.maximumf %51, %52 : vector<8x256xf32>
    %54 = arith.truncf %53 : vector<8x256xf32> to vector<8x256xbf16>
    %c0_22 = arith.constant 0 : index
    %c0_23 = arith.constant 0 : index
    %55 = vector.load %arg7[%c0_22, %c0_23] : memref<256x128xbf16, #tpu.memory_space<vmem>>, vector<256x128xbf16>
    %cst_24 = arith.constant dense<0.000000e+00> : vector<8x128xf32>
    %56 = tpu.matmul %54, %55, %cst_24 {dimension_numbers = #tpu.dot_dimension_numbers<[1], [0], [0], [1], [0, 0, 1, 1], [], []>} : vector<8x256xbf16>, vector<256x128xbf16>, vector<8x128xf32> -> vector<8x128xf32>
    %57 = vector.broadcast %3 : vector<1x128xf32> to vector<8x128xf32>
    %58 = arith.addf %56, %57 : vector<8x128xf32>
    %cst_25 = arith.constant 0.000000e+00 : f32
    %59 = vector.broadcast %cst_25 : f32 to vector<8x128xf32>
    %60 = arith.maximumf %58, %59 : vector<8x128xf32>
    %c0_26 = arith.constant 0 : index
    %c0_27 = arith.constant 0 : index
    %61 = vector.load %arg8[%c0_26, %c0_27] : memref<8x128xbf16, #tpu.memory_space<vmem>>, vector<8x128xbf16>
    %62 = arith.truncf %60 : vector<8x128xf32> to vector<8x128xbf16>
    "tpu.trace_start"() <{level = 10 : i32, message = "od,td->ot"}> : () -> ()
    %cst_28 = arith.constant dense<0.000000e+00> : vector<8x8xf32>
    %63 = tpu.matmul %61, %62, %cst_28 {dimension_numbers = #tpu.dot_dimension_numbers<[1], [1], [0], [0], [0, 0, 1, 0], [], []>} : vector<8x128xbf16>, vector<8x128xbf16>, vector<8x8xf32> -> vector<8x8xf32>
    "tpu.trace_stop"() : () -> ()
    %64 = vector.extract_strided_slice %63 {offsets = [0, 0], sizes = [1, 8], strides = [1, 1]} : vector<8x8xf32> to vector<1x8xf32>
    %65 = vector.broadcast %4 : vector<1x1xf32> to vector<1x8xf32>
    %66 = arith.addf %64, %65 : vector<1x8xf32>
    %c0_29 = arith.constant 0 : index
    %c0_30 = arith.constant 0 : index
    %67 = vector.load %arg10[%c0_29, %c0_30] : memref<1x8xf32, #tpu.memory_space<vmem>>, vector<1x8xf32>
    tpu.vector_store %arg10[%c0_29, %c0_30], %66 {strides = array<i32>} : memref<1x8xf32, #tpu.memory_space<vmem>>, vector<1x8xf32>,
    return
  }
  func.func @transform_0(%arg0: i32) -> (i32, i32) {
    %c0_i32 = arith.constant 0 : i32
    %c0_i32_0 = arith.constant 0 : i32
    return %arg0, %c0_i32 : i32, i32
  }
  func.func @transform_1(%arg0: i32) -> (i32, i32) {
    %c0_i32 = arith.constant 0 : i32
    %c0_i32_0 = arith.constant 0 : i32
    return %arg0, %c0_i32 : i32, i32
  }
  func.func @transform_2(%arg0: i32) -> (i32, i32) {
    %c0_i32 = arith.constant 0 : i32
    %c0_i32_0 = arith.constant 0 : i32
    %c0_i32_1 = arith.constant 0 : i32
    return %c0_i32, %c0_i32_0 : i32, i32
  }
  func.func @transform_3(%arg0: i32) -> (i32, i32) {
    %c0_i32 = arith.constant 0 : i32
    %c0_i32_0 = arith.constant 0 : i32
    %c0_i32_1 = arith.constant 0 : i32
    return %c0_i32, %c0_i32_0 : i32, i32
  }
  func.func @transform_4(%arg0: i32) -> (i32, i32) {
    %c0_i32 = arith.constant 0 : i32
    %c0_i32_0 = arith.constant 0 : i32
    %c0_i32_1 = arith.constant 0 : i32
    return %c0_i32, %c0_i32_0 : i32, i32
  }
  func.func @transform_5(%arg0: i32) -> (i32, i32) {
    %c0_i32 = arith.constant 0 : i32
    %c0_i32_0 = arith.constant 0 : i32
    %c0_i32_1 = arith.constant 0 : i32
    return %c0_i32, %c0_i32_0 : i32, i32
  }
  func.func @transform_6(%arg0: i32) -> (i32, i32) {
    %c0_i32 = arith.constant 0 : i32
    %c0_i32_0 = arith.constant 0 : i32
    %c0_i32_1 = arith.constant 0 : i32
    return %c0_i32, %c0_i32_0 : i32, i32
  }
  func.func @transform_7(%arg0: i32) -> (i32, i32) {
    %c0_i32 = arith.constant 0 : i32
    %c0_i32_0 = arith.constant 0 : i32
    %c0_i32_1 = arith.constant 0 : i32
    return %c0_i32, %c0_i32_0 : i32, i32
  }
  func.func @transform_8(%arg0: i32) -> (i32, i32) {
    %c0_i32 = arith.constant 0 : i32
    %c0_i32_0 = arith.constant 0 : i32
    %c0_i32_1 = arith.constant 0 : i32
    return %c0_i32, %c0_i32_0 : i32, i32
  }
  func.func @transform_9(%arg0: i32) -> (i32, i32) {
    %c0_i32 = arith.constant 0 : i32
    %c0_i32_0 = arith.constant 0 : i32
    return %c0_i32, %arg0 : i32, i32
  }
}

module attributes {stable_mosaic.version = 11 : i64} {
  func.func @critic_kernel(%arg0: i32, %arg1: memref<8x32xf32, #tpu.memory_space<vmem>>, %arg2: memref<8x4xf32, #tpu.memory_space<vmem>>, %arg3: memref<32x1024xbf16, #tpu.memory_space<vmem>>, %arg4: memref<1024x512xbf16, #tpu.memory_space<vmem>>, %arg5: memref<4x512xbf16, #tpu.memory_space<vmem>>, %arg6: memref<512x256xbf16, #tpu.memory_space<vmem>>, %arg7: memref<256x128xbf16, #tpu.memory_space<vmem>>, %arg8: memref<8x128xbf16, #tpu.memory_space<vmem>>, %arg9: memref<1x1921xf32, #tpu.memory_space<vmem>>, %arg10: memref<1x8xf32, #tpu.memory_space<vmem>>) attributes {dimension_semantics = [#tpu.dimension_semantics<parallel>], iteration_bounds = array<i64: 1>, scalar_prefetch = 0 : i64, scratch_operands = 0 : i64, tpu.core_type = #tpu.core_type<tc>, window_params = [{transform_indices = @transform_0, window_bounds = array<i64: 8, 32>}, {transform_indices = @transform_1, window_bounds = array<i64: 8, 4>}, {pipeline_mode = #tpu.pipeline_mode<synchronous>, transform_indices = @transform_2, window_bounds = array<i64: 32, 1024>}, {pipeline_mode = #tpu.pipeline_mode<synchronous>, transform_indices = @transform_3, window_bounds = array<i64: 1024, 512>}, {pipeline_mode = #tpu.pipeline_mode<synchronous>, transform_indices = @transform_4, window_bounds = array<i64: 4, 512>}, {pipeline_mode = #tpu.pipeline_mode<synchronous>, transform_indices = @transform_5, window_bounds = array<i64: 512, 256>}, {pipeline_mode = #tpu.pipeline_mode<synchronous>, transform_indices = @transform_6, window_bounds = array<i64: 256, 128>}, {pipeline_mode = #tpu.pipeline_mode<synchronous>, transform_indices = @transform_7, window_bounds = array<i64: 8, 128>}, {pipeline_mode = #tpu.pipeline_mode<synchronous>, transform_indices = @transform_8, window_bounds = array<i64: 1, 1921>}, {transform_indices = @transform_9, window_bounds = array<i64: 1, 8>}]} {
    %c0 = arith.constant 0 : index
    %c0_0 = arith.constant 0 : index
    %0 = vector.load %arg9[%c0, %c0_0] : memref<1x1921xf32, #tpu.memory_space<vmem>>, vector<1x1024xf32>
    %c0_1 = arith.constant 0 : index
    %c1024 = arith.constant 1024 : index
    %1 = vector.load %arg9[%c0_1, %c1024] : memref<1x1921xf32, #tpu.memory_space<vmem>>, vector<1x512xf32>
    %c0_2 = arith.constant 0 : index
    %c1536 = arith.constant 1536 : index
    %2 = vector.load %arg9[%c0_2, %c1536] : memref<1x1921xf32, #tpu.memory_space<vmem>>, vector<1x256xf32>
    %c0_3 = arith.constant 0 : index
    %c1792 = arith.constant 1792 : index
    %3 = vector.load %arg9[%c0_3, %c1792] : memref<1x1921xf32, #tpu.memory_space<vmem>>, vector<1x128xf32>
    %c0_4 = arith.constant 0 : index
    %c1920 = arith.constant 1920 : index
    %4 = vector.load %arg9[%c0_4, %c1920] : memref<1x1921xf32, #tpu.memory_space<vmem>>, vector<1x1xf32>
    %c0_5 = arith.constant 0 : index
    %c0_6 = arith.constant 0 : index
    %5 = vector.load %arg1[%c0_5, %c0_6] : memref<8x32xf32, #tpu.memory_space<vmem>>, vector<8x32xf32>
    %6 = arith.truncf %5 : vector<8x32xf32> to vector<8x32xbf16>
    %c0_7 = arith.constant 0 : index
    %c0_8 = arith.constant 0 : index
    %7 = vector.load %arg3[%c0_7, %c0_8] : memref<32x1024xbf16, #tpu.memory_space<vmem>>, vector<32x1024xbf16>
    %cst = arith.constant dense<0.000000e+00> : vector<8x1024xf32>
    %8 = tpu.matmul %6, %7, %cst {dimension_numbers = #tpu.dot_dimension_numbers<[1], [0], [0], [1], [0, 0, 1, 1], [], []>} : vector<8x32xbf16>, vector<32x1024xbf16>, vector<8x1024xf32> -> vector<8x1024xf32>
    %9 = vector.broadcast %0 : vector<1x1024xf32> to vector<8x1024xf32>
    %10 = arith.addf %8, %9 : vector<8x1024xf32>
    %cst_9 = arith.constant 0.000000e+00 : f32
    %11 = vector.broadcast %cst_9 : f32 to vector<8x1024xf32>
    %12 = arith.maximumf %10, %11 : vector<8x1024xf32>
    %13 = arith.truncf %12 : vector<8x1024xf32> to vector<8x1024xbf16>
    %c0_10 = arith.constant 0 : index
    %c0_11 = arith.constant 0 : index
    %14 = vector.load %arg4[%c0_10, %c0_11] : memref<1024x512xbf16, #tpu.memory_space<vmem>>, vector<1024x512xbf16>
    %cst_12 = arith.constant dense<0.000000e+00> : vector<8x512xf32>
    %15 = tpu.matmul %13, %14, %cst_12 {dimension_numbers = #tpu.dot_dimension_numbers<[1], [0], [0], [1], [0, 0, 1, 1], [], []>} : vector<8x1024xbf16>, vector<1024x512xbf16>, vector<8x512xf32> -> vector<8x512xf32>
    %c0_13 = arith.constant 0 : index
    %c0_14 = arith.constant 0 : index
    %16 = vector.load %arg2[%c0_13, %c0_14] : memref<8x4xf32, #tpu.memory_space<vmem>>, vector<8x4xf32>
    %c0_15 = arith.constant 0 : index
    %c0_16 = arith.constant 0 : index
    %17 = vector.load %arg5[%c0_15, %c0_16] : memref<4x512xbf16, #tpu.memory_space<vmem>>, vector<4x512xbf16>
    %18 = arith.extf %17 : vector<4x512xbf16> to vector<4x512xf32>
    %19 = vector.extract_strided_slice %16 {offsets = [0, 0], sizes = [8, 1], strides = [1, 1]} : vector<8x4xf32> to vector<8x1xf32>
    %20 = vector.extract_strided_slice %18 {offsets = [0, 0], sizes = [1, 512], strides = [1, 1]} : vector<4x512xf32> to vector<1x512xf32>
    %21 = vector.broadcast %19 : vector<8x1xf32> to vector<8x512xf32>
    %22 = vector.broadcast %20 : vector<1x512xf32> to vector<8x512xf32>
    %23 = arith.mulf %21, %22 : vector<8x512xf32>
    %24 = arith.addf %15, %23 : vector<8x512xf32>
    %25 = vector.extract_strided_slice %16 {offsets = [0, 1], sizes = [8, 1], strides = [1, 1]} : vector<8x4xf32> to vector<8x1xf32>
    %26 = vector.extract_strided_slice %18 {offsets = [1, 0], sizes = [1, 512], strides = [1, 1]} : vector<4x512xf32> to vector<1x512xf32>
    %27 = vector.broadcast %25 : vector<8x1xf32> to vector<8x512xf32>
    %28 = vector.broadcast %26 : vector<1x512xf32> to vector<8x512xf32>
    %29 = arith.mulf %27, %28 : vector<8x512xf32>
    %30 = arith.addf %24, %29 : vector<8x512xf32>
    %31 = vector.extract_strided_slice %16 {offsets = [0, 2], sizes = [8, 1], strides = [1, 1]} : vector<8x4xf32> to vector<8x1xf32>
    %32 = vector.extract_strided_slice %18 {offsets = [2, 0], sizes = [1, 512], strides = [1, 1]} : vector<4x512xf32> to vector<1x512xf32>
    %33 = vector.broadcast %31 : vector<8x1xf32> to vector<8x512xf32>
    %34 = vector.broadcast %32 : vector<1x512xf32> to vector<8x512xf32>
    %35 = arith.mulf %33, %34 : vector<8x512xf32>
    %36 = arith.addf %30, %35 : vector<8x512xf32>
    %37 = vector.extract_strided_slice %16 {offsets = [0, 3], sizes = [8, 1], strides = [1, 1]} : vector<8x4xf32> to vector<8x1xf32>
    %38 = vector.extract_strided_slice %18 {offsets = [3, 0], sizes = [1, 512], strides = [1, 1]} : vector<4x512xf32> to vector<1x512xf32>
    %39 = vector.broadcast %37 : vector<8x1xf32> to vector<8x512xf32>
    %40 = vector.broadcast %38 : vector<1x512xf32> to vector<8x512xf32>
    %41 = arith.mulf %39, %40 : vector<8x512xf32>
    %42 = arith.addf %36, %41 : vector<8x512xf32>
    %43 = vector.broadcast %1 : vector<1x512xf32> to vector<8x512xf32>
    %44 = arith.addf %42, %43 : vector<8x512xf32>
    %cst_17 = arith.constant 0.000000e+00 : f32
    %45 = vector.broadcast %cst_17 : f32 to vector<8x512xf32>
    %46 = arith.maximumf %44, %45 : vector<8x512xf32>
    %47 = arith.truncf %46 : vector<8x512xf32> to vector<8x512xbf16>
    %c0_18 = arith.constant 0 : index
    %c0_19 = arith.constant 0 : index
    %48 = vector.load %arg6[%c0_18, %c0_19] : memref<512x256xbf16, #tpu.memory_space<vmem>>, vector<512x256xbf16>
    %cst_20 = arith.constant dense<0.000000e+00> : vector<8x256xf32>
    %49 = tpu.matmul %47, %48, %cst_20 {dimension_numbers = #tpu.dot_dimension_numbers<[1], [0], [0], [1], [0, 0, 1, 1], [], []>} : vector<8x512xbf16>, vector<512x256xbf16>, vector<8x256xf32> -> vector<8x256xf32>
    %50 = vector.broadcast %2 : vector<1x256xf32> to vector<8x256xf32>
    %51 = arith.addf %49, %50 : vector<8x256xf32>
    %cst_21 = arith.constant 0.000000e+00 : f32
    %52 = vector.broadcast %cst_21 : f32 to vector<8x256xf32>
    %53 = arith.maximumf %51, %52 : vector<8x256xf32>
    %54 = arith.truncf %53 : vector<8x256xf32> to vector<8x256xbf16>
    %c0_22 = arith.constant 0 : index
    %c0_23 = arith.constant 0 : index
    %55 = vector.load %arg7[%c0_22, %c0_23] : memref<256x128xbf16, #tpu.memory_space<vmem>>, vector<256x128xbf16>
    %cst_24 = arith.constant dense<0.000000e+00> : vector<8x128xf32>
    %56 = tpu.matmul %54, %55, %cst_24 {dimension_numbers = #tpu.dot_dimension_numbers<[1], [0], [0], [1], [0, 0, 1, 1], [], []>} : vector<8x256xbf16>, vector<256x128xbf16>, vector<8x128xf32> -> vector<8x128xf32>
    %57 = vector.broadcast %3 : vector<1x128xf32> to vector<8x128xf32>
    %58 = arith.addf %56, %57 : vector<8x128xf32>
    %cst_25 = arith.constant 0.000000e+00 : f32
    %59 = vector.broadcast %cst_25 : f32 to vector<8x128xf32>
    %60 = arith.maximumf %58, %59 : vector<8x128xf32>
    %c0_26 = arith.constant 0 : index
    %c0_27 = arith.constant 0 : index
    %61 = vector.load %arg8[%c0_26, %c0_27] : memref<8x128xbf16, #tpu.memory_space<vmem>>, vector<8x128xbf16>
    %62 = arith.truncf %60 : vector<8x128xf32> to vector<8x128xbf16>
    "tpu.trace_start"() <{level = 10 : i32, message = "od,td->ot"}> : () -> ()
    %cst_28 = arith.constant dense<0.000000e+00> : vector<8x8xf32>
    %63 = tpu.matmul %61, %62, %cst_28 {dimension_numbers = #tpu.dot_dimension_numbers<[1], [1], [0], [0], [0, 0, 1, 0], [], []>} : vector<8x128xbf16>, vector<8x128xbf16>, vector<8x8xf32> -> vector<8x8xf32>
    "tpu.trace_stop"() : () -> ()
    %64 = vector.extract_strided_slice %63 {offsets = [0, 0], sizes = [1, 8], strides = [1, 1]} : vector<8x8xf32> to vector<1x8xf32>
    %65 = vector.broadcast %4 : vector<1x1xf32> to vector<1x8xf32>
    %66 = arith.addf %64, %65 : vector<1x8xf32>
    %c0_29 = arith.constant 0 : index
    %c0_30 = arith.constant 0 : index
    %67 = vector.load %arg10[%c0_29, %c0_30] : memref<1x8xf32, #tpu.memory_space<vmem>>, vector<1x8xf32>
    tpu.vector_store %arg10[%c0_29, %c0_30], %66 {strides = array<i32>} : memref<1x8xf32, #tpu.memory_space<vmem>>, vector<1x8xf32>,
    return
  }
  func.func @transform_0(%arg0: i32) -> (i32, i32) {
    %c0_i32 = arith.constant 0 : i32
    %c0_i32_0 = arith.constant 0 : i32
    return %arg0, %c0_i32 : i32, i32
  }
  func.func @transform_1(%arg0: i32) -> (i32, i32) {
    %c0_i32 = arith.constant 0 : i32
    %c0_i32_0 = arith.constant 0 : i32
    return %arg0, %c0_i32 : i32, i32
  }
  func.func @transform_2(%arg0: i32) -> (i32, i32) {
    %c0_i32 = arith.constant 0 : i32
    %c0_i32_0 = arith.constant 0 : i32
    %c0_i32_1 = arith.constant 0 : i32
    return %c0_i32, %c0_i32_0 : i32, i32
  }
  func.func @transform_3(%arg0: i32) -> (i32, i32) {
    %c0_i32 = arith.constant 0 : i32
    %c0_i32_0 = arith.constant 0 : i32
    %c0_i32_1 = arith.constant 0 : i32
    return %c0_i32, %c0_i32_0 : i32, i32
  }
  func.func @transform_4(%arg0: i32) -> (i32, i32) {
    %c0_i32 = arith.constant 0 : i32
    %c0_i32_0 = arith.constant 0 : i32
    %c0_i32_1 = arith.constant 0 : i32
    return %c0_i32, %c0_i32_0 : i32, i32
  }
  func.func @transform_5(%arg0: i32) -> (i32, i32) {
    %c0_i32 = arith.constant 0 : i32
    %c0_i32_0 = arith.constant 0 : i32
    %c0_i32_1 = arith.constant 0 : i32
    return %c0_i32, %c0_i32_0 : i32, i32
  }
  func.func @transform_6(%arg0: i32) -> (i32, i32) {
    %c0_i32 = arith.constant 0 : i32
    %c0_i32_0 = arith.constant 0 : i32
    %c0_i32_1 = arith.constant 0 : i32
    return %c0_i32, %c0_i32_0 : i32, i32
  }
  func.func @transform_7(%arg0: i32) -> (i32, i32) {
    %c0_i32 = arith.constant 0 : i32
    %c0_i32_0 = arith.constant 0 : i32
    %c0_i32_1 = arith.constant 0 : i32
    return %c0_i32, %c0_i32_0 : i32, i32
  }
  func.func @transform_8(%arg0: i32) -> (i32, i32) {
    %c0_i32 = arith.constant 0 : i32
    %c0_i32_0 = arith.constant 0 : i32
    %c0_i32_1 = arith.constant 0 : i32
    return %c0_i32, %c0_i32_0 : i32, i32
  }
  func.func @transform_9(%arg0: i32) -> (i32, i32) {
    %c0_i32 = arith.constant 0 : i32
    %c0_i32_0 = arith.constant 0 : i32
    return %c0_i32, %arg0 : i32, i32
  }
}

</mosaic_0001>

<bundles_post_ra>
// kernel: tpu_custom_call.1
= control target key start
LH: loop header
LB: loop body
LE: loop exit
PB: predicated region body
PF: predicated region fallthrough
CT: control target
= control target key end

     0   :  { %14 = vsyncpa [#allocation3], 0  ;;  %s5458_s0 = inlined_call_operand.hbm [shape: f32[8,32], index: 0, kind: input, shape index: {}]   ;;  %s5459_s1 = inlined_call_operand.vmem [shape: f32[8,4], index: 1, kind: input, shape index: {}]   ;;  %s5460_s2 = inlined_call_operand.hbm [shape: bf16[32,1024], index: 2, kind: input, shape index: {}]   ;;  %s5461_s3 = inlined_call_operand.hbm [shape: bf16[1024,512], index: 3, kind: input, shape index: {}]   ;;  %s5462_s4 = inlined_call_operand.hbm [shape: bf16[4,512], index: 4, kind: input, shape index: {}]   ;;  %s5463_s5 = inlined_call_operand.hbm [shape: bf16[512,256], index: 5, kind: input, shape index: {}]   ;;  %s5464_s6 = inlined_call_operand.hbm [shape: bf16[256,128], index: 6, kind: input, shape index: {}]   ;;  %s5465_s7 = inlined_call_operand.hbm [shape: bf16[8,128], index: 7, kind: input, shape index: {}]   ;;  %s5466_s8 = inlined_call_operand.vmem [shape: f32[1,1921], index: 8, kind: input, shape index: {}]   ;;  %s5467_s9 = inlined_call_operand.hbm [shape: f32[1,8], index: 9, kind: output, shape index: {}]  }
   0x1   :  { %15 = vsyncpa [#allocation6], 0 }
   0x2   :  { %16 = vsyncpa [#allocation9], 0 }
   0x3   :  { %17 = vsyncpa [#allocation12], 0  ;;  %s36_s11 = sshll.u32 %s5460_s2, 4  ;;  %s37_s11 = int_to_ptr.hbm [resolvable:$true] %s36_s11 }
   0x4   :  { %18 = vsyncpa [#allocation4], 0  ;;  %s5149_s12 = smov [#allocation5]   ;;  %s63_s16 = sshll.u32 %s5462_s4, 4  ;;  %s64_s16 = int_to_ptr.hbm [resolvable:$true] %s63_s16 }
   0x5   :  { %s38_s13 = sshll.u32 %s5149_s12, 4  ;;  %s5150_s17 = smov 512   ;;  %s39_s13 = int_to_ptr.vmem [resolvable:$true] %s38_s13 }
   0x6   :  { %s5151_s18 = smov 32   ;;  %s5152_s19 = smov [#allocation8]  }
   0x7   :  { %44 = dma.hbm_to_vmem [thread:$0]  %s37_s11, 2048, %s39_s13, [#allocation6], %s5150_s17, %s5150_s17, %s5151_s18  }
   0x8   :  { %s65_s20 = sshll.u32 %s5152_s19, 4  ;;  %s86_s23 = sshll.u32 %s5464_s6, 4  ;;  %s66_s20 = int_to_ptr.vmem [resolvable:$true] %s65_s20  ;;  %s87_s23 = int_to_ptr.hbm [resolvable:$true] %s86_s23 }
   0x9   :  { %68 = dma.hbm_to_vmem [thread:$0]  %s64_s16, 128, %s66_s20, [#allocation9]  }
   0xa   :  { %s5153_s2 = smov [#allocation11]   ;;  %s24_s4 = sshll.u32 %s5458_s0, 4  ;;  %s25_s4 = int_to_ptr.hbm [resolvable:$true] %s24_s4 }
   0xb   :  { %s88_s24 = sshll.u32 %s5153_s2, 4  ;;  %s5154_s27 = smov 64   ;;  %s89_s24 = int_to_ptr.vmem [resolvable:$true] %s88_s24 }
   0xc   :  { %s5155_s28 = smov 4   ;;  %s5156_s29 = smov [#allocation2]  }
   0xd   :  { %94 = dma.hbm_to_vmem [thread:$0]  %s87_s23, 2048, %s89_s24, [#allocation12], %s5154_s27, %s5154_s27, %s5155_s28  }
   0xe   :  { %s26_s30 = sshll.u32 %s5156_s29, 4  ;;  %s49_s6 = sshll.u32 %s5461_s3, 4  ;;  %s27_s30 = int_to_ptr.vmem [resolvable:$true] %s26_s30  ;;  %s50_s6 = int_to_ptr.hbm [resolvable:$true] %s49_s6 }
   0xf   :  { %29 = dma.hbm_to_vmem [thread:$0]  %s25_s4, 128, %s27_s30, [#allocation3]  }
  0x10   :  { %s5157_s12 = smov [#allocation7]   ;;  %s73_s0 = sshll.u32 %s5463_s5, 4  ;;  %s74_s0 = int_to_ptr.hbm [resolvable:$true] %s73_s0 }
  0x11   :  { %s51_s13 = sshll.u32 %s5157_s12, 4  ;;  %s5158_s16 = smov 256   ;;  %s52_s13 = int_to_ptr.vmem [resolvable:$true] %s51_s13 }
  0x12   :  { %s5159_s17 = smov 16   ;;  %s5160_s18 = smov [#allocation10]  }
  0x13   :  { %57 = dma.hbm_to_vmem [thread:$0]  %s50_s6, 32768, %s52_s13, [#allocation6], %s5158_s16, %s5158_s16, %s5159_s17  }
  0x14   :  { %s75_s19 = sshll.u32 %s5160_s18, 4  ;;  %s5161_s20 = smov 128   ;;  %s76_s19 = int_to_ptr.vmem [resolvable:$true] %s75_s19 }
  0x15   :  { %s5162_s21 = smov 8   ;;  %s100_s23 = sshll.u32 %s5465_s7, 4  ;;  %s101_s23 = int_to_ptr.hbm [resolvable:$true] %s100_s23 }
  0x16   :  { %81 = dma.hbm_to_vmem [thread:$0]  %s74_s0, 8192, %s76_s19, [#allocation9], %s5161_s20, %s5161_s20, %s5162_s21  }
  0x17   :  { %s5163_s2 = smov [#allocation13]  }
  0x18   :  { %s102_s24 = sshll.u32 %s5163_s2, 4  ;;  %s103_s24 = int_to_ptr.vmem [resolvable:$true] %s102_s24 }
  0x19   :  { %105 = dma.hbm_to_vmem [thread:$0]  %s101_s23, 64, %s103_s24, [#allocation12]  }
  0x1a   :  { %5139 = dma.done.wait [#allocation3], 128  }
  0x1b   :  { %5140 = vsyncadd [#allocation3], 4294967168 }
  0x1c   :  { %5141 = dma.done.wait [#allocation6], 34816  }
  0x1d   :  { %5142 = vsyncadd [#allocation6], 4294932480 }
  0x1e   :  { %5143 = dma.done.wait [#allocation9], 8320  }
  0x1f   :  { %5144 = vsyncadd [#allocation9], 4294958976 }
  0x20   :  { %5145 = dma.done.wait [#allocation12], 2112  }
  0x21   :  { %5146 = vsyncadd [#allocation12], 4294965184  ;;  %v3186_v0 = vld [vmem:[#allocation5 + $0x40] sm:$0xf]  ;;  %v4576_v2 = vld [vmem:[#allocation5 + $0x44] sm:$0xf] }
  0x22   :  { %v4580_v1 = vld [vmem:[#allocation5 + $0x5c] sm:$0xf0]  ;;  %v3188_v4 = vld [vmem:[#allocation5 + $0x60] sm:$0xf0]  ;;  %v3194_v5 = vld [vmem:[#allocation5 + $0x48] sm:$0xf] }
  0x23   :  { %v3187_v3 = vor.u32 %v4580_v1, %v3186_v0  ;;  %v4581_v6 = vld [vmem:[#allocation5 + $0x64] sm:$0xf0]  ;;  %v3191_v7 = vor.u32 %v4576_v2, %v3188_v4  ;;  %v3154_v9 = vld [vmem:[#allocation5] sm:$0xf]  ;;  %v4568_v11 = vld [vmem:[#allocation5 + $0x4] sm:$0xf] }
  0x24   :  { %v3195_v8 = vor.u32 %v4581_v6, %v3194_v5  ;;  %v4572_v10 = vld [vmem:[#allocation5 + $0x1c] sm:$0xf0]  ;;  %v3156_v13 = vld [vmem:[#allocation5 + $0x20] sm:$0xf0]  ;;  %v3162_v14 = vld [vmem:[#allocation5 + $0x8] sm:$0xf] }
  0x25   :  { %267 = vmatpush.bf16.msra.mxu3 %v3187_v3  ;;  %v3155_v12 = vor.u32 %v4572_v10, %v3154_v9  ;;  %v4573_v15 = vld [vmem:[#allocation5 + $0x24] sm:$0xf0]  ;;  %280 = vmatpush.bf16.msra.mxu1 %v3191_v7  ;;  %v3159_v16 = vor.u32 %v4568_v11, %v3156_v13  ;;  %v142_v18 = vld [vmem:[#allocation2] sm:$0xff]  ;;  %vm257_vm0 = vcmask 261120   ;;  %v4577_v19 = vld [vmem:[#allocation5 + $0x4c] sm:$0xf] }
  0x26   :  { %293 = vmatpush.bf16.msra.mxu2 %v3195_v8  ;;  %v3163_v17 = vor.u32 %v4573_v15, %v3162_v14  ;;  %v3196_v20 = vld [vmem:[#allocation5 + $0x68] sm:$0xf0]  ;;  %v4578_v22 = vld [vmem:[#allocation5 + $0x54] sm:$0xf]  ;;  %v3210_v24 = vld [vmem:[#allocation5 + $0x58] sm:$0xf]  ;;  %v5240_v25 = vpack.c.bf16 %v142_v18, %v142_v18 }
  0x27   :  { %v3199_v21 = vor.u32 %v4577_v19, %v3196_v20  ;;  %v3204_v23 = vld [vmem:[#allocation5 + $0x70] sm:$0xf0]  ;;  %v4583_v27 = vld [vmem:[#allocation5 + $0x74] sm:$0xf0]  ;;  %v4569_v28 = vld [vmem:[#allocation5 + $0xc] sm:$0xf] }
  0x28   :  { %v3207_v26 = vor.u32 %v4578_v22, %v3204_v23  ;;  %v3164_v29 = vld [vmem:[#allocation5 + $0x28] sm:$0xf0]  ;;  %v3211_v30 = vor.u32 %v4583_v27, %v3210_v24  ;;  %v4570_v31 = vld [vmem:[#allocation5 + $0x14] sm:$0xf]  ;;  %v3178_v33 = vld [vmem:[#allocation5 + $0x18] sm:$0xf] }
  0x29   :  { %268 = vmatpush.bf16.msra.mxu3 %v3155_v12  ;;  %v3172_v32 = vld [vmem:[#allocation5 + $0x30] sm:$0xf0]  ;;  %281 = vmatpush.bf16.msra.mxu1 %v3159_v16  ;;  %v4575_v34 = vld [vmem:[#allocation5 + $0x34] sm:$0xf0]  ;;  %v3202_v35 = vld [vmem:[#allocation5 + $0x50] sm:$0xf]  ;;  %v3167_v37 = vor.u32 %v4569_v28, %v3164_v29 }
  0x2a   :  { %294 = vmatpush.bf16.msra.mxu2 %v3163_v17  ;;  %v4582_v36 = vld [vmem:[#allocation5 + $0x6c] sm:$0xf0]  ;;  %v3175_v38 = vor.u32 %v4570_v31, %v3172_v32  ;;  %v4579_v42 = vld [vmem:[#allocation5 + $0x5c] sm:$0xf]  ;;  %v3179_v43 = vor.u32 %v4575_v34, %v3178_v33  ;;  %v3466_v48 = vld [vmem:[#allocation7 + $0x1e0] sm:$0xf] }
  0x2b   :  { %v3203_v39 = vor.u32 %v4582_v36, %v3202_v35  ;;  %v3170_v40 = vld [vmem:[#allocation5 + $0x10] sm:$0xf]  ;;  %v3212_v44 = vld [vmem:[#allocation5 + $0x78] sm:$0xf0]  ;;  %v3450_v50 = vld [vmem:[#allocation7 + $0x1c0] sm:$0xf] }
  0x2c   :  { %v4574_v41 = vld [vmem:[#allocation5 + $0x2c] sm:$0xf0]  ;;  %3216 = vmatmul.msk.bf16.vlgmr.msra.gmra.mxu3 %vm257_vm0, %v5240_v25  ;;  %v4571_v45 = vld [vmem:[#allocation5 + $0x1c] sm:$0xf]  ;;  %3217 = vmatmul.msk.bf16.vlgmr.msra.gmra.mxu1 %vm257_vm0, %v5240_v25  ;;  %v3215_v47 = vor.u32 %v4579_v42, %v3212_v44  ;;  %v3338_v54 = vld [vmem:[#allocation7 + $0xe0] sm:$0xf] }
  0x2d   :  { %306 = vmatpush.bf16.msrb.mxu3 %v3199_v21  ;;  %332 = vmatpush.bf16.msrb.mxu1 %v3207_v26  ;;  %v3180_v46 = vld [vmem:[#allocation5 + $0x38] sm:$0xf0]  ;;  %v4646_v49 = vld [vmem:[#allocation7 + $0x1ec] sm:$0xf0]  ;;  %v3171_v51 = vor.u32 %v4574_v41, %v3170_v40  ;;  %v3594_v57 = vld [vmem:[#allocation7 + $0x2e0] sm:$0xf] }
  0x2e   :  { %345 = vmatpush.bf16.msrb.mxu2 %v3211_v30  ;;  %319 = vmatpush.bf16.msra.mxu0 %v3203_v39  ;;  %v3467_v52 = vor.u32 %v4646_v49, %v3466_v48  ;;  %v4642_v53 = vld [vmem:[#allocation7 + $0x1cc] sm:$0xf0]  ;;  %v3183_v59 = vor.u32 %v4571_v45, %v3180_v46  ;;  %v3322_v61 = vld [vmem:[#allocation7 + $0xc0] sm:$0xf]  ;;  %s5168_s6 = smov [#allocation14]   ;;  %s3139_s15 = sshll.u32 %s5467_s9, 4  ;;  %s3140_s15 = int_to_ptr.hbm [resolvable:$true] %s3139_s15 }
  0x2f   :  { %3218 = vmatmul.msk.bf16.vlgmr.msra.gmra.mxu2 %vm257_vm0, %v5240_v25  ;;  %v4614_v55 = vld [vmem:[#allocation7 + $0xec] sm:$0xf0]  ;;  %v3451_v63 = vor.u32 %v4642_v53, %v3450_v50  ;;  %v3578_v0 = vld [vmem:[#allocation7 + $0x2c0] sm:$0xf]  ;;  %s3137_s12 = sshll.u32 %s5168_s6, 4  ;;  %vm3130_vm1 = vcmask 57344   ;;  %s3138_s12 = int_to_ptr.vmem [resolvable:$true] %s3137_s12 }
  0x30   :  { %v3339_v56 = vor.u32 %v4614_v55, %v3338_v54  ;;  %v4678_v58 = vld [vmem:[#allocation7 + $0x2ec] sm:$0xf0]  ;;  %v3434_v2 = vld [vmem:[#allocation7 + $0x1a0] sm:$0xf] }
  0x31   :  { %307 = vmatpush.bf16.msrb.mxu3 %v3167_v37  ;;  %333 = vmatpush.bf16.msrb.mxu1 %v3175_v38  ;;  %v3595_v60 = vor.u32 %v4678_v58, %v3594_v57  ;;  %v4610_v62 = vld [vmem:[#allocation7 + $0xcc] sm:$0xf0]  ;;  %v3562_v6 = vld [vmem:[#allocation7 + $0x2a0] sm:$0xf] }
  0x32   :  { %346 = vmatpush.bf16.msrb.mxu2 %v3179_v43  ;;  %v4674_v1 = vld [vmem:[#allocation7 + $0x2cc] sm:$0xf0]  ;;  %320 = vmatpush.bf16.msra.mxu0 %v3171_v51  ;;  %v3323_v5 = vor.u32 %v4610_v62, %v3322_v61  ;;  %v3306_v8 = vld [vmem:[#allocation7 + $0xa0] sm:$0xf] }
  0x33   :  { %v4638_v3 = vld [vmem:[#allocation7 + $0x1ac] sm:$0xf0]  ;;  %v3579_v4 = vor.u32 %v4674_v1, %v3578_v0  ;;  %v3418_v11 = vld [vmem:[#allocation7 + $0x180] sm:$0xf] }
  0x34   :  { %v4670_v7 = vld [vmem:[#allocation7 + $0x2ac] sm:$0xf0]  ;;  %v3435_v10 = vor.u32 %v4638_v3, %v3434_v2  ;;  %v3290_v15 = vld [vmem:[#allocation7 + $0x80] sm:$0xf] }
  0x35   :  { %358 = vmatpush.bf16.msra.mxu3 %v3215_v47  ;;  %1957 = vmatpush.bf16.msra.mxu1 %v3467_v52  ;;  %v4606_v9 = vld [vmem:[#allocation7 + $0xac] sm:$0xf0]  ;;  %v3563_v13 = vor.u32 %v4670_v7, %v3562_v6  ;;  %v3546_v16 = vld [vmem:[#allocation7 + $0x280] sm:$0xf] }
  0x36   :  { %1970 = vmatpush.bf16.msra.mxu2 %v3595_v60  ;;  %1944 = vmatpush.bf16.msrb.mxu0 %v3339_v56  ;;  %v4634_v12 = vld [vmem:[#allocation7 + $0x18c] sm:$0xf0]  ;;  %v3307_v14 = vor.u32 %v4606_v9, %v3306_v8  ;;  %v3722_v19 = vld [vmem:[#allocation7 + $0x3e0] sm:$0xf] }
  0x37   :  { %3220 = vmatmul.msk.bf16.vlgmr.msra.gmra.mxu0 %vm257_vm0, %v5240_v25  ;;  %v4666_v17 = vld [vmem:[#allocation7 + $0x28c] sm:$0xf0]  ;;  %v3419_v21 = vor.u32 %v4634_v12, %v3418_v11  ;;  %v3402_v22 = vld [vmem:[#allocation7 + $0x160] sm:$0xf] }
  0x38   :  { %v4602_v18 = vld [vmem:[#allocation7 + $0x8c] sm:$0xf0]  ;;  %v3547_v24 = vor.u32 %v4666_v17, %v3546_v16  ;;  %v3274_v27 = vld [vmem:[#allocation7 + $0x60] sm:$0xf] }
  0x39   :  { %359 = vmatpush.bf16.msra.mxu3 %v3183_v59  ;;  %1958 = vmatpush.bf16.msra.mxu1 %v3451_v63  ;;  %v4710_v20 = vld [vmem:[#allocation7 + $0x3ec] sm:$0xf0]  ;;  %v3291_v26 = vor.u32 %v4602_v18, %v3290_v15  ;;  %v3530_v28 = vld [vmem:[#allocation7 + $0x260] sm:$0xf] }
  0x3a   :  { %1971 = vmatpush.bf16.msra.mxu2 %v3579_v4  ;;  %1945 = vmatpush.bf16.msrb.mxu0 %v3323_v5  ;;  %v4630_v23 = vld [vmem:[#allocation7 + $0x16c] sm:$0xf0]  ;;  %v3723_v30 = vor.u32 %v4710_v20, %v3722_v19  ;;  %v3706_v32 = vld [vmem:[#allocation7 + $0x3c0] sm:$0xf] }
  0x3b   :  { %v4662_v29 = vld [vmem:[#allocation7 + $0x26c] sm:$0xf0]  ;;  %v3403_v34 = vor.u32 %v4630_v23, %v3402_v22  ;;  %v3386_v35 = vld [vmem:[#allocation7 + $0x140] sm:$0xf] }
  0x3c   :  { %3219 = vmatmul.msk.bf16.vlgmr.msrb.gmra.mxu3 %vm257_vm0, %v5240_v25  ;;  %v4598_v31 = vld [vmem:[#allocation7 + $0x6c] sm:$0xf0]  ;;  %3221 = vmatmul.msk.bf16.vlgmr.msrb.gmra.mxu1 %vm257_vm0, %v5240_v25  ;;  %v3531_v37 = vor.u32 %v4662_v29, %v3530_v28  ;;  %v3258_v39 = vld [vmem:[#allocation7 + $0x40] sm:$0xf] }
  0x3d   :  { %1959 = vmatpush.bf16.msra.mxu1 %v3435_v10  ;;  %v4706_v33 = vld [vmem:[#allocation7 + $0x3cc] sm:$0xf0]  ;;  %v3275_v38 = vor.u32 %v4598_v31, %v3274_v27  ;;  %1983 = vmatpush.bf16.msrb.mxu3 %v3723_v30  ;;  %v3514_v40 = vld [vmem:[#allocation7 + $0x240] sm:$0xf] }
  0x3e   :  { %1972 = vmatpush.bf16.msra.mxu2 %v3563_v13  ;;  %1946 = vmatpush.bf16.msrb.mxu0 %v3307_v14  ;;  %v4626_v36 = vld [vmem:[#allocation7 + $0x14c] sm:$0xf0]  ;;  %v3707_v42 = vor.u32 %v4706_v33, %v3706_v32  ;;  %v3690_v44 = vld [vmem:[#allocation7 + $0x3a0] sm:$0xf] }
  0x3f   :  { %3222 = vmatmul.msk.bf16.vlgmr.msrb.gmra.mxu2 %vm257_vm0, %v5240_v25  ;;  %v4658_v41 = vld [vmem:[#allocation7 + $0x24c] sm:$0xf0]  ;;  %v3387_v46 = vor.u32 %v4626_v36, %v3386_v35  ;;  %v3370_v47 = vld [vmem:[#allocation7 + $0x120] sm:$0xf] }
  0x40   :  { %v4594_v43 = vld [vmem:[#allocation7 + $0x4c] sm:$0xf0]  ;;  %v3515_v49 = vor.u32 %v4658_v41, %v3514_v40  ;;  %v3242_v51 = vld [vmem:[#allocation7 + $0x20] sm:$0xf] }
  0x41   :  { %1960 = vmatpush.bf16.msra.mxu1 %v3419_v21  ;;  %v4702_v45 = vld [vmem:[#allocation7 + $0x3ac] sm:$0xf0]  ;;  %v3259_v50 = vor.u32 %v4594_v43, %v3258_v39  ;;  %1984 = vmatpush.bf16.msrb.mxu3 %v3707_v42  ;;  %v3498_v52 = vld [vmem:[#allocation7 + $0x220] sm:$0xf] }
  0x42   :  { %1973 = vmatpush.bf16.msra.mxu2 %v3547_v24  ;;  %1947 = vmatpush.bf16.msrb.mxu0 %v3291_v26  ;;  %v4622_v48 = vld [vmem:[#allocation7 + $0x12c] sm:$0xf0]  ;;  %v3691_v54 = vor.u32 %v4702_v45, %v3690_v44  ;;  %v3674_v56 = vld [vmem:[#allocation7 + $0x380] sm:$0xf] }
  0x43   :  { %v4654_v53 = vld [vmem:[#allocation7 + $0x22c] sm:$0xf0]  ;;  %v3371_v58 = vor.u32 %v4622_v48, %v3370_v47  ;;  %v3354_v59 = vld [vmem:[#allocation7 + $0x100] sm:$0xf] }
  0x44   :  { %v4590_v55 = vld [vmem:[#allocation7 + $0x2c] sm:$0xf0]  ;;  %v3978_v61 = vld [vmem:[#allocation7 + $0x5e0] sm:$0xf]  ;;  %v3499_v62 = vor.u32 %v4654_v53, %v3498_v52 }
  0x45   :  { %1961 = vmatpush.bf16.msra.mxu1 %v3403_v34  ;;  %v4698_v57 = vld [vmem:[#allocation7 + $0x38c] sm:$0xf0]  ;;  %v3243_v0 = vor.u32 %v4590_v55, %v3242_v51  ;;  %1985 = vmatpush.bf16.msrb.mxu3 %v3691_v54  ;;  %v3482_v1 = vld [vmem:[#allocation7 + $0x200] sm:$0xf] }
  0x46   :  { %1974 = vmatpush.bf16.msra.mxu2 %v3531_v37  ;;  %1948 = vmatpush.bf16.msrb.mxu0 %v3275_v38  ;;  %v4618_v60 = vld [vmem:[#allocation7 + $0x10c] sm:$0xf0]  ;;  %v3675_v3 = vor.u32 %v4698_v57, %v3674_v56  ;;  %v3226_v4 = vld [vmem:[#allocation7] sm:$0xf] }
  0x47   :  { %v4774_v63 = vld [vmem:[#allocation7 + $0x5ec] sm:$0xf0]  ;;  %v3850_v6 = vld [vmem:[#allocation7 + $0x4e0] sm:$0xf]  ;;  %v3355_v10 = vor.u32 %v4618_v60, %v3354_v59 }
  0x48   :  { %v4650_v2 = vld [vmem:[#allocation7 + $0x20c] sm:$0xf0]  ;;  %v4106_v8 = vld [vmem:[#allocation7 + $0x6e0] sm:$0xf]  ;;  %v3979_v14 = vor.u32 %v4774_v63, %v3978_v61 }
  0x49   :  { %1962 = vmatpush.bf16.msra.mxu1 %v3387_v46  ;;  %v4586_v5 = vld [vmem:[#allocation7 + $0xc] sm:$0xf0]  ;;  %v3483_v11 = vor.u32 %v4650_v2, %v3482_v1  ;;  %v3658_v12 = vld [vmem:[#allocation7 + $0x360] sm:$0xf]  ;;  %1986 = vmatpush.bf16.msrb.mxu3 %v3675_v3 }
  0x4a   :  { %1975 = vmatpush.bf16.msra.mxu2 %v3515_v49  ;;  %1949 = vmatpush.bf16.msrb.mxu0 %v3259_v50  ;;  %v4742_v7 = vld [vmem:[#allocation7 + $0x4ec] sm:$0xf0]  ;;  %v3962_v15 = vld [vmem:[#allocation7 + $0x5c0] sm:$0xf]  ;;  %v3227_v16 = vor.u32 %v4586_v5, %v3226_v4 }
  0x4b   :  { %v4806_v9 = vld [vmem:[#allocation7 + $0x6ec] sm:$0xf0]  ;;  %v3851_v18 = vor.u32 %v4742_v7, %v3850_v6  ;;  %v3834_v20 = vld [vmem:[#allocation7 + $0x4c0] sm:$0xf] }
  0x4c   :  { %v4694_v13 = vld [vmem:[#allocation7 + $0x36c] sm:$0xf0]  ;;  %3223 = vmatmul.msk.bf16.vlgmr.msra.gmra.mxu3 %vm257_vm0, %v5240_v25  ;;  %v4107_v19 = vor.u32 %v4806_v9, %v4106_v8  ;;  %v4090_v23 = vld [vmem:[#allocation7 + $0x6c0] sm:$0xf] }
  0x4d   :  { %1963 = vmatpush.bf16.msra.mxu1 %v3371_v58  ;;  %v4770_v17 = vld [vmem:[#allocation7 + $0x5cc] sm:$0xf0]  ;;  %v3659_v21 = vor.u32 %v4694_v13, %v3658_v12  ;;  %v3642_v26 = vld [vmem:[#allocation7 + $0x340] sm:$0xf] }
  0x4e   :  { %1976 = vmatpush.bf16.msra.mxu2 %v3499_v62  ;;  %1950 = vmatpush.bf16.msrb.mxu0 %v3243_v0  ;;  %v4738_v22 = vld [vmem:[#allocation7 + $0x4cc] sm:$0xf0]  ;;  %v3963_v28 = vor.u32 %v4770_v17, %v3962_v15  ;;  %v3946_v29 = vld [vmem:[#allocation7 + $0x5a0] sm:$0xf] }
  0x4f   :  { %v4802_v24 = vld [vmem:[#allocation7 + $0x6cc] sm:$0xf0]  ;;  %v3835_v25 = vor.u32 %v4738_v22, %v3834_v20  ;;  %v3818_v32 = vld [vmem:[#allocation7 + $0x4a0] sm:$0xf]  ;;  %1987 = vmatpush.bf16.msrb.mxu3 %v3659_v21 }
  0x50   :  { %v4690_v27 = vld [vmem:[#allocation7 + $0x34c] sm:$0xf0]  ;;  %v4091_v31 = vor.u32 %v4802_v24, %v4090_v23  ;;  %v4074_v35 = vld [vmem:[#allocation7 + $0x6a0] sm:$0xf] }
  0x51   :  { %1964 = vmatpush.bf16.msra.mxu1 %v3355_v10  ;;  %v4766_v30 = vld [vmem:[#allocation7 + $0x5ac] sm:$0xf0]  ;;  %v3643_v33 = vor.u32 %v4690_v27, %v3642_v26  ;;  %v3626_v37 = vld [vmem:[#allocation7 + $0x320] sm:$0xf] }
  0x52   :  { %1977 = vmatpush.bf16.msra.mxu2 %v3483_v11  ;;  %1951 = vmatpush.bf16.msrb.mxu0 %v3227_v16  ;;  %v4734_v34 = vld [vmem:[#allocation7 + $0x4ac] sm:$0xf0]  ;;  %v3947_v39 = vor.u32 %v4766_v30, %v3946_v29  ;;  %v3930_v40 = vld [vmem:[#allocation7 + $0x580] sm:$0xf] }
  0x53   :  { %v4798_v36 = vld [vmem:[#allocation7 + $0x6ac] sm:$0xf0]  ;;  %v3819_v42 = vor.u32 %v4734_v34, %v3818_v32  ;;  %v3802_v44 = vld [vmem:[#allocation7 + $0x480] sm:$0xf]  ;;  %1988 = vmatpush.bf16.msrb.mxu3 %v3643_v33 }
  0x54   :  { %v4686_v38 = vld [vmem:[#allocation7 + $0x32c] sm:$0xf0]  ;;  %v4075_v43 = vor.u32 %v4798_v36, %v4074_v35  ;;  %v4058_v47 = vld [vmem:[#allocation7 + $0x680] sm:$0xf] }
  0x55   :  { %2009 = vmatpush.bf16.msrb.mxu1 %v3979_v14  ;;  %v4762_v41 = vld [vmem:[#allocation7 + $0x58c] sm:$0xf0]  ;;  %v3627_v45 = vor.u32 %v4686_v38, %v3626_v37  ;;  %v3610_v49 = vld [vmem:[#allocation7 + $0x300] sm:$0xf] }
  0x56   :  { %1996 = vmatpush.bf16.msra.mxu0 %v3851_v18  ;;  %2022 = vmatpush.bf16.msrb.mxu2 %v4107_v19  ;;  %v4730_v46 = vld [vmem:[#allocation7 + $0x48c] sm:$0xf0]  ;;  %v3931_v51 = vor.u32 %v4762_v41, %v3930_v40  ;;  %v3914_v52 = vld [vmem:[#allocation7 + $0x560] sm:$0xf] }
  0x57   :  { %v4794_v48 = vld [vmem:[#allocation7 + $0x68c] sm:$0xf0]  ;;  %v3803_v54 = vor.u32 %v4730_v46, %v3802_v44  ;;  %1989 = vmatpush.bf16.msrb.mxu3 %v3627_v45  ;;  %v3898_v58 = vld [vmem:[#allocation7 + $0x540] sm:$0xf]  ;;  %v5164_v45 = vmov 0   ;;  %v5262_v46 = vld [vmem:[%s5459_s1] sm:$0xff] }
  0x58   :  { %v4682_v50 = vld [vmem:[#allocation7 + $0x30c] sm:$0xf0]  ;;  %v4059_v55 = vor.u32 %v4794_v48, %v4058_v47  ;;  %v3786_v61 = vld [vmem:[#allocation7 + $0x460] sm:$0xf]  ;;  %4940 = vset.pattern.permute.xlu0 %v5164_v45  ;;  %4944 = vset.pattern.permute.xlu2 %v5164_v45 }
  0x59   :  { %2010 = vmatpush.bf16.msrb.mxu1 %v3963_v28  ;;  %v4758_v53 = vld [vmem:[#allocation7 + $0x56c] sm:$0xf0]  ;;  %v3611_v56 = vor.u32 %v4682_v50, %v3610_v49  ;;  %v4042_v63 = vld [vmem:[#allocation7 + $0x660] sm:$0xf]  ;;  %643 = vperm.xlu0 %4940, %v5262_v46   ;;  %v5269_v50 = vld [vmem:[%s5466_s8] sm:$0xff] }
  0x5a   :  { %1997 = vmatpush.bf16.msra.mxu0 %v3835_v25  ;;  %2023 = vmatpush.bf16.msrb.mxu2 %v4091_v31  ;;  %v3915_v57 = vor.u32 %v4758_v53, %v3914_v52  ;;  %v4754_v59 = vld [vmem:[#allocation7 + $0x54c] sm:$0xf0]  ;;  %v4234_v2 = vld [vmem:[#allocation7 + $0x7e0] sm:$0xf] }
  0x5b   :  { %1990 = vmatpush.bf16.msrb.mxu3 %v3611_v56  ;;  %v3899_v60 = vor.u32 %v4754_v59, %v3898_v58  ;;  %v4726_v62 = vld [vmem:[#allocation7 + $0x46c] sm:$0xf0]  ;;  %v3882_v6 = vld [vmem:[#allocation7 + $0x520] sm:$0xf]  ;;  %v3468_v58 = vld [vmem:[#allocation7 + $0x1f0] sm:$0xf0] }
  0x5c   :  { %v3787_v0 = vor.u32 %v4726_v62, %v3786_v61  ;;  %v4790_v1 = vld [vmem:[#allocation7 + $0x66c] sm:$0xf0]  ;;  %v3770_v9 = vld [vmem:[#allocation7 + $0x440] sm:$0xf]  ;;  %v161_v59 = vperm.slane %v5269_v50, 0  ;;  %v163_v61 = vperm.slane %v5269_v50, 2 }
  0x5d   :  { %2011 = vmatpush.bf16.msrb.mxu1 %v3947_v39  ;;  %v4838_v3 = vld [vmem:[#allocation7 + $0x7ec] sm:$0xf0]  ;;  %v4043_v4 = vor.u32 %v4790_v1, %v4042_v63  ;;  %v4026_v11 = vld [vmem:[#allocation7 + $0x640] sm:$0xf]  ;;  %v4640_v1 = vld [vmem:[#allocation7 + $0x1c4] sm:$0xf] }
  0x5e   :  { %1998 = vmatpush.bf16.msra.mxu0 %v3819_v42  ;;  %2024 = vmatpush.bf16.msrb.mxu2 %v4075_v43  ;;  %v4235_v5 = vor.u32 %v4838_v3, %v4234_v2  ;;  %v4750_v7 = vld [vmem:[#allocation7 + $0x52c] sm:$0xf0]  ;;  %v4218_v14 = vld [vmem:[#allocation7 + $0x7c0] sm:$0xf]  ;;  %v3452_v2 = vld [vmem:[#allocation7 + $0x1d0] sm:$0xf0] }
  0x5f   :  { %v3883_v8 = vor.u32 %v4750_v7, %v3882_v6  ;;  %v4722_v10 = vld [vmem:[#allocation7 + $0x44c] sm:$0xf0]  ;;  %v3866_v18 = vld [vmem:[#allocation7 + $0x500] sm:$0xf]  ;;  %v3340_v6 = vld [vmem:[#allocation7 + $0xf0] sm:$0xf0] }
  0x60   :  { %2035 = vmatpush.bf16.msra.mxu3 %v4235_v5  ;;  %v3771_v12 = vor.u32 %v4722_v10, %v3770_v9  ;;  %v4786_v13 = vld [vmem:[#allocation7 + $0x64c] sm:$0xf0]  ;;  %v3754_v21 = vld [vmem:[#allocation7 + $0x420] sm:$0xf]  ;;  %v4612_v5 = vld [vmem:[#allocation7 + $0xe4] sm:$0xf] }
  0x61   :  { %2012 = vmatpush.bf16.msrb.mxu1 %v3931_v51  ;;  %v4834_v15 = vld [vmem:[#allocation7 + $0x7cc] sm:$0xf0]  ;;  %v4027_v16 = vor.u32 %v4786_v13, %v4026_v11  ;;  %v4010_v23 = vld [vmem:[#allocation7 + $0x620] sm:$0xf]  ;;  %v3596_v9 = vld [vmem:[#allocation7 + $0x2f0] sm:$0xf0] }
  0x62   :  { %1999 = vmatpush.bf16.msra.mxu0 %v3803_v54  ;;  %2025 = vmatpush.bf16.msrb.mxu2 %v4059_v55  ;;  %v4219_v17 = vor.u32 %v4834_v15, %v4218_v14  ;;  %v4746_v19 = vld [vmem:[#allocation7 + $0x50c] sm:$0xf0]  ;;  %v4202_v27 = vld [vmem:[#allocation7 + $0x7a0] sm:$0xf]  ;;  %v162_v54 = vperm.slane %v5269_v50, 1  ;;  %v3343_v15 = vor.u32 %v4612_v5, %v3340_v6 }
  0x63   :  { %v3867_v20 = vor.u32 %v4746_v19, %v3866_v18  ;;  %v4718_v22 = vld [vmem:[#allocation7 + $0x42c] sm:$0xf0]  ;;  %v3738_v25 = vld [vmem:[#allocation7 + $0x400] sm:$0xf]  ;;  %v3276_v6 = vld [vmem:[#allocation7 + $0x70] sm:$0xf0] }
  0x64   :  { %2036 = vmatpush.bf16.msra.mxu3 %v4219_v17  ;;  %v3755_v24 = vor.u32 %v4718_v22, %v3754_v21  ;;  %v4782_v26 = vld [vmem:[#allocation7 + $0x62c] sm:$0xf0]  ;;  %v3994_v32 = vld [vmem:[#allocation7 + $0x600] sm:$0xf]  ;;  %v3436_v17 = vld [vmem:[#allocation7 + $0x1b0] sm:$0xf0] }
  0x65   :  { %2013 = vmatpush.bf16.msrb.mxu1 %v3915_v57  ;;  %v4830_v28 = vld [vmem:[#allocation7 + $0x7ac] sm:$0xf0]  ;;  %v4011_v29 = vor.u32 %v4782_v26, %v4010_v23  ;;  %v4186_v35 = vld [vmem:[#allocation7 + $0x780] sm:$0xf]  ;;  %v4644_v57 = vld [vmem:[#allocation7 + $0x1e4] sm:$0xf] }
  0x66   :  { %2000 = vmatpush.bf16.msra.mxu0 %v3787_v0  ;;  %2026 = vmatpush.bf16.msrb.mxu2 %v4043_v4  ;;  %v4203_v30 = vor.u32 %v4830_v28, %v4202_v27  ;;  %v4714_v31 = vld [vmem:[#allocation7 + $0x40c] sm:$0xf0]  ;;  %v4170_v39 = vld [vmem:[#allocation7 + $0x760] sm:$0xf]  ;;  %v3471_v62 = vor.u32 %v4644_v57, %v3468_v58  ;;  %v3324_v21 = vld [vmem:[#allocation7 + $0xd0] sm:$0xf0] }
  0x67   :  { %v3739_v33 = vor.u32 %v4714_v31, %v3738_v25  ;;  %v4778_v34 = vld [vmem:[#allocation7 + $0x60c] sm:$0xf0]  ;;  %v4154_v42 = vld [vmem:[#allocation7 + $0x740] sm:$0xf]  ;;  %v4672_v23 = vld [vmem:[#allocation7 + $0x2c4] sm:$0xf] }
  0x68   :  { %2037 = vmatpush.bf16.msra.mxu3 %v4203_v30  ;;  %v4826_v36 = vld [vmem:[#allocation7 + $0x78c] sm:$0xf0]  ;;  %v3995_v37 = vor.u32 %v4778_v34, %v3994_v32  ;;  %v4138_v47 = vld [vmem:[#allocation7 + $0x720] sm:$0xf]  ;;  %v166_v28 = vperm.slane %v5269_v50, 5  ;;  %v165_v31 = vperm.slane %v5269_v50, 4 }
  0x69   :  { %2014 = vmatpush.bf16.msrb.mxu1 %v3899_v60  ;;  %v4187_v38 = vor.u32 %v4826_v36, %v4186_v35  ;;  %v4822_v40 = vld [vmem:[#allocation7 + $0x76c] sm:$0xf0]  ;;  %v4122_v51 = vld [vmem:[#allocation7 + $0x700] sm:$0xf]  ;;  %v4632_v30 = vld [vmem:[#allocation7 + $0x184] sm:$0xf] }
  0x6a   :  { %2001 = vmatpush.bf16.msra.mxu0 %v3771_v12  ;;  %2027 = vmatpush.bf16.msrb.mxu2 %v4027_v16  ;;  %v4171_v41 = vor.u32 %v4822_v40, %v4170_v39  ;;  %v4818_v43 = vld [vmem:[#allocation7 + $0x74c] sm:$0xf0]  ;;  %v3455_v12 = vor.u32 %v4640_v1, %v3452_v2  ;;  %v4636_v16 = vld [vmem:[#allocation7 + $0x1a4] sm:$0xf]  ;;  %v3420_v25 = vld [vmem:[#allocation7 + $0x190] sm:$0xf0] }
  0x6b   :  { %v4155_v44 = vor.u32 %v4818_v43, %v4154_v42  ;;  %v4814_v48 = vld [vmem:[#allocation7 + $0x72c] sm:$0xf0]  ;;  %v3439_v26 = vor.u32 %v4636_v16, %v3436_v17  ;;  %v4604_v34 = vld [vmem:[#allocation7 + $0xa4] sm:$0xf]  ;;  %v3308_v35 = vld [vmem:[#allocation7 + $0xb0] sm:$0xf0]  ;;  %v3423_v39 = vor.u32 %v4632_v30, %v3420_v25 }
  0x6c   :  { %2038 = vmatpush.bf16.msra.mxu3 %v4187_v38  ;;  %v4139_v49 = vor.u32 %v4814_v48, %v4138_v47  ;;  %v4810_v52 = vld [vmem:[#allocation7 + $0x70c] sm:$0xf0]  ;;  %v4668_v36 = vld [vmem:[#allocation7 + $0x2a4] sm:$0xf]  ;;  %v3311_v42 = vor.u32 %v4604_v34, %v3308_v35  ;;  %v3404_v47 = vld [vmem:[#allocation7 + $0x170] sm:$0xf0] }
  0x6d   :  { %2015 = vmatpush.bf16.msrb.mxu1 %v3883_v8  ;;  %v4123_v53 = vor.u32 %v4810_v52, %v4122_v51  ;;  %v4676_v8 = vld [vmem:[#allocation7 + $0x2e4] sm:$0xf]  ;;  %v3292_v52 = vld [vmem:[#allocation7 + $0x90] sm:$0xf0] }
  0x6e   :  { %2002 = vmatpush.bf16.msra.mxu0 %v3755_v24  ;;  %2028 = vmatpush.bf16.msrb.mxu2 %v4011_v29  ;;  %v3599_v19 = vor.u32 %v4676_v8, %v3596_v9  ;;  %v3580_v24 = vld [vmem:[#allocation7 + $0x2d0] sm:$0xf0]  ;;  %v4600_v51 = vld [vmem:[#allocation7 + $0x84] sm:$0xf] }
  0x6f   :  { %v3532_v8 = vld [vmem:[#allocation7 + $0x270] sm:$0xf0]  ;;  %v4620_v16 = vld [vmem:[#allocation7 + $0x124] sm:$0xf] }
  0x70   :  { %2039 = vmatpush.bf16.msra.mxu3 %v4171_v41  ;;  %v3372_v17 = vld [vmem:[#allocation7 + $0x130] sm:$0xf0]  ;;  %v4616_v34 = vld [vmem:[#allocation7 + $0x104] sm:$0xf] }
  0x71   :  { %2016 = vmatpush.bf16.msrb.mxu1 %v3867_v20  ;;  %v4608_v20 = vld [vmem:[#allocation7 + $0xc4] sm:$0xf]  ;;  %v3516_v30 = vld [vmem:[#allocation7 + $0x250] sm:$0xf0]  ;;  %v3375_v25 = vor.u32 %v4620_v16, %v3372_v17 }
  0x72   :  { %2003 = vmatpush.bf16.msra.mxu0 %v3739_v33  ;;  %2029 = vmatpush.bf16.msrb.mxu2 %v3995_v37  ;;  %v3327_v29 = vor.u32 %v4608_v20, %v3324_v21  ;;  %v3583_v33 = vor.u32 %v4672_v23, %v3580_v24  ;;  %v3564_v37 = vld [vmem:[#allocation7 + $0x2b0] sm:$0xf0]  ;;  %v4592_v24 = vld [vmem:[#allocation7 + $0x44] sm:$0xf] }
  0x73   :  { %v3567_v48 = vor.u32 %v4668_v36, %v3564_v37  ;;  %v3356_v35 = vld [vmem:[#allocation7 + $0x110] sm:$0xf0] }
  0x74   :  { %2040 = vmatpush.bf16.msra.mxu3 %v4155_v44  ;;  %v4628_v44 = vld [vmem:[#allocation7 + $0x164] sm:$0xf] }
  0x75   :  { %v3407_v57 = vor.u32 %v4628_v44, %v3404_v47  ;;  %v4652_v44 = vld [vmem:[#allocation7 + $0x224] sm:$0xf]  ;;  %v3500_v47 = vld [vmem:[#allocation7 + $0x230] sm:$0xf0] }
  0x78   :  { %2041 = vmatpush.bf16.msra.mxu3 %v4139_v49  ;;  %v164_v49 = vperm.slane %v5269_v50, 3 }
  0x7c   :  { %2042 = vmatpush.bf16.msra.mxu3 %v4123_v53 }
  0xa9   :  { %v283_v55 = vpop.f32.mrf.mxu1 }
  0xaa   :  { %v284_v56 = vadd.f32 %v283_v55, %v162_v54  ;;  %v167_v54 = vperm.slane %v5269_v50, 6  ;;  %v4664_v55 = vld [vmem:[#allocation7 + $0x284] sm:$0xf] }
  0xac   :  { %v366_v60 = vmax.f32 %v284_v56, 0.0  ;;  %v3548_v56 = vld [vmem:[#allocation7 + $0x290] sm:$0xf0] }
  0xae   :  { %v5274_v63 = vpack.c.bf16 %v366_v60, %v366_v60 }
  0xaf   :  { %v270_v0 = vpop.f32.mrf.mxu3 }
  0xb0   :  { %v271_v3 = vadd.f32 %v270_v0, %v161_v59  ;;  %1965 = vmatmul.bf16.vlgmr.msra.gmra.mxu1 %v5274_v63  ;;  %v3388_v0 = vld [vmem:[#allocation7 + $0x150] sm:$0xf0] }
  0xb1   :  { %2061 = vmatpush.bf16.msra.mxu1 %v3471_v62  ;;  %v285_v11 = vpop.f32.mrf.mxu1  ;;  %v4624_v62 = vld [vmem:[#allocation7 + $0x144] sm:$0xf] }
  0xb2   :  { %v296_v4 = vpop.f32.mrf.mxu2  ;;  %v365_v10 = vmax.f32 %v271_v3, 0.0  ;;  %v3551_v3 = vor.u32 %v4664_v55, %v3548_v56  ;;  %v4708_v11 = vld [vmem:[#allocation7 + $0x3e4] sm:$0xf] }
  0xb3   :  { %v297_v7 = vadd.f32 %v296_v4, %v163_v61  ;;  %v3295_v61 = vor.u32 %v4600_v51, %v3292_v52  ;;  %v4596_v4 = vld [vmem:[#allocation7 + $0x64] sm:$0xf]  ;;  %v3692_v52 = vld [vmem:[#allocation7 + $0x3b0] sm:$0xf0] }
  0xb4   :  { %v322_v13 = vpop.f32.mrf.mxu0  ;;  %v5277_v18 = vpack.c.bf16 %v365_v10, %v365_v10  ;;  %v3391_v10 = vor.u32 %v4624_v62, %v3388_v0  ;;  %v3279_v21 = vor.u32 %v4596_v4, %v3276_v6  ;;  %v4700_v51 = vld [vmem:[#allocation7 + $0x3a4] sm:$0xf]  ;;  %v3676_v4 = vld [vmem:[#allocation7 + $0x390] sm:$0xf0] }
  0xb5   :  { %v367_v14 = vmax.f32 %v297_v7, 0.0  ;;  %2062 = vmatpush.bf16.msra.mxu1 %v3455_v12  ;;  %v323_v43 = vadd.f32 %v322_v13, %v165_v31  ;;  %v4660_v7 = vld [vmem:[#allocation7 + $0x264] sm:$0xf]  ;;  %v3724_v12 = vld [vmem:[#allocation7 + $0x3f0] sm:$0xf0]  ;;  %v3695_v62 = vor.u32 %v4700_v51, %v3692_v52 }
  0xb6   :  { %1952 = vmatmul.bf16.vlgmr.msrb.gmra.mxu0 %v5277_v18  ;;  %v3535_v23 = vor.u32 %v4660_v7, %v3532_v8  ;;  %v4704_v31 = vld [vmem:[#allocation7 + $0x3c4] sm:$0xf]  ;;  %v3852_v6 = vld [vmem:[#allocation7 + $0x4f0] sm:$0xf0] }
  0xb7   :  { %v5279_v22 = vpack.c.bf16 %v367_v14, %v367_v14  ;;  %2048 = vmatpush.bf16.msrb.mxu0 %v3343_v15  ;;  %v272_v27 = vpop.f32.mrf.mxu3  ;;  %v369_v60 = vmax.f32 %v323_v43, 0.0  ;;  %v3244_v43 = vld [vmem:[#allocation7 + $0x30] sm:$0xf0]  ;;  %v4768_v55 = vld [vmem:[#allocation7 + $0x5c4] sm:$0xf] }
  0xb8   :  { %v3727_v27 = vor.u32 %v4708_v11, %v3724_v12  ;;  %v4648_v0 = vld [vmem:[#allocation7 + $0x204] sm:$0xf]  ;;  %v3628_v52 = vld [vmem:[#allocation7 + $0x330] sm:$0xf0] }
  0xb9   :  { %1978 = vmatmul.bf16.vlgmr.msra.gmra.mxu2 %v5279_v22  ;;  %2063 = vmatpush.bf16.msra.mxu1 %v3439_v26  ;;  %v335_v38 = vpop.f32.mrf.mxu1  ;;  %v5290_v14 = vpack.c.bf16 %v369_v60, %v369_v60  ;;  %v4584_v60 = vld [vmem:[#allocation7 + $0x4] sm:$0xf] }
  0xba   :  { %2074 = vmatpush.bf16.msra.mxu2 %v3599_v19  ;;  %v298_v32 = vpop.f32.mrf.mxu2  ;;  %v336_v41 = vadd.f32 %v335_v38, %v166_v28  ;;  %v5165_v19 = vmov 2   ;;  %v3260_v28 = vld [vmem:[#allocation7 + $0x50] sm:$0xf0]  ;;  %v4772_v38 = vld [vmem:[#allocation7 + $0x5e4] sm:$0xf] }
  0xbb   :  { %2049 = vmatpush.bf16.msrb.mxu0 %v3327_v29  ;;  %4942 = vset.pattern.permute.xlu1 %v5165_v19  ;;  %v4656_v29 = vld [vmem:[#allocation7 + $0x244] sm:$0xf]  ;;  %v3708_v32 = vld [vmem:[#allocation7 + $0x3d0] sm:$0xf0]  ;;  %v3263_v36 = vor.u32 %v4592_v24, %v3260_v28 }
  0xbc   :  { %v324_v40 = vpop.f32.mrf.mxu0  ;;  %v370_v53 = vmax.f32 %v336_v41, 0.0  ;;  %2385 = vperm.xlu1 %4942, %v5262_v46   ;;  %v3519_v37 = vor.u32 %v4656_v29, %v3516_v30  ;;  %v4804_v8 = vld [vmem:[#allocation7 + $0x6e4] sm:$0xf]  ;;  %v4092_v30 = vld [vmem:[#allocation7 + $0x6d0] sm:$0xf0] }
  0xbd   :  { %2064 = vmatpush.bf16.msra.mxu1 %v3423_v39  ;;  %v3980_v39 = vld [vmem:[#allocation7 + $0x5f0] sm:$0xf0]  ;;  %v4588_v40 = vld [vmem:[#allocation7 + $0x24] sm:$0xf] }
  0xbe   :  { %2075 = vmatpush.bf16.msra.mxu2 %v3583_v33  ;;  %v5287_v58 = vpack.c.bf16 %v370_v53, %v370_v53  ;;  %v3983_v53 = vor.u32 %v4772_v38, %v3980_v39  ;;  %v3247_v56 = vor.u32 %v4588_v40, %v3244_v43  ;;  %v4692_v19 = vld [vmem:[#allocation7 + $0x364] sm:$0xf]  ;;  %v3820_v38 = vld [vmem:[#allocation7 + $0x4b0] sm:$0xf0] }
  0xbf   :  { %2050 = vmatpush.bf16.msrb.mxu0 %v3311_v42  ;;  %v309_v59 = vpop.f32.mrf.mxu3  ;;  %v3711_v42 = vor.u32 %v4704_v31, %v3708_v32  ;;  %v4736_v24 = vld [vmem:[#allocation7 + $0x4c4] sm:$0xf]  ;;  %v3932_v32 = vld [vmem:[#allocation7 + $0x590] sm:$0xf0] }
  0xc0   :  { %v310_v1 = vadd.f32 %v309_v59, %v164_v49  ;;  %2017 = vmatmul.bf16.vlgmr.msrb.gmra.mxu1 %v5287_v58  ;;  %v3359_v49 = vor.u32 %v4616_v34, %v3356_v35  ;;  %v3964_v59 = vld [vmem:[#allocation7 + $0x5d0] sm:$0xf0]  ;;  %v4800_v29 = vld [vmem:[#allocation7 + $0x6c4] sm:$0xf] }
  0xc1   :  { %2065 = vmatpush.bf16.msra.mxu1 %v3407_v57  ;;  %v337_v13 = vpop.f32.mrf.mxu1  ;;  %v3503_v57 = vor.u32 %v4652_v44, %v3500_v47  ;;  %v3967_v7 = vor.u32 %v4768_v55, %v3964_v59  ;;  %v4760_v31 = vld [vmem:[#allocation7 + $0x584] sm:$0xf]  ;;  %v3916_v44 = vld [vmem:[#allocation7 + $0x570] sm:$0xf0] }
  0xc2   :  { %2076 = vmatpush.bf16.msra.mxu2 %v3567_v48  ;;  %v348_v2 = vpop.f32.mrf.mxu2  ;;  %v368_v9 = vmax.f32 %v310_v1, 0.0  ;;  %v5166_v48 = vmov 1   ;;  %v3484_v1 = vld [vmem:[#allocation7 + $0x210] sm:$0xf0]  ;;  %v4764_v13 = vld [vmem:[#allocation7 + $0x5a4] sm:$0xf]  ;;  %v3935_v39 = vor.u32 %v4760_v31, %v3932_v32 }
  0xc3   :  { %v349_v5 = vadd.f32 %v348_v2, %v167_v54  ;;  %2051 = vmatpush.bf16.msrb.mxu0 %v3295_v61  ;;  %4941 = vset.pattern.permute.xlu0 %v5166_v48  ;;  %v168_v54 = vperm.slane %v5269_v50, 7  ;;  %v3228_v61 = vld [vmem:[#allocation7 + $0x10] sm:$0xf0]  ;;  %v4696_v2 = vld [vmem:[#allocation7 + $0x384] sm:$0xf]  ;;  %v3487_v12 = vor.u32 %v4648_v0, %v3484_v1 }
  0xc4   :  { %v5292_v20 = vpack.c.bf16 %v368_v9, %v368_v9  ;;  %2361 = vperm.xlu0 %4941, %v5262_v46   ;;  %v4108_v9 = vld [vmem:[#allocation7 + $0x6f0] sm:$0xf0]  ;;  %v3231_v11 = vor.u32 %v4584_v60, %v3228_v61  ;;  %v3679_v16 = vor.u32 %v4696_v2, %v3676_v4  ;;  %v4688_v35 = vld [vmem:[#allocation7 + $0x344] sm:$0xf]  ;;  %v4647_v31 = vld [vmem:[#allocation7 + $0x1f4] sm:$0xf0] }
  0xc5   :  { %v371_v15 = vmax.f32 %v349_v5, 0.0  ;;  %2066 = vmatpush.bf16.msra.mxu1 %v3391_v10  ;;  %v4740_v5 = vld [vmem:[#allocation7 + $0x4e4] sm:$0xf]  ;;  %v3900_v60 = vld [vmem:[#allocation7 + $0x550] sm:$0xf0] }
  0xc6   :  { %2077 = vmatpush.bf16.msra.mxu2 %v3551_v3  ;;  %1991 = vmatmul.bf16.vlgmr.msrb.gmra.mxu3 %v5292_v20  ;;  %v5167_v3 = vmov 3   ;;  %v3855_v17 = vor.u32 %v4740_v5, %v3852_v6  ;;  %v4796_v40 = vld [vmem:[#allocation7 + $0x6a4] sm:$0xf]  ;;  %v3612_v1 = vld [vmem:[#allocation7 + $0x310] sm:$0xf0] }
  0xc7   :  { %v5295_v26 = vpack.c.bf16 %v371_v15, %v371_v15  ;;  %2004 = vmatmul.bf16.vlgmr.msra.gmra.mxu0 %v5290_v14  ;;  %v311_v33 = vpop.f32.mrf.mxu3  ;;  %2087 = vmatpush.bf16.msrb.mxu3 %v3727_v27  ;;  %v3948_v15 = vld [vmem:[#allocation7 + $0x5b0] sm:$0xf0]  ;;  %v4756_v43 = vld [vmem:[#allocation7 + $0x564] sm:$0xf] }
  0xc8   :  { %2052 = vmatpush.bf16.msrb.mxu0 %v3279_v21  ;;  %4943 = vset.pattern.permute.xlu1 %v5167_v3  ;;  %v3660_v21 = vld [vmem:[#allocation7 + $0x370] sm:$0xf0]  ;;  %v3951_v28 = vor.u32 %v4764_v13, %v3948_v15  ;;  %v3919_v55 = vor.u32 %v4756_v43, %v3916_v44  ;;  %v4752_v59 = vld [vmem:[#allocation7 + $0x544] sm:$0xf]  ;;  %v4643_v43 = vld [vmem:[#allocation7 + $0x1d4] sm:$0xf0] }
  0xc9   :  { %2030 = vmatmul.bf16.vlgmr.msrb.gmra.mxu2 %v5295_v26  ;;  %2067 = vmatpush.bf16.msra.mxu1 %v3375_v25  ;;  %v3836_v27 = vld [vmem:[#allocation7 + $0x4d0] sm:$0xf0]  ;;  %v3663_v33 = vor.u32 %v4692_v19, %v3660_v21  ;;  %v4680_v0 = vld [vmem:[#allocation7 + $0x304] sm:$0xf]  ;;  %v3903_v6 = vor.u32 %v4752_v59, %v3900_v60  ;;  %v3602_v59 = vld [vmem:[#allocation7 + $0x2e8] sm:$0xf] }
  0xca   :  { %2078 = vmatpush.bf16.msra.mxu2 %v3535_v23  ;;  %v350_v41 = vpop.f32.mrf.mxu2  ;;  %2409 = vperm.xlu1 %4943, %v5262_v46   ;;  %v4111_v23 = vor.u32 %v4804_v8, %v4108_v9  ;;  %v3839_v34 = vor.u32 %v4736_v24, %v3836_v27  ;;  %v4724_v3 = vld [vmem:[#allocation7 + $0x464] sm:$0xf]  ;;  %v3788_v4 = vld [vmem:[#allocation7 + $0x470] sm:$0xf0]  ;;  %v4679_v60 = vld [vmem:[#allocation7 + $0x2f4] sm:$0xf0] }
  0xcb   :  { %2088 = vmatpush.bf16.msrb.mxu3 %v3711_v42  ;;  %v4076_v41 = vld [vmem:[#allocation7 + $0x6b0] sm:$0xf0]  ;;  %v4788_v5 = vld [vmem:[#allocation7 + $0x664] sm:$0xf] }
  0xcc   :  { %2053 = vmatpush.bf16.msrb.mxu0 %v3263_v36  ;;  %4945 = vset.pattern.permute.xlu0 %v5164_v45  ;;  %v4095_v36 = vor.u32 %v4800_v29, %v4092_v30  ;;  %v3644_v45 = vld [vmem:[#allocation7 + $0x350] sm:$0xf0]  ;;  %v4079_v51 = vor.u32 %v4796_v40, %v4076_v41  ;;  %v4748_v9 = vld [vmem:[#allocation7 + $0x524] sm:$0xf]  ;;  %v3474_v30 = vld [vmem:[#allocation7 + $0x1e8] sm:$0xf] }
  0xcd   :  { %2068 = vmatpush.bf16.msra.mxu1 %v3359_v49  ;;  %v3647_v47 = vor.u32 %v4688_v35, %v3644_v45  ;;  %v4684_v49 = vld [vmem:[#allocation7 + $0x324] sm:$0xf]  ;;  %v4236_v8 = vld [vmem:[#allocation7 + $0x7f0] sm:$0xf0]  ;;  %v3475_v40 = vor.u32 %v4647_v31, %v3474_v30 }
  0xce   :  { %2079 = vmatpush.bf16.msra.mxu2 %v3519_v37  ;;  %v4732_v37 = vld [vmem:[#allocation7 + $0x4a4] sm:$0xf]  ;;  %v3631_v61 = vor.u32 %v4684_v49, %v3628_v52  ;;  %v4220_v24 = vld [vmem:[#allocation7 + $0x7d0] sm:$0xf0] }
  0xcf   :  { %v361_v50 = vpop.f32.mrf.mxu3  ;;  %2089 = vmatpush.bf16.msrb.mxu3 %v3695_v62  ;;  %v3823_v48 = vor.u32 %v4732_v37, %v3820_v38  ;;  %v4784_v19 = vld [vmem:[#allocation7 + $0x644] sm:$0xf]  ;;  %v3756_v35 = vld [vmem:[#allocation7 + $0x430] sm:$0xf0] }
  0xd0   :  { %2054 = vmatpush.bf16.msrb.mxu0 %v3247_v56  ;;  %v362_v10 = vadd.f32 %v361_v50, %v168_v54  ;;  %2069 = vmatmul.bf16.vlgmr.msra.gmra.mxu1 %v5274_v63  ;;  %v3804_v54 = vld [vmem:[#allocation7 + $0x490] sm:$0xf0]  ;;  %v4792_v56 = vld [vmem:[#allocation7 + $0x684] sm:$0xf] }
  0xd1   :  { %2113 = vmatpush.bf16.msrb.mxu1 %v3983_v53  ;;  %v4728_v53 = vld [vmem:[#allocation7 + $0x484] sm:$0xf]  ;;  %v4044_v50 = vld [vmem:[#allocation7 + $0x670] sm:$0xf0] }
  0xd2   :  { %2080 = vmatpush.bf16.msra.mxu2 %v3503_v57  ;;  %v372_v46 = vmax.f32 %v362_v10, 0.0  ;;  %v4060_v57 = vld [vmem:[#allocation7 + $0x690] sm:$0xf0]  ;;  %v3807_v62 = vor.u32 %v4728_v53, %v3804_v54  ;;  %v4047_v13 = vor.u32 %v4788_v5, %v4044_v50  ;;  %v4744_v27 = vld [vmem:[#allocation7 + $0x504] sm:$0xf] }
  0xd3   :  { %2090 = vmatpush.bf16.msrb.mxu3 %v3679_v16  ;;  %v4063_v2 = vor.u32 %v4792_v56, %v4060_v57  ;;  %v3884_v10 = vld [vmem:[#allocation7 + $0x530] sm:$0xf0]  ;;  %v4720_v16 = vld [vmem:[#allocation7 + $0x444] sm:$0xf]  ;;  %v4615_v57 = vld [vmem:[#allocation7 + $0xf4] sm:$0xf0] }
  0xd4   :  { %v5305_v25 = vpack.c.bf16 %v372_v46, %v372_v46  ;;  %2055 = vmatpush.bf16.msrb.mxu0 %v3231_v11  ;;  %v3615_v11 = vor.u32 %v4680_v0, %v3612_v1  ;;  %v3887_v21 = vor.u32 %v4748_v9, %v3884_v10  ;;  %v4028_v46 = vld [vmem:[#allocation7 + $0x650] sm:$0xf0]  ;;  %v4828_v38 = vld [vmem:[#allocation7 + $0x7a4] sm:$0xf]  ;;  %v4639_v0 = vld [vmem:[#allocation7 + $0x1b4] sm:$0xf0] }
  0xd5   :  { %2114 = vmatpush.bf16.msrb.mxu1 %v3967_v7  ;;  %v4836_v7 = vld [vmem:[#allocation7 + $0x7e4] sm:$0xf]  ;;  %v4031_v32 = vor.u32 %v4784_v19, %v4028_v46  ;;  %v4012_v37 = vld [vmem:[#allocation7 + $0x630] sm:$0xf0]  ;;  %v3330_v50 = vld [vmem:[#allocation7 + $0xc8] sm:$0xf] }
  0xd6   :  { %2081 = vmatpush.bf16.msra.mxu2 %v3487_v12  ;;  %2043 = vmatmul.bf16.vlgmr.msra.gmra.mxu3 %v5305_v25  ;;  %v3791_v12 = vor.u32 %v4724_v3, %v3788_v4  ;;  %v4239_v15 = vor.u32 %v4836_v7, %v4236_v8  ;;  %v4712_v44 = vld [vmem:[#allocation7 + $0x404] sm:$0xf]  ;;  %v3740_v49 = vld [vmem:[#allocation7 + $0x410] sm:$0xf0]  ;;  %v3603_v4 = vor.u32 %v4679_v60, %v3602_v59  ;;  %v4611_v8 = vld [vmem:[#allocation7 + $0xd4] sm:$0xf0] }
  0xd7   :  { %2056 = vmatmul.bf16.vlgmr.msrb.gmra.mxu0 %v5277_v18  ;;  %v363_v42 = vpop.f32.mrf.mxu3  ;;  %2091 = vmatpush.bf16.msrb.mxu3 %v3663_v33  ;;  %v3996_v52 = vld [vmem:[#allocation7 + $0x610] sm:$0xf0]  ;;  %v4824_v53 = vld [vmem:[#allocation7 + $0x784] sm:$0xf]  ;;  %v3586_v9 = vld [vmem:[#allocation7 + $0x2c8] sm:$0xf] }
  0xd8   :  { %2100 = vmatpush.bf16.msra.mxu0 %v3855_v17  ;;  %v3772_v17 = vld [vmem:[#allocation7 + $0x450] sm:$0xf0]  ;;  %v3458_v42 = vld [vmem:[#allocation7 + $0x1c8] sm:$0xf]  ;;  %v4820_v5 = vld [vmem:[#allocation7 + $0x764] sm:$0xf] }
  0xd9   :  { %2115 = vmatpush.bf16.msrb.mxu1 %v3951_v28  ;;  %2082 = vmatmul.bf16.vlgmr.msra.gmra.mxu2 %v5279_v22  ;;  %v3868_v28 = vld [vmem:[#allocation7 + $0x510] sm:$0xf0]  ;;  %v3775_v29 = vor.u32 %v4720_v16, %v3772_v17  ;;  %v3459_v56 = vor.u32 %v4643_v43, %v3458_v42  ;;  %v4675_v10 = vld [vmem:[#allocation7 + $0x2d4] sm:$0xf0]  ;;  %v4816_v17 = vld [vmem:[#allocation7 + $0x744] sm:$0xf] }
  0xda   :  { %2126 = vmatpush.bf16.msrb.mxu2 %v4111_v23  ;;  %v4832_v23 = vld [vmem:[#allocation7 + $0x7c4] sm:$0xf]  ;;  %v3871_v45 = vor.u32 %v4744_v27, %v3868_v28  ;;  %v4188_v54 = vld [vmem:[#allocation7 + $0x790] sm:$0xf0]  ;;  %v3587_v16 = vor.u32 %v4675_v10, %v3586_v9  ;;  %v4671_v27 = vld [vmem:[#allocation7 + $0x2b4] sm:$0xf0] }
  0xdb   :  { %2092 = vmatpush.bf16.msrb.mxu3 %v3647_v47  ;;  %v4223_v33 = vor.u32 %v4832_v23, %v4220_v24  ;;  %v4156_v19 = vld [vmem:[#allocation7 + $0x750] sm:$0xf0]  ;;  %v4607_v23 = vld [vmem:[#allocation7 + $0xb4] sm:$0xf0]  ;;  %v3570_v24 = vld [vmem:[#allocation7 + $0x2a8] sm:$0xf] }
  0xdc   :  { %2101 = vmatpush.bf16.msra.mxu0 %v3839_v34  ;;  %v4716_v34 = vld [vmem:[#allocation7 + $0x424] sm:$0xf]  ;;  %v3410_v28 = vld [vmem:[#allocation7 + $0x168] sm:$0xf]  ;;  %v4159_v30 = vor.u32 %v4816_v17, %v4156_v19  ;;  %v4775_v9 = vld [vmem:[#allocation7 + $0x5f4] sm:$0xf0] }
  0xdd   :  { %2116 = vmatpush.bf16.msrb.mxu1 %v3935_v39  ;;  %v4204_v39 = vld [vmem:[#allocation7 + $0x7b0] sm:$0xf0]  ;;  %v3759_v41 = vor.u32 %v4716_v34, %v3756_v35  ;;  %v3298_v35 = vld [vmem:[#allocation7 + $0x88] sm:$0xf]  ;;  %v4808_v42 = vld [vmem:[#allocation7 + $0x704] sm:$0xf] }
  0xde   :  { %2127 = vmatpush.bf16.msrb.mxu2 %v4095_v36  ;;  %v4780_v36 = vld [vmem:[#allocation7 + $0x624] sm:$0xf]  ;;  %v4140_v34 = vld [vmem:[#allocation7 + $0x730] sm:$0xf0]  ;;  %v3506_v17 = vld [vmem:[#allocation7 + $0x228] sm:$0xf] }
  0xdf   :  { %2093 = vmatpush.bf16.msrb.mxu3 %v3631_v61  ;;  %v4015_v47 = vor.u32 %v4780_v36, %v4012_v37  ;;  %v3743_v61 = vor.u32 %v4712_v44, %v3740_v49  ;;  %v3554_v37 = vld [vmem:[#allocation7 + $0x288] sm:$0xf]  ;;  %v4599_v49 = vld [vmem:[#allocation7 + $0x74] sm:$0xf0] }
  0xe0   :  { %2102 = vmatpush.bf16.msra.mxu0 %v3823_v48  ;;  %v4207_v48 = vor.u32 %v4828_v38, %v4204_v39  ;;  %v4667_v38 = vld [vmem:[#allocation7 + $0x294] sm:$0xf0]  ;;  %v3394_v39 = vld [vmem:[#allocation7 + $0x148] sm:$0xf] }
  0xe1   :  { %2117 = vmatpush.bf16.msrb.mxu1 %v3919_v55  ;;  %v3346_v55 = vld [vmem:[#allocation7 + $0xe8] sm:$0xf]  ;;  %v3555_v44 = vor.u32 %v4667_v38, %v3554_v37  ;;  %v4655_v19 = vld [vmem:[#allocation7 + $0x234] sm:$0xf0] }
  0xe2   :  { %2128 = vmatpush.bf16.msrb.mxu2 %v4079_v51  ;;  %v4776_v51 = vld [vmem:[#allocation7 + $0x604] sm:$0xf]  ;;  %v3347_v3 = vor.u32 %v4615_v57, %v3346_v55  ;;  %v4711_v55 = vld [vmem:[#allocation7 + $0x3f4] sm:$0xf0]  ;;  %v3858_v37 = vld [vmem:[#allocation7 + $0x4e8] sm:$0xf] }
  0xe3   :  { %2094 = vmatpush.bf16.msrb.mxu3 %v3615_v11  ;;  %v3999_v1 = vor.u32 %v4776_v51, %v3996_v52  ;;  %v3426_v11 = vld [vmem:[#allocation7 + $0x188] sm:$0xf]  ;;  %v4623_v57 = vld [vmem:[#allocation7 + $0x134] sm:$0xf0] }
  0xe4   :  { %2103 = vmatpush.bf16.msra.mxu0 %v3807_v62  ;;  %v3442_v62 = vld [vmem:[#allocation7 + $0x1a8] sm:$0xf]  ;;  %v4743_v38 = vld [vmem:[#allocation7 + $0x4f4] sm:$0xf0] }
  0xe5   :  { %2118 = vmatpush.bf16.msrb.mxu1 %v3903_v6  ;;  %v4172_v6 = vld [vmem:[#allocation7 + $0x770] sm:$0xf0]  ;;  %v3443_v7 = vor.u32 %v4639_v0, %v3442_v62  ;;  %v3538_v52 = vld [vmem:[#allocation7 + $0x268] sm:$0xf]  ;;  %v4595_v0 = vld [vmem:[#allocation7 + $0x54] sm:$0xf0] }
  0xe6   :  { %2129 = vmatpush.bf16.msrb.mxu2 %v4063_v2  ;;  %2095 = vmatmul.bf16.vlgmr.msrb.gmra.mxu3 %v5292_v20  ;;  %v4191_v2 = vor.u32 %v4824_v53, %v4188_v54  ;;  %v4663_v53 = vld [vmem:[#allocation7 + $0x274] sm:$0xf0]  ;;  %v3730_v54 = vld [vmem:[#allocation7 + $0x3e8] sm:$0xf] }
  0xe7   :  { %2139 = vmatpush.bf16.msra.mxu3 %v4239_v15  ;;  %v3331_v15 = vor.u32 %v4611_v8, %v3330_v50  ;;  %v3266_v62 = vld [vmem:[#allocation7 + $0x48] sm:$0xf] }
  0xe8   :  { %2104 = vmatpush.bf16.msra.mxu0 %v3791_v12  ;;  %v4635_v12 = vld [vmem:[#allocation7 + $0x194] sm:$0xf0]  ;;  %v3362_v50 = vld [vmem:[#allocation7 + $0x108] sm:$0xf]  ;;  %v3267_v10 = vor.u32 %v4595_v0, %v3266_v62 }
  0xe9   :  { %2119 = vmatpush.bf16.msrb.mxu1 %v3887_v21  ;;  %v3314_v21 = vld [vmem:[#allocation7 + $0xa8] sm:$0xf]  ;;  %v3427_v46 = vor.u32 %v4635_v12, %v3426_v11 }
  0xea   :  { %2130 = vmatpush.bf16.msrb.mxu2 %v4047_v13  ;;  %v4175_v13 = vor.u32 %v4820_v5, %v4172_v6  ;;  %v3315_v31 = vor.u32 %v4607_v23, %v3314_v21  ;;  %v3714_v5 = vld [vmem:[#allocation7 + $0x3c8] sm:$0xf]  ;;  %v4707_v6 = vld [vmem:[#allocation7 + $0x3d4] sm:$0xf0] }
  0xeb   :  { %2140 = vmatpush.bf16.msra.mxu3 %v4223_v33  ;;  %v4812_v33 = vld [vmem:[#allocation7 + $0x724] sm:$0xf]  ;;  %v3986_v8 = vld [vmem:[#allocation7 + $0x5e8] sm:$0xf]  ;;  %v4703_v23 = vld [vmem:[#allocation7 + $0x3b4] sm:$0xf0] }
  0xec   :  { %2105 = vmatpush.bf16.msra.mxu0 %v3775_v29  ;;  %v4631_v29 = vld [vmem:[#allocation7 + $0x174] sm:$0xf0]  ;;  %v3250_v12 = vld [vmem:[#allocation7 + $0x28] sm:$0xf]  ;;  %v3987_v21 = vor.u32 %v4775_v9, %v3986_v8 }
  0xed   :  { %2120 = vmatpush.bf16.msrb.mxu1 %v3871_v45  ;;  %v3411_v36 = vor.u32 %v4631_v29, %v3410_v28  ;;  %v4603_v45 = vld [vmem:[#allocation7 + $0x94] sm:$0xf0]  ;;  %v3507_v29 = vor.u32 %v4655_v19, %v3506_v17  ;;  %v3650_v0 = vld [vmem:[#allocation7 + $0x348] sm:$0xf] }
  0xee   :  { %2131 = vmatpush.bf16.msrb.mxu2 %v4031_v32  ;;  %v3571_v32 = vor.u32 %v4671_v27, %v3570_v24  ;;  %v3299_v43 = vor.u32 %v4603_v45, %v3298_v35  ;;  %v3970_v24 = vld [vmem:[#allocation7 + $0x5c8] sm:$0xf]  ;;  %v4771_v27 = vld [vmem:[#allocation7 + $0x5d4] sm:$0xf0] }
  0xef   :  { %2141 = vmatpush.bf16.msra.mxu3 %v4207_v48  ;;  %v3282_v48 = vld [vmem:[#allocation7 + $0x68] sm:$0xf]  ;;  %v3971_v45 = vor.u32 %v4771_v27, %v3970_v24  ;;  %v4759_v8 = vld [vmem:[#allocation7 + $0x574] sm:$0xf0] }
  0xf0   :  { %2106 = vmatpush.bf16.msra.mxu0 %v3759_v41  ;;  %2121 = vmatmul.bf16.vlgmr.msrb.gmra.mxu1 %v5287_v58  ;;  %v4143_v41 = vor.u32 %v4812_v33, %v4140_v34  ;;  %v3283_v60 = vor.u32 %v4599_v49, %v3282_v48  ;;  %v4651_v34 = vld [vmem:[#allocation7 + $0x214] sm:$0xf0]  ;;  %v3682_v35 = vld [vmem:[#allocation7 + $0x388] sm:$0xf]  ;;  %v3859_v48 = vor.u32 %v4743_v38, %v3858_v37 }
  0xf1   :  { %2165 = vmatpush.bf16.msra.mxu1 %v3475_v40  ;;  %v4627_v40 = vld [vmem:[#allocation7 + $0x154] sm:$0xf0]  ;;  %v3666_v49 = vld [vmem:[#allocation7 + $0x368] sm:$0xf] }
  0xf2   :  { %2132 = vmatpush.bf16.msrb.mxu2 %v4015_v47  ;;  %v4124_v47 = vld [vmem:[#allocation7 + $0x710] sm:$0xf0]  ;;  %v3395_v51 = vor.u32 %v4627_v40, %v3394_v39  ;;  %v4114_v39 = vld [vmem:[#allocation7 + $0x6e8] sm:$0xf]  ;;  %v4807_v40 = vld [vmem:[#allocation7 + $0x6f4] sm:$0xf0] }
  0xf3   :  { %2142 = vmatpush.bf16.msra.mxu3 %v4191_v2  ;;  %v4127_v59 = vor.u32 %v4808_v42, %v4124_v47  ;;  %v4767_v42 = vld [vmem:[#allocation7 + $0x5b4] sm:$0xf0]  ;;  %v4066_v19 = vld [vmem:[#allocation7 + $0x688] sm:$0xf] }
  0xf4   :  { %2107 = vmatpush.bf16.msra.mxu0 %v3743_v61  ;;  %v3539_v61 = vor.u32 %v4663_v53, %v3538_v52  ;;  %v4115_v52 = vor.u32 %v4807_v40, %v4114_v39  ;;  %v4731_v17 = vld [vmem:[#allocation7 + $0x494] sm:$0xf0]  ;;  %v3890_v37 = vld [vmem:[#allocation7 + $0x528] sm:$0xf] }
  0xf5   :  { %2166 = vmatpush.bf16.msra.mxu1 %v3459_v56  ;;  %v3378_v56 = vld [vmem:[#allocation7 + $0x128] sm:$0xf]  ;;  %v4751_v38 = vld [vmem:[#allocation7 + $0x534] sm:$0xf0] }
  0xf6   :  { %2133 = vmatpush.bf16.msrb.mxu2 %v3999_v1  ;;  %v3731_v1 = vor.u32 %v4711_v55, %v3730_v54  ;;  %v3379_v2 = vor.u32 %v4623_v57, %v3378_v56  ;;  %v3842_v54 = vld [vmem:[#allocation7 + $0x4c8] sm:$0xf]  ;;  %v4739_v55 = vld [vmem:[#allocation7 + $0x4d4] sm:$0xf0] }
  0xf7   :  { %2108 = vmatmul.bf16.vlgmr.msra.gmra.mxu0 %v5290_v14  ;;  %2143 = vmatpush.bf16.msra.mxu3 %v4175_v13  ;;  %v3715_v13 = vor.u32 %v4707_v6, %v3714_v5  ;;  %v4098_v56 = vld [vmem:[#allocation7 + $0x6c8] sm:$0xf]  ;;  %v4803_v57 = vld [vmem:[#allocation7 + $0x6d4] sm:$0xf0]  ;;  %v3843_v62 = vor.u32 %v4739_v55, %v3842_v54 }
  0xf8   :  { %2152 = vmatpush.bf16.msrb.mxu0 %v3347_v3  ;;  %v3522_v3 = vld [vmem:[#allocation7 + $0x248] sm:$0xf]  ;;  %v4735_v5 = vld [vmem:[#allocation7 + $0x4b4] sm:$0xf0] }
  0xf9   :  { %2167 = vmatpush.bf16.msra.mxu1 %v3443_v7  ;;  %2134 = vmatmul.bf16.vlgmr.msrb.gmra.mxu2 %v5295_v26  ;;  %v4619_v7 = vld [vmem:[#allocation7 + $0x114] sm:$0xf0]  ;;  %v4082_v6 = vld [vmem:[#allocation7 + $0x6a8] sm:$0xf] }
  0xfa   :  { %2178 = vmatpush.bf16.msra.mxu2 %v3603_v4  ;;  %v4659_v4 = vld [vmem:[#allocation7 + $0x254] sm:$0xf0] }
  0xfb   :  { %2144 = vmatpush.bf16.msra.mxu3 %v4159_v30  ;;  %v3523_v11 = vor.u32 %v4659_v4, %v3522_v3  ;;  %v3234_v30 = vld [vmem:[#allocation7 + $0x8] sm:$0xf]  ;;  %v4747_v54 = vld [vmem:[#allocation7 + $0x514] sm:$0xf0] }
  0xfc   :  { %2153 = vmatpush.bf16.msrb.mxu0 %v3331_v15  ;;  %v3363_v15 = vor.u32 %v4619_v7, %v3362_v50  ;;  %v3826_v4 = vld [vmem:[#allocation7 + $0x4a8] sm:$0xf]  ;;  %v4799_v50 = vld [vmem:[#allocation7 + $0x6b4] sm:$0xf0] }
  0xfd   :  { %2168 = vmatpush.bf16.msra.mxu1 %v3427_v46  ;;  %v3698_v46 = vld [vmem:[#allocation7 + $0x3a8] sm:$0xf] }
  0xfe   :  { %2179 = vmatpush.bf16.msra.mxu2 %v3587_v16  ;;  %v4591_v16 = vld [vmem:[#allocation7 + $0x34] sm:$0xf0]  ;;  %v3699_v33 = vor.u32 %v4703_v23, %v3698_v46  ;;  %v3922_v7 = vld [vmem:[#allocation7 + $0x568] sm:$0xf] }
  0xff   :  { %2145 = vmatpush.bf16.msra.mxu3 %v4143_v41  ;;  %v3251_v28 = vor.u32 %v4591_v16, %v3250_v12  ;;  %v3954_v41 = vld [vmem:[#allocation7 + $0x5a8] sm:$0xf]  ;;  %v4687_v12 = vld [vmem:[#allocation7 + $0x334] sm:$0xf0] }
 0x100   :  { %2154 = vmatpush.bf16.msrb.mxu0 %v3315_v31  ;;  %v4587_v31 = vld [vmem:[#allocation7 + $0x14] sm:$0xf0]  ;;  %v3955_v53 = vor.u32 %v4767_v42, %v3954_v41  ;;  %v3810_v16 = vld [vmem:[#allocation7 + $0x488] sm:$0xf] }
 0x101   :  { %2169 = vmatpush.bf16.msra.mxu1 %v3411_v36  ;;  %v4699_v36 = vld [vmem:[#allocation7 + $0x394] sm:$0xf0]  ;;  %v3906_v46 = vld [vmem:[#allocation7 + $0x548] sm:$0xf]  ;;  %v3811_v27 = vor.u32 %v4731_v17, %v3810_v16  ;;  %v4613_v17 = vld [vmem:[#allocation7 + $0xec] sm:$0xf] }
 0x102   :  { %2180 = vmatpush.bf16.msra.mxu2 %v3571_v32  ;;  %v3490_v32 = vld [vmem:[#allocation7 + $0x208] sm:$0xf]  ;;  %v3683_v47 = vor.u32 %v4699_v36, %v3682_v35  ;;  %v4755_v23 = vld [vmem:[#allocation7 + $0x554] sm:$0xf0] }
 0x103   :  { %2146 = vmatpush.bf16.msra.mxu3 %v4127_v59  ;;  %v3938_v59 = vld [vmem:[#allocation7 + $0x588] sm:$0xf]  ;;  %v4791_v35 = vld [vmem:[#allocation7 + $0x674] sm:$0xf0] }
 0x104   :  { %2155 = vmatpush.bf16.msrb.mxu0 %v3299_v43  ;;  %v3235_v43 = vor.u32 %v4587_v31, %v3234_v30  ;;  %v3907_v31 = vor.u32 %v4755_v23, %v3906_v46  ;;  %v4242_v36 = vld [vmem:[#allocation7 + $0x7e8] sm:$0xf]  ;;  %v4827_v16 = vld [vmem:[#allocation7 + $0x794] sm:$0xf0]  ;;  %v4677_v46 = vld [vmem:[#allocation7 + $0x2ec] sm:$0xf] }
 0x105   :  { %2170 = vmatpush.bf16.msra.mxu1 %v3395_v51  ;;  %v4695_v51 = vld [vmem:[#allocation7 + $0x374] sm:$0xf0]  ;;  %v3604_v23 = vld [vmem:[#allocation7 + $0x2f8] sm:$0xf0] }
 0x106   :  { %2181 = vmatpush.bf16.msra.mxu2 %v3555_v44  ;;  %2147 = vmatmul.bf16.vlgmr.msra.gmra.mxu3 %v5305_v25  ;;  %v3491_v44 = vor.u32 %v4651_v34, %v3490_v32  ;;  %v3794_v32 = vld [vmem:[#allocation7 + $0x468] sm:$0xf] }
 0x107   :  { %2191 = vmatpush.bf16.msrb.mxu3 %v3731_v1  ;;  %v4691_v1 = vld [vmem:[#allocation7 + $0x354] sm:$0xf0]  ;;  %v4050_v34 = vld [vmem:[#allocation7 + $0x668] sm:$0xf] }
 0x108   :  { %2156 = vmatpush.bf16.msrb.mxu0 %v3283_v60  ;;  %v4763_v60 = vld [vmem:[#allocation7 + $0x594] sm:$0xf0]  ;;  %v3651_v9 = vor.u32 %v4691_v1, %v3650_v0  ;;  %v4051_v41 = vor.u32 %v4791_v35, %v4050_v34  ;;  %v4018_v0 = vld [vmem:[#allocation7 + $0x628] sm:$0xf]  ;;  %v4609_v35 = vld [vmem:[#allocation7 + $0xcc] sm:$0xf] }
 0x109   :  { %2171 = vmatpush.bf16.msra.mxu1 %v3379_v2  ;;  %v4099_v2 = vor.u32 %v4803_v57, %v4098_v56  ;;  %v3939_v3 = vor.u32 %v4763_v60, %v3938_v59  ;;  %v4645_v56 = vld [vmem:[#allocation7 + $0x1ec] sm:$0xf]  ;;  %v3476_v57 = vld [vmem:[#allocation7 + $0x1f8] sm:$0xf0]  ;;  %v4823_v34 = vld [vmem:[#allocation7 + $0x774] sm:$0xf0] }
 0x10a   :  { %2182 = vmatpush.bf16.msra.mxu2 %v3539_v61  ;;  %v3667_v61 = vor.u32 %v4695_v51, %v3666_v49  ;;  %v4787_v49 = vld [vmem:[#allocation7 + $0x654] sm:$0xf0]  ;;  %v4226_v51 = vld [vmem:[#allocation7 + $0x7c8] sm:$0xf] }
 0x10b   :  { %2192 = vmatpush.bf16.msrb.mxu3 %v3715_v13  ;;  %v4083_v13 = vor.u32 %v4799_v50, %v4082_v6  ;;  %v4641_v50 = vld [vmem:[#allocation7 + $0x1cc] sm:$0xf] }
 0x10c   :  { %2157 = vmatpush.bf16.msrb.mxu0 %v3267_v10  ;;  %v3827_v10 = vor.u32 %v4735_v5, %v3826_v4  ;;  %v4831_v4 = vld [vmem:[#allocation7 + $0x7b4] sm:$0xf0]  ;;  %v3479_v5 = vor.u32 %v4645_v56, %v3476_v57  ;;  %v3412_v56 = vld [vmem:[#allocation7 + $0x178] sm:$0xf0] }
 0x10d   :  { %2172 = vmatpush.bf16.msra.mxu1 %v3363_v15  ;;  %v3923_v15 = vor.u32 %v4759_v8, %v3922_v7  ;;  %v3460_v7 = vld [vmem:[#allocation7 + $0x1d8] sm:$0xf0]  ;;  %v3746_v8 = vld [vmem:[#allocation7 + $0x408] sm:$0xf] }
 0x10e   :  { %2183 = vmatpush.bf16.msra.mxu2 %v3523_v11  ;;  %v3634_v11 = vld [vmem:[#allocation7 + $0x328] sm:$0xf] }
 0x10f   :  { %2193 = vmatpush.bf16.msrb.mxu3 %v3699_v33  ;;  %v3635_v24 = vor.u32 %v4687_v12, %v3634_v11  ;;  %v4727_v33 = vld [vmem:[#allocation7 + $0x474] sm:$0xf0]  ;;  %v4002_v12 = vld [vmem:[#allocation7 + $0x608] sm:$0xf] }
 0x110   :  { %2158 = vmatpush.bf16.msrb.mxu0 %v3251_v28  ;;  %2173 = vmatmul.bf16.vlgmr.msra.gmra.mxu1 %v5274_v63  ;;  %v3618_v28 = vld [vmem:[#allocation7 + $0x308] sm:$0xf]  ;;  %v3795_v40 = vor.u32 %v4727_v33, %v3794_v32  ;;  %v4715_v11 = vld [vmem:[#allocation7 + $0x414] sm:$0xf0]  ;;  %v3607_v32 = vor.u32 %v4677_v46, %v3604_v23  ;;  %v3732_v46 = vld [vmem:[#allocation7 + $0x3f8] sm:$0xf0] }
 0x111   :  { %2217 = vmatpush.bf16.msrb.mxu1 %v3987_v21  ;;  %v4795_v21 = vld [vmem:[#allocation7 + $0x694] sm:$0xf0]  ;;  %v4178_v33 = vld [vmem:[#allocation7 + $0x768] sm:$0xf]  ;;  %v4621_v23 = vld [vmem:[#allocation7 + $0x12c] sm:$0xf] }
 0x112   :  { %2184 = vmatpush.bf16.msra.mxu2 %v3507_v29  ;;  %v4683_v29 = vld [vmem:[#allocation7 + $0x314] sm:$0xf0]  ;;  %v4067_v30 = vor.u32 %v4795_v21, %v4066_v19  ;;  %v3463_v19 = vor.u32 %v4641_v50, %v3460_v7  ;;  %v3348_v21 = vld [vmem:[#allocation7 + $0xf8] sm:$0xf0] }
 0x113   :  { %2194 = vmatpush.bf16.msrb.mxu3 %v3683_v47  ;;  %v3619_v39 = vor.u32 %v4683_v29, %v3618_v28  ;;  %v4034_v47 = vld [vmem:[#allocation7 + $0x648] sm:$0xf]  ;;  %v3444_v28 = vld [vmem:[#allocation7 + $0x1b8] sm:$0xf0] }
 0x114   :  { %2159 = vmatpush.bf16.msrb.mxu0 %v3235_v43  ;;  %v3778_v43 = vld [vmem:[#allocation7 + $0x448] sm:$0xf]  ;;  %v4035_v59 = vor.u32 %v4787_v49, %v4034_v47  ;;  %v4605_v49 = vld [vmem:[#allocation7 + $0xac] sm:$0xf]  ;;  %v3396_v50 = vld [vmem:[#allocation7 + $0x158] sm:$0xf0] }
 0x115   :  { %2218 = vmatpush.bf16.msrb.mxu1 %v3971_v45  ;;  %v4839_v45 = vld [vmem:[#allocation7 + $0x7f4] sm:$0xf0]  ;;  %v4162_v47 = vld [vmem:[#allocation7 + $0x748] sm:$0xf] }
 0x116   :  { %2185 = vmatpush.bf16.msra.mxu2 %v3491_v44  ;;  %v4243_v42 = vor.u32 %v4839_v45, %v4242_v36  ;;  %v4723_v44 = vld [vmem:[#allocation7 + $0x454] sm:$0xf0]  ;;  %v3332_v45 = vld [vmem:[#allocation7 + $0xd8] sm:$0xf0] }
 0x117   :  { %2160 = vmatmul.bf16.vlgmr.msrb.gmra.mxu0 %v5277_v18  ;;  %2195 = vmatpush.bf16.msrb.mxu3 %v3667_v61  ;;  %v3779_v55 = vor.u32 %v4723_v44, %v3778_v43  ;;  %v3762_v61 = vld [vmem:[#allocation7 + $0x428] sm:$0xf]  ;;  %v3335_v43 = vor.u32 %v4609_v35, %v3332_v45  ;;  %v3524_v45 = vld [vmem:[#allocation7 + $0x258] sm:$0xf0] }
 0x118   :  { %2204 = vmatpush.bf16.msra.mxu0 %v3859_v48  ;;  %v3891_v48 = vor.u32 %v4751_v38, %v3890_v37  ;;  %v4673_v37 = vld [vmem:[#allocation7 + $0x2cc] sm:$0xf]  ;;  %v3588_v38 = vld [vmem:[#allocation7 + $0x2d8] sm:$0xf0] }
 0x119   :  { %2219 = vmatpush.bf16.msrb.mxu1 %v3955_v53  ;;  %2186 = vmatmul.bf16.vlgmr.msra.gmra.mxu2 %v5279_v22  ;;  %v3874_v53 = vld [vmem:[#allocation7 + $0x508] sm:$0xf]  ;;  %v3591_v44 = vor.u32 %v4673_v37, %v3588_v38  ;;  %v4705_v37 = vld [vmem:[#allocation7 + $0x3cc] sm:$0xf]  ;;  %v3716_v38 = vld [vmem:[#allocation7 + $0x3d8] sm:$0xf0] }
 0x11a   :  { %2230 = vmatpush.bf16.msrb.mxu2 %v4115_v52  ;;  %v4835_v52 = vld [vmem:[#allocation7 + $0x7d4] sm:$0xf0]  ;;  %v3875_v1 = vor.u32 %v4747_v54, %v3874_v53  ;;  %v4669_v53 = vld [vmem:[#allocation7 + $0x2ac] sm:$0xf]  ;;  %v3572_v54 = vld [vmem:[#allocation7 + $0x2b8] sm:$0xf0] }
 0x11b   :  { %2196 = vmatpush.bf16.msrb.mxu3 %v3651_v9  ;;  %v4227_v60 = vor.u32 %v4835_v52, %v4226_v51  ;;  %v3316_v52 = vld [vmem:[#allocation7 + $0xb8] sm:$0xf0] }
 0x11c   :  { %2205 = vmatpush.bf16.msra.mxu0 %v3843_v62  ;;  %v4719_v62 = vld [vmem:[#allocation7 + $0x434] sm:$0xf0] }
 0x11d   :  { %2220 = vmatpush.bf16.msrb.mxu1 %v3939_v3  ;;  %v4210_v3 = vld [vmem:[#allocation7 + $0x7a8] sm:$0xf]  ;;  %v3763_v6 = vor.u32 %v4719_v62, %v3762_v61  ;;  %v4815_v62 = vld [vmem:[#allocation7 + $0x734] sm:$0xf0] }
 0x11e   :  { %2231 = vmatpush.bf16.msrb.mxu2 %v4099_v2  ;;  %v4783_v2 = vld [vmem:[#allocation7 + $0x634] sm:$0xf0]  ;;  %v4146_v61 = vld [vmem:[#allocation7 + $0x728] sm:$0xf] }
 0x11f   :  { %2197 = vmatpush.bf16.msrb.mxu3 %v3635_v24  ;;  %v4019_v9 = vor.u32 %v4783_v2, %v4018_v0  ;;  %v3747_v24 = vor.u32 %v4715_v11, %v3746_v8  ;;  %v4601_v0 = vld [vmem:[#allocation7 + $0x8c] sm:$0xf]  ;;  %v4147_v7 = vor.u32 %v4815_v62, %v4146_v61  ;;  %v4130_v8 = vld [vmem:[#allocation7 + $0x708] sm:$0xf]  ;;  %v3972_v61 = vld [vmem:[#allocation7 + $0x5d8] sm:$0xf0] }
 0x120   :  { %2206 = vmatpush.bf16.msra.mxu0 %v3827_v10  ;;  %v4211_v10 = vor.u32 %v4831_v4, %v4210_v3  ;;  %v3300_v3 = vld [vmem:[#allocation7 + $0x98] sm:$0xf0]  ;;  %v4665_v4 = vld [vmem:[#allocation7 + $0x28c] sm:$0xf]  ;;  %v5331_v62 = vld [vmem:[#allocation8] sm:$0xff] }
 0x121   :  { %2221 = vmatpush.bf16.msrb.mxu1 %v3923_v15  ;;  %v4194_v15 = vld [vmem:[#allocation7 + $0x788] sm:$0xf] }
 0x122   :  { %2232 = vmatpush.bf16.msrb.mxu2 %v4083_v13  ;;  %v4779_v13 = vld [vmem:[#allocation7 + $0x614] sm:$0xf0] }
 0x123   :  { %2198 = vmatpush.bf16.msrb.mxu3 %v3619_v39  ;;  %v4003_v29 = vor.u32 %v4779_v13, %v4002_v12  ;;  %v4633_v39 = vld [vmem:[#allocation7 + $0x18c] sm:$0xf]  ;;  %v4811_v12 = vld [vmem:[#allocation7 + $0x714] sm:$0xf0] }
 0x124   :  { %2207 = vmatpush.bf16.msra.mxu0 %v3811_v27  ;;  %v4637_v27 = vld [vmem:[#allocation7 + $0x1ac] sm:$0xf] }
 0x125   :  { %2222 = vmatpush.bf16.msrb.mxu1 %v3907_v31  ;;  %v3351_v31 = vor.u32 %v4613_v17, %v3348_v21  ;;  %v3447_v36 = vor.u32 %v4637_v27, %v3444_v28  ;;  %v4597_v13 = vld [vmem:[#allocation7 + $0x6c] sm:$0xf]  ;;  %v4131_v27 = vor.u32 %v4811_v12, %v4130_v8 }
 0x126   :  { %2233 = vmatpush.bf16.msrb.mxu2 %v4067_v30  ;;  %2199 = vmatmul.bf16.vlgmr.msrb.gmra.mxu3 %v5292_v20  ;;  %v4195_v30 = vor.u32 %v4827_v16, %v4194_v15  ;;  %v3284_v15 = vld [vmem:[#allocation7 + $0x78] sm:$0xf0]  ;;  %v4661_v17 = vld [vmem:[#allocation7 + $0x26c] sm:$0xf] }
 0x127   :  { %2243 = vmatpush.bf16.msra.mxu3 %v4243_v42  ;;  %v4709_v21 = vld [vmem:[#allocation7 + $0x3ec] sm:$0xf] }
 0x128   :  { %2208 = vmatpush.bf16.msra.mxu0 %v3795_v40  ;;  %v3428_v40 = vld [vmem:[#allocation7 + $0x198] sm:$0xf0]  ;;  %v4697_v8 = vld [vmem:[#allocation7 + $0x38c] sm:$0xf] }
 0x129   :  { %2223 = vmatpush.bf16.msrb.mxu1 %v3891_v48  ;;  %v4819_v48 = vld [vmem:[#allocation7 + $0x754] sm:$0xf0]  ;;  %v3431_v51 = vor.u32 %v4633_v39, %v3428_v40  ;;  %v4617_v39 = vld [vmem:[#allocation7 + $0x10c] sm:$0xf]  ;;  %v3364_v40 = vld [vmem:[#allocation7 + $0x118] sm:$0xf0] }
 0x12a   :  { %2234 = vmatpush.bf16.msrb.mxu2 %v4051_v41  ;;  %v4179_v41 = vor.u32 %v4823_v34, %v4178_v33  ;;  %v4163_v57 = vor.u32 %v4819_v48, %v4162_v47  ;;  %v3735_v33 = vor.u32 %v4709_v21, %v3732_v46  ;;  %v4741_v12 = vld [vmem:[#allocation7 + $0x4ec] sm:$0xf] }
 0x12b   :  { %2244 = vmatpush.bf16.msra.mxu3 %v4227_v60  ;;  %v3575_v60 = vor.u32 %v4669_v53, %v3572_v54  ;;  %v3252_v53 = vld [vmem:[#allocation7 + $0x38] sm:$0xf0]  ;;  %v4653_v54 = vld [vmem:[#allocation7 + $0x22c] sm:$0xf] }
 0x12c   :  { %2209 = vmatpush.bf16.msra.mxu0 %v3779_v55  ;;  %v4629_v55 = vld [vmem:[#allocation7 + $0x16c] sm:$0xf] }
 0x12d   :  { %2224 = vmatpush.bf16.msrb.mxu1 %v3875_v1  ;;  %v5320_v42 = vpop.f32.mrf.mxu1  ;;  %v3415_v2 = vor.u32 %v4629_v55, %v3412_v56  ;;  %v3508_v55 = vld [vmem:[#allocation7 + $0x238] sm:$0xf0] }
 0x12e   :  { %2235 = vmatpush.bf16.msrb.mxu2 %v4035_v59  ;;  %v3319_v59 = vor.u32 %v4605_v49, %v3316_v52  ;;  %v4589_v49 = vld [vmem:[#allocation7 + $0x2c] sm:$0xf]  ;;  %v3367_v52 = vor.u32 %v4617_v39, %v3364_v40  ;;  %v3940_v39 = vld [vmem:[#allocation7 + $0x598] sm:$0xf0] }
 0x12f   :  { %2245 = vmatpush.bf16.msra.mxu3 %v4211_v10  ;;  %v3303_v10 = vor.u32 %v4601_v0, %v3300_v3  ;;  %v3511_v3 = vor.u32 %v4653_v54, %v3508_v55  ;;  %v3828_v54 = vld [vmem:[#allocation7 + $0x4b8] sm:$0xf0]  ;;  %v4797_v55 = vld [vmem:[#allocation7 + $0x6ac] sm:$0xf] }
 0x130   :  { %2210 = vmatpush.bf16.msra.mxu0 %v3763_v6  ;;  %2225 = vmatmul.bf16.vlgmr.msrb.gmra.mxu1 %v5287_v58  ;;  %v4625_v6 = vld [vmem:[#allocation7 + $0x14c] sm:$0xf] }
 0x131   :  { %2269 = vmatpush.bf16.msra.mxu1 %v3479_v5  ;;  %v3556_v5 = vld [vmem:[#allocation7 + $0x298] sm:$0xf0]  ;;  %v3399_v16 = vor.u32 %v4625_v6, %v3396_v50  ;;  %v4649_v6 = vld [vmem:[#allocation7 + $0x20c] sm:$0xf] }
 0x132   :  { %2236 = vmatpush.bf16.msrb.mxu2 %v4019_v9  ;;  %v3559_v11 = vor.u32 %v4665_v4, %v3556_v5  ;;  %v4585_v4 = vld [vmem:[#allocation7 + $0xc] sm:$0xf]  ;;  %v3236_v5 = vld [vmem:[#allocation7 + $0x18] sm:$0xf0] }
 0x133   :  { %2246 = vmatpush.bf16.msra.mxu3 %v4195_v30  ;;  %v5324_v1 = vpop.f32.mrf.mxu0  ;;  %v3239_v46 = vor.u32 %v4585_v4, %v3236_v5  ;;  %v3636_v4 = vld [vmem:[#allocation7 + $0x338] sm:$0xf0] }
 0x134   :  { %2211 = vmatpush.bf16.msra.mxu0 %v3747_v24  ;;  %v3380_v24 = vld [vmem:[#allocation7 + $0x138] sm:$0xf0] }
 0x135   :  { %2270 = vmatpush.bf16.msra.mxu1 %v3463_v19  ;;  %v1968_v9 = vpop.f32.mrf.mxu1  ;;  %v3540_v19 = vld [vmem:[#allocation7 + $0x278] sm:$0xf0]  ;;  %v3383_v35 = vor.u32 %v4621_v23, %v3380_v24  ;;  %v5336_v24 = vunpack.c.l.bf16 %v5331_v62 }
 0x136   :  { %2237 = vmatpush.bf16.msrb.mxu2 %v4003_v29  ;;  %v3287_v29 = vor.u32 %v4597_v13, %v3284_v15  ;;  %v3543_v30 = vor.u32 %v4661_v17, %v3540_v19  ;;  %v3684_v9 = vld [vmem:[#allocation7 + $0x398] sm:$0xf0]  ;;  %v4805_v15 = vld [vmem:[#allocation7 + $0x6ec] sm:$0xf] }
 0x137   :  { %2212 = vmatmul.bf16.vlgmr.msra.gmra.mxu0 %v5290_v14  ;;  %2247 = vmatpush.bf16.msra.mxu3 %v4179_v41  ;;  %v4773_v41 = vld [vmem:[#allocation7 + $0x5ec] sm:$0xf]  ;;  %v3860_v13 = vld [vmem:[#allocation7 + $0x4f8] sm:$0xf0] }
 0x138   :  { %2256 = vmatpush.bf16.msrb.mxu0 %v3351_v31  ;;  %v4593_v31 = vld [vmem:[#allocation7 + $0x4c] sm:$0xf]  ;;  %v3956_v19 = vld [vmem:[#allocation7 + $0x5b8] sm:$0xf0] }
 0x139   :  { %2271 = vmatpush.bf16.msra.mxu1 %v3447_v36  ;;  %2238 = vmatmul.bf16.vlgmr.msrb.gmra.mxu2 %v5295_v26  ;;  %v4657_v36 = vld [vmem:[#allocation7 + $0x24c] sm:$0xf] }
 0x13a   :  { %2282 = vmatpush.bf16.msra.mxu2 %v3607_v32  ;;  %v3268_v32 = vld [vmem:[#allocation7 + $0x58] sm:$0xf0]  ;;  %v3527_v48 = vor.u32 %v4657_v36, %v3524_v45  ;;  %v4765_v17 = vld [vmem:[#allocation7 + $0x5ac] sm:$0xf] }
 0x13b   :  { %2248 = vmatpush.bf16.msra.mxu3 %v4163_v57  ;;  %v1955_v34 = vpop.f32.mrf.mxu0  ;;  %v3271_v47 = vor.u32 %v4593_v31, %v3268_v32  ;;  %v4701_v57 = vld [vmem:[#allocation7 + $0x3ac] sm:$0xf]  ;;  %v3668_v31 = vld [vmem:[#allocation7 + $0x378] sm:$0xf0] }
 0x13c   :  { %2257 = vmatpush.bf16.msrb.mxu0 %v3335_v43  ;;  %v5326_v28 = vpop.f32.mrf.mxu2  ;;  %v3988_v43 = vld [vmem:[#allocation7 + $0x5f8] sm:$0xf0]  ;;  %v4737_v34 = vld [vmem:[#allocation7 + $0x4cc] sm:$0xf] }
 0x13d   :  { %2272 = vmatpush.bf16.msra.mxu1 %v3431_v51  ;;  %v3719_v51 = vor.u32 %v4705_v37, %v3716_v38  ;;  %v3991_v56 = vor.u32 %v4773_v41, %v3988_v43  ;;  %v4801_v36 = vld [vmem:[#allocation7 + $0x6cc] sm:$0xf]  ;;  %v4100_v37 = vld [vmem:[#allocation7 + $0x6d8] sm:$0xf0] }
 0x13e   :  { %2283 = vmatpush.bf16.msra.mxu2 %v3591_v44  ;;  %v5328_v44 = vpop.f32.mrf.mxu1  ;;  %v4761_v38 = vld [vmem:[#allocation7 + $0x58c] sm:$0xf] }
 0x13f   :  { %2249 = vmatpush.bf16.msra.mxu3 %v4147_v7  ;;  %v3492_v7 = vld [vmem:[#allocation7 + $0x218] sm:$0xf0] }
 0x140   :  { %2258 = vmatpush.bf16.msrb.mxu0 %v3319_v59  ;;  %v3700_v59 = vld [vmem:[#allocation7 + $0x3b8] sm:$0xf0]  ;;  %v3495_v23 = vor.u32 %v4649_v6, %v3492_v7  ;;  %v4793_v7 = vld [vmem:[#allocation7 + $0x68c] sm:$0xf] }
 0x141   :  { %2273 = vmatpush.bf16.msra.mxu1 %v3415_v2  ;;  %v3255_v2 = vor.u32 %v4589_v49, %v3252_v53  ;;  %v3703_v50 = vor.u32 %v4701_v57, %v3700_v59  ;;  %v4733_v53 = vld [vmem:[#allocation7 + $0x4ac] sm:$0xf]  ;;  %v3924_v59 = vld [vmem:[#allocation7 + $0x578] sm:$0xf0] }
 0x142   :  { %2284 = vmatpush.bf16.msra.mxu2 %v3575_v60  ;;  %v4769_v60 = vld [vmem:[#allocation7 + $0x5cc] sm:$0xf] }
 0x143   :  { %2250 = vmatpush.bf16.msra.mxu3 %v4131_v27  ;;  %v3687_v27 = vor.u32 %v4697_v8, %v3684_v9  ;;  %v4757_v57 = vld [vmem:[#allocation7 + $0x56c] sm:$0xf]  ;;  %v4068_v9 = vld [vmem:[#allocation7 + $0x698] sm:$0xf0] }
 0x144   :  { %2259 = vmatpush.bf16.msrb.mxu0 %v3303_v10  ;;  %v1981_v0 = vpop.f32.mrf.mxu2  ;;  %v5333_v10 = vpop.f32.mrf.mxu0  ;;  %v3927_v6 = vor.u32 %v4757_v57, %v3924_v59  ;;  %v3876_v57 = vld [vmem:[#allocation7 + $0x518] sm:$0xf0] }
 0x145   :  { %2274 = vmatpush.bf16.msra.mxu1 %v3399_v16  ;;  %v4116_v16 = vld [vmem:[#allocation7 + $0x6f8] sm:$0xf0] }
 0x146   :  { %2285 = vmatpush.bf16.msra.mxu2 %v3559_v11  ;;  %2251 = vmatmul.bf16.vlgmr.msra.gmra.mxu3 %v5305_v25  ;;  %v3975_v11 = vor.u32 %v4769_v60, %v3972_v61  ;;  %v2020_v21 = vpop.f32.mrf.mxu1  ;;  %v4119_v32 = vor.u32 %v4805_v15, %v4116_v16 }
 0x147   :  { %2295 = vmatpush.bf16.msrb.mxu3 %v3735_v33  ;;  %v3959_v33 = vor.u32 %v4765_v17, %v3956_v19  ;;  %v4681_v17 = vld [vmem:[#allocation7 + $0x30c] sm:$0xf]  ;;  %v3620_v19 = vld [vmem:[#allocation7 + $0x318] sm:$0xf0] }
 0x148   :  { %2260 = vmatpush.bf16.msrb.mxu0 %v3287_v29  ;;  %v3863_v29 = vor.u32 %v4741_v12, %v3860_v13  ;;  %v3908_v12 = vld [vmem:[#allocation7 + $0x558] sm:$0xf0] }
 0x149   :  { %2275 = vmatpush.bf16.msra.mxu1 %v3383_v35  ;;  %v3844_v35 = vld [vmem:[#allocation7 + $0x4d8] sm:$0xf0]  ;;  %v5339_v45 = vpop.f32.mrf.mxu3 }
 0x14a   :  { %2286 = vmatpush.bf16.msra.mxu2 %v3543_v30  ;;  %v4693_v30 = vld [vmem:[#allocation7 + $0x36c] sm:$0xf]  ;;  %v3847_v43 = vor.u32 %v4737_v34, %v3844_v35  ;;  %v4244_v34 = vld [vmem:[#allocation7 + $0x7f8] sm:$0xf0] }
 0x14b   :  { %2296 = vmatpush.bf16.msrb.mxu3 %v3719_v51  ;;  %v3671_v41 = vor.u32 %v4693_v30, %v3668_v31  ;;  %v4103_v51 = vor.u32 %v4801_v36, %v4100_v37  ;;  %v3796_v30 = vld [vmem:[#allocation7 + $0x478] sm:$0xf0]  ;;  %v4789_v31 = vld [vmem:[#allocation7 + $0x66c] sm:$0xf] }
 0x14c   :  { %2261 = vmatpush.bf16.msrb.mxu0 %v3271_v47  ;;  %v5341_v40 = vpop.f32.mrf.mxu2  ;;  %v4689_v47 = vld [vmem:[#allocation7 + $0x34c] sm:$0xf]  ;;  %v2007_v49 = vpop.f32.mrf.mxu0  ;;  %v3892_v37 = vld [vmem:[#allocation7 + $0x538] sm:$0xf0] }
 0x14d   :  { %2276 = vmatpush.bf16.msra.mxu1 %v3367_v52  ;;  %v3943_v52 = vor.u32 %v4761_v38, %v3940_v39  ;;  %v4749_v36 = vld [vmem:[#allocation7 + $0x52c] sm:$0xf]  ;;  %v3623_v38 = vor.u32 %v4681_v17, %v3620_v19 }
 0x14e   :  { %2287 = vmatpush.bf16.msra.mxu2 %v3527_v48  ;;  %v3652_v48 = vld [vmem:[#allocation7 + $0x358] sm:$0xf0]  ;;  %v5346_v60 = vpop.f32.mrf.mxu1  ;;  %v4785_v49 = vld [vmem:[#allocation7 + $0x64c] sm:$0xf] }
 0x14f   :  { %2297 = vmatpush.bf16.msrb.mxu3 %v3703_v50  ;;  %v3655_v0 = vor.u32 %v4689_v47, %v3652_v48  ;;  %v4729_v50 = vld [vmem:[#allocation7 + $0x48c] sm:$0xf]  ;;  %v3780_v48 = vld [vmem:[#allocation7 + $0x458] sm:$0xf0] }
 0x150   :  { %2262 = vmatpush.bf16.msrb.mxu0 %v3255_v2  ;;  %2277 = vmatmul.bf16.vlgmr.msra.gmra.mxu1 %v5274_v63  ;;  %v648_v63 = vperm.slane %v5336_v24, 0  ;;  %v3831_v2 = vor.u32 %v4733_v53, %v3828_v54  ;;  %v4721_v47 = vld [vmem:[#allocation7 + $0x44c] sm:$0xf]  ;;  %v4036_v53 = vld [vmem:[#allocation7 + $0x658] sm:$0xf0] }
 0x151   :  { %2321 = vmatpush.bf16.msrb.mxu1 %v3991_v56  ;;  %v4084_v56 = vld [vmem:[#allocation7 + $0x6b8] sm:$0xf0]  ;;  %v1994_v8 = vpop.f32.mrf.mxu3  ;;  %v4833_v54 = vld [vmem:[#allocation7 + $0x7cc] sm:$0xf] }
 0x152   :  { %2288 = vmatpush.bf16.msra.mxu2 %v3511_v3  ;;  %v656_v61 = vperm.slane %v648_v63, 0  ;;  %v4685_v3 = vld [vmem:[#allocation7 + $0x32c] sm:$0xf]  ;;  %v4087_v5 = vor.u32 %v4797_v55, %v4084_v56  ;;  %v4228_v55 = vld [vmem:[#allocation7 + $0x7d8] sm:$0xf0] }
 0x153   :  { %2298 = vmatpush.bf16.msrb.mxu3 %v3687_v27  ;;  %v3639_v15 = vor.u32 %v4685_v3, %v3636_v4  ;;  %v4745_v56 = vld [vmem:[#allocation7 + $0x50c] sm:$0xf]  ;;  %v4039_v4 = vor.u32 %v4785_v49, %v4036_v53  ;;  %v4020_v8 = vld [vmem:[#allocation7 + $0x638] sm:$0xf0]  ;;  %v4298_v49 = vld [vmem:[#allocation10 + $0x60] sm:$0xf] }
 0x154   :  { %2263 = vmatpush.bf16.msrb.mxu0 %v3239_v46  ;;  %v2033_v13 = vpop.f32.mrf.mxu2  ;;  %v5351_v46 = vpop.f32.mrf.mxu0 }
 0x155   :  { %2322 = vmatpush.bf16.msrb.mxu1 %v3975_v11  ;;  %v4753_v11 = vld [vmem:[#allocation7 + $0x54c] sm:$0xf] }
 0x156   :  { %2289 = vmatpush.bf16.msra.mxu2 %v3495_v23  ;;  %v4071_v23 = vor.u32 %v4793_v7, %v4068_v9  ;;  %v3911_v27 = vor.u32 %v4753_v11, %v3908_v12  ;;  %v2072_v35 = vpop.f32.mrf.mxu1  ;;  %v3879_v7 = vor.u32 %v4745_v56, %v3876_v57  ;;  %v4829_v9 = vld [vmem:[#allocation7 + $0x7ac] sm:$0xf]  ;;  %v4212_v11 = vld [vmem:[#allocation7 + $0x7b8] sm:$0xf0]  ;;  %v2388_v57 = vperm.slane %v5336_v24, 2 }
 0x157   :  { %2264 = vmatmul.bf16.vlgmr.msrb.gmra.mxu0 %v5277_v18  ;;  %2299 = vmatpush.bf16.msrb.mxu3 %v3671_v41  ;;  %v3812_v18 = vld [vmem:[#allocation7 + $0x498] sm:$0xf0] }
 0x158   :  { %2308 = vmatpush.bf16.msra.mxu0 %v3863_v29  ;;  %v3815_v16 = vor.u32 %v4729_v50, %v3812_v18  ;;  %v4725_v29 = vld [vmem:[#allocation7 + $0x46c] sm:$0xf]  ;;  %v3764_v50 = vld [vmem:[#allocation7 + $0x438] sm:$0xf0] }
 0x159   :  { %2323 = vmatpush.bf16.msrb.mxu1 %v3959_v33  ;;  %2290 = vmatmul.bf16.vlgmr.msra.gmra.mxu2 %v5279_v22  ;;  %v5348_v22 = vpop.permute.xlu0 %643  ;;  %v4837_v33 = vld [vmem:[#allocation7 + $0x7ec] sm:$0xf]  ;;  %v3799_v39 = vor.u32 %v4725_v29, %v3796_v30 }
 0x15a   :  { %2334 = vmatpush.bf16.msrb.mxu2 %v4119_v32  ;;  %v660_v21 = vmul.f32 %v656_v61, %v5348_v22  ;;  %v4052_v32 = vld [vmem:[#allocation7 + $0x678] sm:$0xf0]  ;;  %v4370_v61 = vld [vmem:[#allocation10 + $0xf0] sm:$0xf]  ;;  %v4781_v18 = vld [vmem:[#allocation7 + $0x62c] sm:$0xf] }
 0x15b   :  { %2300 = vmatpush.bf16.msrb.mxu3 %v3655_v0  ;;  %v4055_v41 = vor.u32 %v4789_v31, %v4052_v32  ;;  %v4871_v0 = vld [vmem:[#allocation10 + $0xf4] sm:$0xf0]  ;;  %v4023_v19 = vor.u32 %v4781_v18, %v4020_v8  ;;  %v4777_v29 = vld [vmem:[#allocation7 + $0x60c] sm:$0xf]  ;;  %v4004_v31 = vld [vmem:[#allocation7 + $0x618] sm:$0xf0] }
 0x15c   :  { %2309 = vmatpush.bf16.msra.mxu0 %v3847_v43  ;;  %v1954_v63 = vadd.f32 %v5324_v1, %v660_v21  ;;  %v4247_v43 = vor.u32 %v4837_v33, %v4244_v34  ;;  %v5356_v59 = vpop.f32.mrf.mxu2  ;;  %v3783_v1 = vor.u32 %v4721_v47, %v3780_v48  ;;  %v2059_v3 = vpop.f32.mrf.mxu0  ;;  %v4371_v13 = vor.u32 %v4871_v0, %v4370_v61  ;;  %v4196_v32 = vld [vmem:[#allocation7 + $0x798] sm:$0xf0]  ;;  %v4855_v33 = vld [vmem:[#allocation10 + $0x74] sm:$0xf0]  ;;  %v4817_v61 = vld [vmem:[#allocation7 + $0x74c] sm:$0xf] }
 0x15d   :  { %2324 = vmatpush.bf16.msrb.mxu1 %v3943_v52  ;;  %v3895_v52 = vor.u32 %v4749_v36, %v3892_v37  ;;  %v4215_v21 = vor.u32 %v4829_v9, %v4212_v11  ;;  %v4867_v37 = vld [vmem:[#allocation10 + $0xd4] sm:$0xf0]  ;;  %v4180_v47 = vld [vmem:[#allocation7 + $0x778] sm:$0xf0]  ;;  %v2364_v48 = vperm.slane %v5336_v24, 1  ;;  %v2396_v11 = vperm.slane %v2388_v57, 2 }
 0x15e   :  { %2335 = vmatpush.bf16.msrb.mxu2 %v4103_v51  ;;  %v5354_v51 = vpop.f32.mrf.mxu3  ;;  %v4164_v0 = vld [vmem:[#allocation7 + $0x758] sm:$0xf0]  ;;  %v4290_v3 = vld [vmem:[#allocation10 + $0x50] sm:$0xf]  ;;  %v4857_v57 = vld [vmem:[#allocation10 + $0x84] sm:$0xf0] }
 0x15f   :  { %2301 = vmatpush.bf16.msrb.mxu3 %v3639_v15  ;;  %v4362_v15 = vld [vmem:[#allocation10 + $0xe0] sm:$0xf]  ;;  %v4338_v18 = vld [vmem:[#allocation10 + $0xb0] sm:$0xf] }
 0x160   :  { %2310 = vmatpush.bf16.msra.mxu0 %v3831_v2  ;;  %v1967_v2 = vadd.f32 %v5320_v42, %v1954_v63 }
 0x161   :  { %2325 = vmatpush.bf16.msrb.mxu1 %v3927_v6  ;;  %v4717_v6 = vld [vmem:[#allocation7 + $0x42c] sm:$0xf] }
 0x162   :  { %2336 = vmatpush.bf16.msrb.mxu2 %v4087_v5  ;;  %v4231_v5 = vor.u32 %v4833_v54, %v4228_v55  ;;  %v1980_v12 = vadd.f32 %v5326_v28, %v1967_v2  ;;  %v3767_v42 = vor.u32 %v4717_v6, %v3764_v50  ;;  %v4825_v28 = vld [vmem:[#allocation7 + $0x78c] sm:$0xf]  ;;  %v4346_v54 = vld [vmem:[#allocation10 + $0xc0] sm:$0xf]  ;;  %v4865_v55 = vld [vmem:[#allocation10 + $0xc4] sm:$0xf0]  ;;  %v5371_v6 = vpop.permute.xlu0 %2361 }
 0x163   :  { %2302 = vmatpush.bf16.msrb.mxu3 %v3623_v38  ;;  %v4199_v63 = vor.u32 %v4825_v28, %v4196_v32  ;;  %v2372_v2 = vperm.slane %v2364_v48, 1  ;;  %v4809_v28 = vld [vmem:[#allocation7 + $0x70c] sm:$0xf]  ;;  %v4132_v32 = vld [vmem:[#allocation7 + $0x718] sm:$0xf0] }
 0x164   :  { %2311 = vmatpush.bf16.msra.mxu0 %v3815_v16  ;;  %v4869_v16 = vld [vmem:[#allocation10 + $0xe4] sm:$0xf0]  ;;  %v1993_v17 = vadd.f32 %v5339_v45, %v1980_v12  ;;  %v2085_v35 = vpop.f32.mrf.mxu2  ;;  %v4354_v45 = vld [vmem:[#allocation10 + $0xd0] sm:$0xf] }
 0x165   :  { %2326 = vmatpush.bf16.msrb.mxu1 %v3911_v27  ;;  %v3748_v27 = vld [vmem:[#allocation7 + $0x418] sm:$0xf0]  ;;  %v4363_v34 = vor.u32 %v4869_v16, %v4362_v15  ;;  %v4355_v53 = vor.u32 %v4867_v37, %v4354_v45  ;;  %v2376_v15 = vmul.f32 %v2372_v2, %v5371_v6  ;;  %v4847_v35 = vld [vmem:[#allocation10 + $0x34] sm:$0xf0] }
 0x166   :  { %2337 = vmatpush.bf16.msrb.mxu2 %v4071_v23  ;;  %2303 = vmatmul.bf16.vlgmr.msrb.gmra.mxu3 %v5292_v20  ;;  %v4713_v23 = vld [vmem:[#allocation7 + $0x40c] sm:$0xf]  ;;  %v2046_v30 = vpop.f32.mrf.mxu3  ;;  %v4306_v20 = vld [vmem:[#allocation10 + $0x70] sm:$0xf]  ;;  %v2006_v38 = vadd.f32 %v5333_v10, %v1993_v17  ;;  %v4282_v17 = vld [vmem:[#allocation10 + $0x40] sm:$0xf] }
 0x167   :  { %2347 = vmatpush.bf16.msra.mxu3 %v4247_v43  ;;  %v3751_v36 = vor.u32 %v4713_v23, %v3748_v27  ;;  %v4821_v43 = vld [vmem:[#allocation7 + $0x76c] sm:$0xf]  ;;  %v4330_v23 = vld [vmem:[#allocation10 + $0xa0] sm:$0xf]  ;;  %v4861_v27 = vld [vmem:[#allocation10 + $0xa4] sm:$0xf0] }
 0x168   :  { %2312 = vmatpush.bf16.msra.mxu0 %v3799_v39  ;;  %v4007_v39 = vor.u32 %v4777_v29, %v4004_v31  ;;  %v2019_v10 = vadd.f32 %v5328_v44, %v2006_v38  ;;  %v4183_v56 = vor.u32 %v4821_v43, %v4180_v47  ;;  %v649_v44 = vperm.slane %v5336_v24, 4 }
 0x169   :  { %2327 = vmatpush.bf16.msrb.mxu1 %v3895_v52  ;;  %v4853_v52 = vld [vmem:[#allocation10 + $0x64] sm:$0xf0]  ;;  %v4135_v43 = vor.u32 %v4809_v28, %v4132_v32  ;;  %v2413_v28 = vperm.slane %v5336_v24, 7 }
 0x16a   :  { %2338 = vmatpush.bf16.msrb.mxu2 %v4055_v41  ;;  %v4307_v41 = vor.u32 %v4855_v33, %v4306_v20  ;;  %v2032_v8 = vadd.f32 %v5341_v40, %v2019_v10  ;;  %v657_v40 = vperm.slane %v649_v44, 0  ;;  %v5393_v10 = vld [vmem:[%s5466_s8 + $0x8] sm:$0xf]  ;;  %v4258_v44 = vld [vmem:[#allocation10 + $0x10] sm:$0xf] }
 0x16b   :  { %2348 = vmatpush.bf16.msra.mxu3 %v4231_v5  ;;  %v4347_v5 = vor.u32 %v4865_v55, %v4346_v54 }
 0x16c   :  { %2313 = vmatpush.bf16.msra.mxu0 %v3783_v1  ;;  %v4299_v1 = vor.u32 %v4853_v52, %v4298_v49  ;;  %v2045_v16 = vadd.f32 %v5354_v51, %v2032_v8  ;;  %v661_v45 = vmul.f32 %v657_v40, %v5348_v22  ;;  %v4266_v52 = vld [vmem:[#allocation10 + $0x20] sm:$0xf]  ;;  %v4866_v40 = vld [vmem:[#allocation10 + $0xd4] sm:$0xf] }
 0x16d   :  { %2328 = vmatpush.bf16.msrb.mxu1 %v3879_v7  ;;  %v4863_v7 = vld [vmem:[#allocation10 + $0xb4] sm:$0xf0]  ;;  %v5377_v9 = vpop.f32.mrf.mxu1 }
 0x16e   :  { %2339 = vmatpush.bf16.msrb.mxu2 %v4039_v4  ;;  %v4851_v4 = vld [vmem:[#allocation10 + $0x54] sm:$0xf0]  ;;  %v5374_v50 = vpop.f32.mrf.mxu3  ;;  %v2380_v51 = vadd.f32 %v2376_v15, %v2045_v16  ;;  %v2058_v55 = vadd.f32 %v5351_v46, %v661_v45  ;;  %v4250_v16 = vld [vmem:[#allocation10] sm:$0xf] }
 0x16f   :  { %2349 = vmatpush.bf16.msra.mxu3 %v4215_v21  ;;  %v4291_v12 = vor.u32 %v4851_v4, %v4290_v3  ;;  %v4339_v21 = vor.u32 %v4863_v7, %v4338_v18  ;;  %v4843_v18 = vld [vmem:[#allocation10 + $0x14] sm:$0xf0] }
 0x170   :  { %2314 = vmatpush.bf16.msra.mxu0 %v3767_v42  ;;  %2329 = vmatmul.bf16.vlgmr.msrb.gmra.mxu1 %v5287_v58  ;;  %v5367_v58 = vpop.permute.xlu1 %2385  ;;  %v4148_v42 = vld [vmem:[#allocation7 + $0x738] sm:$0xf0]  ;;  %v2071_v7 = vadd.f32 %v5346_v60, %v2058_v55  ;;  %v4887_v45 = vld [vmem:[#allocation10 + $0x174] sm:$0xf0] }
 0x171   :  { %2855 = vmatpush.bf16.msra.mxu1 %v4371_v13  ;;  %v4813_v13 = vld [vmem:[#allocation7 + $0x72c] sm:$0xf]  ;;  %v2400_v20 = vmul.f32 %v2396_v11, %v5367_v58  ;;  %v4364_v11 = vld [vmem:[#allocation10 + $0xe8] sm:$0xf0]  ;;  %v4862_v55 = vld [vmem:[#allocation10 + $0xb4] sm:$0xf] }
 0x172   :  { %2340 = vmatpush.bf16.msrb.mxu2 %v4023_v19  ;;  %v4849_v19 = vld [vmem:[#allocation10 + $0x44] sm:$0xf0]  ;;  %v4151_v29 = vor.u32 %v4813_v13, %v4148_v42  ;;  %v4259_v13 = vor.u32 %v4843_v18, %v4258_v44  ;;  %v2365_v42 = vperm.slane %v5336_v24, 5  ;;  %v4284_v44 = vld [vmem:[#allocation10 + $0x48] sm:$0xf0] }
 0x173   :  { %2350 = vmatpush.bf16.msra.mxu3 %v4199_v63  ;;  %v4283_v31 = vor.u32 %v4849_v19, %v4282_v17  ;;  %v4859_v63 = vld [vmem:[#allocation10 + $0x94] sm:$0xf0]  ;;  %v2404_v48 = vadd.f32 %v2400_v20, %v2380_v51  ;;  %v4854_v19 = vld [vmem:[#allocation10 + $0x74] sm:$0xf]  ;;  %v4852_v51 = vld [vmem:[#allocation10 + $0x64] sm:$0xf] }
 0x174   :  { %2315 = vmatpush.bf16.msra.mxu0 %v3751_v36  ;;  %v5382_v30 = vpop.f32.mrf.mxu0  ;;  %v4331_v36 = vor.u32 %v4861_v27, %v4330_v23  ;;  %v4356_v23 = vld [vmem:[#allocation10 + $0xd8] sm:$0xf0]  ;;  %v2389_v27 = vperm.slane %v5336_v24, 6 }
 0x175   :  { %2856 = vmatpush.bf16.msra.mxu1 %v4363_v34  ;;  %v4274_v34 = vld [vmem:[#allocation10 + $0x30] sm:$0xf] }
 0x176   :  { %2341 = vmatpush.bf16.msrb.mxu2 %v4007_v39  ;;  %v2098_v38 = vpop.f32.mrf.mxu3  ;;  %v4322_v39 = vld [vmem:[#allocation10 + $0x90] sm:$0xf]  ;;  %v4275_v47 = vor.u32 %v4847_v35, %v4274_v34  ;;  %v4864_v34 = vld [vmem:[#allocation10 + $0xc4] sm:$0xf]  ;;  %v4348_v35 = vld [vmem:[#allocation10 + $0xc8] sm:$0xf0] }
 0x177   :  { %2316 = vmatmul.bf16.vlgmr.msra.gmra.mxu0 %v5290_v14  ;;  %2351 = vmatpush.bf16.msra.mxu3 %v4183_v56  ;;  %v4167_v14 = vor.u32 %v4817_v61, %v4164_v0  ;;  %v4323_v54 = vor.u32 %v4859_v63, %v4322_v39  ;;  %v4314_v56 = vld [vmem:[#allocation10 + $0x80] sm:$0xf]  ;;  %v4870_v61 = vld [vmem:[#allocation10 + $0xf4] sm:$0xf]  ;;  %v4372_v0 = vld [vmem:[#allocation10 + $0xf8] sm:$0xf0] }
 0x178   :  { %2842 = vmatpush.bf16.msrb.mxu0 %v4307_v41  ;;  %v5386_v37 = vpop.permute.xlu1 %2409  ;;  %v2124_v41 = vpop.f32.mrf.mxu1  ;;  %v4315_v46 = vor.u32 %v4857_v57, %v4314_v56  ;;  %v4375_v8 = vor.u32 %v4870_v61, %v4372_v0  ;;  %v2397_v38 = vperm.slane %v2389_v27, 2  ;;  %v2421_v63 = vperm.slane %v2413_v28, 3  ;;  %v4340_v56 = vld [vmem:[#allocation10 + $0xb8] sm:$0xf0] }
 0x179   :  { %2857 = vmatpush.bf16.msra.mxu1 %v4355_v53  ;;  %2342 = vmatmul.bf16.vlgmr.msrb.gmra.mxu2 %v5295_v26  ;;  %v2412_v26 = vperm.slane %v5336_v24, 3  ;;  %v4845_v53 = vld [vmem:[#allocation10 + $0x24] sm:$0xf0]  ;;  %v4343_v18 = vor.u32 %v4862_v55, %v4340_v56  ;;  %v4875_v55 = vld [vmem:[#allocation10 + $0x114] sm:$0xf0] }
 0x17a   :  { %v4267_v3 = vor.u32 %v4845_v53, %v4266_v52  ;;  %v4351_v52 = vor.u32 %v4864_v34, %v4348_v35  ;;  %v4426_v53 = vld [vmem:[#allocation10 + $0x160] sm:$0xf]  ;;  %v2401_v61 = vmul.f32 %v2397_v38, %v5367_v58  ;;  %v4316_v38 = vld [vmem:[#allocation10 + $0x88] sm:$0xf0] }
 0x17b   :  { %2352 = vmatpush.bf16.msra.mxu3 %v4167_v14  ;;  %v2420_v33 = vperm.slane %v2412_v26, 3  ;;  %v4868_v14 = vld [vmem:[#allocation10 + $0xe4] sm:$0xf]  ;;  %v4841_v26 = vld [vmem:[#allocation10 + $0x4] sm:$0xf0] }
 0x17c   :  { %2843 = vmatpush.bf16.msrb.mxu0 %v4299_v1  ;;  %v2135_v1 = vpop.f32.mrf.mxu2  ;;  %v2111_v2 = vpop.f32.mrf.mxu0  ;;  %v4367_v60 = vor.u32 %v4868_v14, %v4364_v11  ;;  %v4883_v14 = vld [vmem:[#allocation10 + $0x154] sm:$0xf0]  ;;  %v4394_v34 = vld [vmem:[#allocation10 + $0x120] sm:$0xf] }
 0x17d   :  { %2858 = vmatpush.bf16.msra.mxu1 %v4347_v5  ;;  %v2424_v49 = vmul.f32 %v2420_v33, %v5386_v37  ;;  %v2433_v5 = vperm.slane %v5393_v10, 0  ;;  %v4359_v33 = vor.u32 %v4866_v40, %v4356_v23 }
 0x17f   :  { %2353 = vmatpush.bf16.msra.mxu3 %v4151_v29  ;;  %v2428_v4 = vadd.f32 %v2424_v49, %v2404_v48  ;;  %v4251_v29 = vor.u32 %v4841_v26, %v4250_v16  ;;  %v4292_v49 = vld [vmem:[#allocation10 + $0x58] sm:$0xf0] }
 0x180   :  { %2844 = vmatpush.bf16.msrb.mxu0 %v4291_v12  ;;  %v2084_v12 = vadd.f32 %v5356_v59, %v2071_v7  ;;  %v4332_v7 = vld [vmem:[#allocation10 + $0xa8] sm:$0xf0] }
 0x181   :  { %2859 = vmatpush.bf16.msra.mxu1 %v4339_v21  ;;  %v2441_v15 = vadd.f32 %v2433_v5, %v2428_v4  ;;  %v4308_v21 = vld [vmem:[#allocation10 + $0x78] sm:$0xf0]  ;;  %v4848_v5 = vld [vmem:[#allocation10 + $0x44] sm:$0xf] }
 0x182   :  { %v2097_v17 = vadd.f32 %v5374_v50, %v2084_v12  ;;  %v4311_v32 = vor.u32 %v4854_v19, %v4308_v21  ;;  %v4300_v50 = vld [vmem:[#allocation10 + $0x68] sm:$0xf0]  ;;  %v2434_v12 = vperm.slane %v5393_v10, 1  ;;  %v4410_v21 = vld [vmem:[#allocation10 + $0x140] sm:$0xf] }
 0x183   :  { %2354 = vmatpush.bf16.msra.mxu3 %v4135_v43  ;;  %v2445_v20 = vmax.f32 %v2441_v15, 0.0  ;;  %v4303_v24 = vor.u32 %v4852_v51, %v4300_v50  ;;  %v4850_v43 = vld [vmem:[#allocation10 + $0x54] sm:$0xf]  ;;  %v4402_v50 = vld [vmem:[#allocation10 + $0x130] sm:$0xf] }
 0x184   :  { %2845 = vmatpush.bf16.msrb.mxu0 %v4283_v31  ;;  %v2110_v59 = vadd.f32 %v5382_v30, %v2097_v17  ;;  %v2373_v31 = vperm.slane %v2365_v42, 1  ;;  %v4287_v42 = vor.u32 %v4848_v5, %v4284_v44  ;;  %v4846_v15 = vld [vmem:[#allocation10 + $0x34] sm:$0xf]  ;;  %v4276_v17 = vld [vmem:[#allocation10 + $0x38] sm:$0xf0]  ;;  %v5419_v44 = vunpack.c.h.bf16 %v5331_v62 }
 0x185   :  { %2860 = vmatpush.bf16.msra.mxu1 %v4331_v36  ;;  %v4434_v36 = vld [vmem:[#allocation10 + $0x170] sm:$0xf]  ;;  %v5405_v41 = vpack.c.bf16 %v2445_v20, %v2445_v20  ;;  %v4268_v20 = vld [vmem:[#allocation10 + $0x28] sm:$0xf0]  ;;  %v4436_v5 = vld [vmem:[#allocation10 + $0x178] sm:$0xf0] }
 0x186   :  { %2355 = vmatmul.bf16.vlgmr.msra.gmra.mxu3 %v5305_v25  ;;  %v2137_v25 = vpop.f32.mrf.mxu2  ;;  %v2123_v39 = vadd.f32 %v5377_v9, %v2110_v59  ;;  %v4435_v30 = vor.u32 %v4887_v45, %v4434_v36  ;;  %v4858_v59 = vld [vmem:[#allocation10 + $0x94] sm:$0xf]  ;;  %v4856_v45 = vld [vmem:[#allocation10 + $0x84] sm:$0xf] }
 0x188   :  { %2846 = vmatpush.bf16.msrb.mxu0 %v4275_v47  ;;  %v2377_v47 = vmul.f32 %v2373_v31, %v5371_v6  ;;  %v2136_v48 = vadd.f32 %v2135_v1, %v2123_v39  ;;  %2868 = vmatpush.bf16.msra.mxu2 %v4435_v30  ;;  %v2425_v1 = vmul.f32 %v2421_v63, %v5386_v37  ;;  %v4877_v30 = vld [vmem:[#allocation10 + $0x124] sm:$0xf0] }
 0x189   :  { %2861 = vmatpush.bf16.msra.mxu1 %v4323_v54  ;;  %v4885_v54 = vld [vmem:[#allocation10 + $0x164] sm:$0xf0]  ;;  %v2148_v9 = vpop.f32.mrf.mxu3  ;;  %v4279_v31 = vor.u32 %v4846_v15, %v4276_v17  ;;  %v4880_v17 = vld [vmem:[#allocation10 + $0x144] sm:$0xf] }
 0x18a   :  { %v4427_v57 = vor.u32 %v4885_v54, %v4426_v53  ;;  %v2149_v0 = vadd.f32 %v2148_v9, %v2136_v48  ;;  %v4395_v48 = vor.u32 %v4877_v30, %v4394_v34  ;;  %v4840_v53 = vld [vmem:[#allocation10 + $0x4] sm:$0xf]  ;;  %v4252_v54 = vld [vmem:[#allocation10 + $0x8] sm:$0xf0]  ;;  %v4386_v9 = vld [vmem:[#allocation10 + $0x110] sm:$0xf] }
 0x18b   :  { %v4387_v56 = vor.u32 %v4875_v55, %v4386_v9  ;;  %v4388_v34 = vld [vmem:[#allocation10 + $0x118] sm:$0xf0] }
 0x18c   :  { %2847 = vmatpush.bf16.msrb.mxu0 %v4267_v3  ;;  %v4295_v3 = vor.u32 %v4850_v43, %v4292_v49  ;;  %v2381_v4 = vadd.f32 %v2377_v47, %v2149_v0  ;;  %2869 = vmatpush.bf16.msra.mxu2 %v4427_v57  ;;  %v4842_v43 = vld [vmem:[#allocation10 + $0x14] sm:$0xf]  ;;  %v4260_v47 = vld [vmem:[#allocation10 + $0x18] sm:$0xf0]  ;;  %v4319_v49 = vor.u32 %v4856_v45, %v4316_v38  ;;  %v4378_v57 = vld [vmem:[#allocation10 + $0x100] sm:$0xf] }
 0x18d   :  { %2862 = vmatpush.bf16.msra.mxu1 %v4315_v46  ;;  %v5410_v2 = vpop.f32.mrf.mxu1  ;;  %v4860_v46 = vld [vmem:[#allocation10 + $0xa4] sm:$0xf]  ;;  %v4380_v38 = vld [vmem:[#allocation10 + $0x108] sm:$0xf0] }
 0x18e   :  { %v2405_v11 = vadd.f32 %v2401_v61, %v2381_v4  ;;  %v4335_v19 = vor.u32 %v4860_v46, %v4332_v7  ;;  %v4873_v61 = vld [vmem:[#allocation10 + $0x104] sm:$0xf0]  ;;  %v4886_v4 = vld [vmem:[#allocation10 + $0x174] sm:$0xf]  ;;  %v4884_v46 = vld [vmem:[#allocation10 + $0x164] sm:$0xf] }
 0x18f   :  { %v4428_v7 = vld [vmem:[#allocation10 + $0x168] sm:$0xf0]  ;;  %v4872_v45 = vld [vmem:[#allocation10 + $0x104] sm:$0xf] }
 0x190   :  { %2848 = vmatpush.bf16.msrb.mxu0 %v4259_v13  ;;  %v2429_v16 = vadd.f32 %v2425_v1, %v2405_v11  ;;  %v4379_v1 = vor.u32 %v4873_v61, %v4378_v57  ;;  %v4431_v11 = vor.u32 %v4884_v46, %v4428_v7  ;;  %v4901_v57 = vld [vmem:[#allocation10 + $0x1e4] sm:$0xf0]  ;;  %v4482_v46 = vld [vmem:[#allocation10 + $0x1d0] sm:$0xf]  ;;  %v4899_v7 = vld [vmem:[#allocation10 + $0x1d4] sm:$0xf0] }
 0x191   :  { %2907 = vmatpush.bf16.msrb.mxu1 %v4375_v8  ;;  %v4418_v8 = vld [vmem:[#allocation10 + $0x150] sm:$0xf]  ;;  %v2150_v25 = vpop.f32.mrf.mxu3 }
 0x192   :  { %v4419_v13 = vor.u32 %v4883_v14, %v4418_v8  ;;  %v2442_v27 = vadd.f32 %v2434_v12, %v2429_v16  ;;  %v650_v8 = vperm.slane %v5419_v44, 0 }
 0x194   :  { %2849 = vmatpush.bf16.msrb.mxu0 %v4251_v29  ;;  %v5414_v26 = vpop.f32.mrf.mxu0  ;;  %2870 = vmatpush.bf16.msra.mxu2 %v4419_v13  ;;  %v4324_v29 = vld [vmem:[#allocation10 + $0x98] sm:$0xf0]  ;;  %v2446_v28 = vmax.f32 %v2442_v27, 0.0  ;;  %v4882_v13 = vld [vmem:[#allocation10 + $0x154] sm:$0xf]  ;;  %v658_v15 = vperm.slane %v650_v8, 0  ;;  %v4483_v8 = vor.u32 %v4899_v7, %v4482_v46 }
 0x195   :  { %2908 = vmatpush.bf16.msrb.mxu1 %v4367_v60  ;;  %v4881_v60 = vld [vmem:[#allocation10 + $0x144] sm:$0xf0]  ;;  %v2176_v23 = vpop.f32.mrf.mxu1  ;;  %v4327_v51 = vor.u32 %v4858_v59, %v4324_v29  ;;  %v4876_v29 = vld [vmem:[#allocation10 + $0x124] sm:$0xf] }
 0x196   :  { %v4411_v40 = vor.u32 %v4881_v60, %v4410_v21  ;;  %v2450_v36 = vpack.c.bf16 %v2446_v28, %v2446_v28  ;;  %v4404_v23 = vld [vmem:[#allocation10 + $0x138] sm:$0xf0] }
 0x197   :  { %2850 = vmatmul.bf16.vlgmr.msrb.gmra.mxu0 %v5405_v41 }
 0x198   :  { %2894 = vmatpush.bf16.msra.mxu0 %v4311_v32  ;;  %v4844_v32 = vld [vmem:[#allocation10 + $0x24] sm:$0xf]  ;;  %2871 = vmatpush.bf16.msra.mxu2 %v4411_v40  ;;  %v4878_v40 = vld [vmem:[#allocation10 + $0x134] sm:$0xf] }
 0x199   :  { %2909 = vmatpush.bf16.msrb.mxu1 %v4359_v33  ;;  %v4879_v33 = vld [vmem:[#allocation10 + $0x134] sm:$0xf0]  ;;  %v4271_v63 = vor.u32 %v4844_v32, %v4268_v20  ;;  %v4407_v59 = vor.u32 %v4878_v40, %v4404_v23  ;;  %v4458_v40 = vld [vmem:[#allocation10 + $0x1a0] sm:$0xf]  ;;  %v4893_v23 = vld [vmem:[#allocation10 + $0x1a4] sm:$0xf0] }
 0x19a   :  { %v4403_v39 = vor.u32 %v4879_v33, %v4402_v50  ;;  %2863 = vmatmul.bf16.vlgmr.msra.gmra.mxu1 %v2450_v36  ;;  %v4874_v33 = vld [vmem:[#allocation10 + $0x114] sm:$0xf] }
 0x19c   :  { %2895 = vmatpush.bf16.msra.mxu0 %v4303_v24  ;;  %v5416_v35 = vpop.f32.mrf.mxu2  ;;  %v2163_v24 = vpop.f32.mrf.mxu0  ;;  %2872 = vmatpush.bf16.msra.mxu2 %v4403_v39  ;;  %v2366_v39 = vperm.slane %v5419_v44, 1 }
 0x19d   :  { %2910 = vmatpush.bf16.msrb.mxu1 %v4351_v52  ;;  %v4263_v52 = vor.u32 %v4842_v43, %v4260_v47  ;;  %v4383_v43 = vor.u32 %v4872_v45, %v4380_v38  ;;  %v4500_v45 = vld [vmem:[#allocation10 + $0x1f8] sm:$0xf0] }
 0x19e   :  { %v2374_v47 = vperm.slane %v2366_v39, 1  ;;  %v4900_v39 = vld [vmem:[#allocation10 + $0x1e4] sm:$0xf] }
 0x1a0   :  { %2896 = vmatpush.bf16.msra.mxu0 %v4295_v3  ;;  %2873 = vmatpush.bf16.msra.mxu2 %v4395_v48  ;;  %v4255_v3 = vor.u32 %v4840_v53, %v4252_v54  ;;  %v4498_v48 = vld [vmem:[#allocation10 + $0x1f0] sm:$0xf]  ;;  %v2378_v54 = vmul.f32 %v2374_v47, %v5371_v6  ;;  %v4898_v47 = vld [vmem:[#allocation10 + $0x1d4] sm:$0xf] }
 0x1a1   :  { %2911 = vmatpush.bf16.msrb.mxu1 %v4343_v18  ;;  %v4439_v18 = vor.u32 %v4886_v4, %v4436_v5 }
 0x1a4   :  { %2897 = vmatpush.bf16.msra.mxu0 %v4287_v42  ;;  %v2189_v0 = vpop.f32.mrf.mxu2  ;;  %2874 = vmatpush.bf16.msra.mxu2 %v4387_v56  ;;  %v4420_v42 = vld [vmem:[#allocation10 + $0x158] sm:$0xf0]  ;;  %v4490_v56 = vld [vmem:[#allocation10 + $0x1e0] sm:$0xf] }
 0x1a5   :  { %2912 = vmatpush.bf16.msrb.mxu1 %v4335_v19  ;;  %v4423_v62 = vor.u32 %v4882_v13, %v4420_v42  ;;  %v4412_v19 = vld [vmem:[#allocation10 + $0x148] sm:$0xf0]  ;;  %v4491_v0 = vor.u32 %v4901_v57, %v4490_v56  ;;  %v4474_v42 = vld [vmem:[#allocation10 + $0x1c0] sm:$0xf]  ;;  %v4894_v57 = vld [vmem:[#allocation10 + $0x1b4] sm:$0xf] }
 0x1a6   :  { %v4415_v21 = vor.u32 %v4880_v17, %v4412_v19 }
 0x1a8   :  { %2898 = vmatpush.bf16.msra.mxu0 %v4279_v31  ;;  %2875 = vmatpush.bf16.msra.mxu2 %v4379_v1  ;;  %v4396_v31 = vld [vmem:[#allocation10 + $0x128] sm:$0xf0] }
 0x1a9   :  { %2913 = vmatpush.bf16.msrb.mxu1 %v4327_v51  ;;  %v2200_v14 = vpop.f32.mrf.mxu3  ;;  %v4399_v20 = vor.u32 %v4876_v29, %v4396_v31  ;;  %v4459_v29 = vor.u32 %v4893_v23, %v4458_v40 }
 0x1ac   :  { %2899 = vmatpush.bf16.msra.mxu0 %v4271_v63  ;;  %2920 = vmatpush.bf16.msrb.mxu2 %v4439_v18  ;;  %v2390_v63 = vperm.slane %v5419_v44, 2 }
 0x1ad   :  { %2914 = vmatpush.bf16.msrb.mxu1 %v4319_v49  ;;  %v2226_v12 = vpop.f32.mrf.mxu1 }
 0x1b0   :  { %2900 = vmatpush.bf16.msra.mxu0 %v4263_v52  ;;  %2915 = vmatmul.bf16.vlgmr.msrb.gmra.mxu1 %v2450_v36  ;;  %v4391_v36 = vor.u32 %v4874_v33, %v4388_v34  ;;  %v2398_v52 = vperm.slane %v2390_v63, 2  ;;  %v651_v63 = vperm.slane %v5419_v44, 4 }
 0x1b1   :  { %2921 = vmatpush.bf16.msrb.mxu2 %v4431_v11  ;;  %v2202_v60 = vpop.f32.mrf.mxu3  ;;  %v2435_v11 = vperm.slane %v5393_v10, 2 }
 0x1b2   :  { %v4895_v60 = vld [vmem:[#allocation10 + $0x1b4] sm:$0xf0] }
 0x1b4   :  { %2901 = vmatpush.bf16.msra.mxu0 %v4255_v3  ;;  %v2213_v16 = vpop.f32.mrf.mxu0  ;;  %v2402_v3 = vmul.f32 %v2398_v52, %v5367_v58  ;;  %v4476_v52 = vld [vmem:[#allocation10 + $0x1c8] sm:$0xf0] }
 0x1b5   :  { %2922 = vmatpush.bf16.msrb.mxu2 %v4423_v62  ;;  %v2228_v25 = vpop.f32.mrf.mxu1 }
 0x1b7   :  { %2902 = vmatmul.bf16.vlgmr.msra.gmra.mxu0 %v5405_v41  ;;  %v662_v41 = vmul.f32 %v658_v15, %v5348_v22  ;;  %v4897_v15 = vld [vmem:[#allocation10 + $0x1c4] sm:$0xf0] }
 0x1b9   :  { %2923 = vmatpush.bf16.msrb.mxu2 %v4415_v21  ;;  %v2162_v27 = vadd.f32 %v5414_v26, %v662_v41  ;;  %v4466_v41 = vld [vmem:[#allocation10 + $0x1b0] sm:$0xf] }
 0x1ba   :  { %v4467_v25 = vor.u32 %v4895_v60, %v4466_v41 }
 0x1bb   :  { %v2175_v51 = vadd.f32 %v5410_v2, %v2162_v27  ;;  %v2414_v2 = vperm.slane %v5419_v44, 3 }
 0x1bc   :  { %v2239_v28 = vpop.f32.mrf.mxu2  ;;  %v2215_v32 = vpop.f32.mrf.mxu0 }
 0x1bd   :  { %2924 = vmatpush.bf16.msrb.mxu2 %v4407_v59  ;;  %v2188_v50 = vadd.f32 %v5416_v35, %v2175_v51  ;;  %v4903_v35 = vld [vmem:[#allocation10 + $0x1f4] sm:$0xf0]  ;;  %v2422_v9 = vperm.slane %v2414_v2, 3  ;;  %v4484_v2 = vld [vmem:[#allocation10 + $0x1d8] sm:$0xf0] }
 0x1be   :  { %v4499_v49 = vor.u32 %v4903_v35, %v4498_v48  ;;  %v4891_v32 = vld [vmem:[#allocation10 + $0x194] sm:$0xf0]  ;;  %v4487_v48 = vor.u32 %v4898_v47, %v4484_v2  ;;  %v659_v35 = vperm.slane %v651_v63, 0 }
 0x1bf   :  { %v2201_v26 = vadd.f32 %v2200_v14, %v2188_v50  ;;  %v2426_v5 = vmul.f32 %v2422_v9, %v5386_v37  ;;  %v4889_v50 = vld [vmem:[#allocation10 + $0x184] sm:$0xf0] }
 0x1c0   :  { %2881 = vmatpush.bf16.msrb.mxu3 %v4499_v49  ;;  %v4896_v49 = vld [vmem:[#allocation10 + $0x1c4] sm:$0xf]  ;;  %v663_v9 = vmul.f32 %v659_v35, %v5348_v22  ;;  %v4911_v35 = vld [vmem:[#allocation11 + $0x38] sm:$0xff] }
 0x1c1   :  { %2925 = vmatpush.bf16.msrb.mxu2 %v4399_v20  ;;  %v2214_v24 = vadd.f32 %v2213_v16, %v2201_v26  ;;  %v4475_v16 = vor.u32 %v4897_v15, %v4474_v42  ;;  %v4442_v20 = vld [vmem:[#allocation10 + $0x180] sm:$0xf]  ;;  %v4492_v26 = vld [vmem:[#allocation10 + $0x1e8] sm:$0xf0]  ;;  %v4888_v15 = vld [vmem:[#allocation10 + $0x184] sm:$0xf]  ;;  %3081 = vmatpush.bf16.msrb.mxu0 %v4911_v35 }
 0x1c2   :  { %v4443_v34 = vor.u32 %v4889_v50, %v4442_v20 }
 0x1c3   :  { %v2227_v53 = vadd.f32 %v2226_v12, %v2214_v24 }
 0x1c4   :  { %v2241_v30 = vpop.f32.mrf.mxu2  ;;  %2882 = vmatpush.bf16.msrb.mxu3 %v4491_v0 }
 0x1c5   :  { %2926 = vmatpush.bf16.msrb.mxu2 %v4391_v36  ;;  %v2240_v55 = vadd.f32 %v2239_v28, %v2227_v53  ;;  %v4450_v28 = vld [vmem:[#allocation10 + $0x190] sm:$0xf]  ;;  %v4902_v36 = vld [vmem:[#allocation10 + $0x1f4] sm:$0xf]  ;;  %v4495_v30 = vor.u32 %v4900_v39, %v4492_v26 }
 0x1c6   :  { %v4451_v51 = vor.u32 %v4891_v32, %v4450_v28  ;;  %v4503_v38 = vor.u32 %v4902_v36, %v4500_v45 }
 0x1c8   :  { %2883 = vmatpush.bf16.msrb.mxu3 %v4483_v8 }
 0x1c9   :  { %2927 = vmatpush.bf16.msrb.mxu2 %v4383_v43  ;;  %v2252_v61 = vpop.f32.mrf.mxu3 }
 0x1ca   :  { %v2253_v1 = vadd.f32 %v2252_v61, %v2240_v55  ;;  %v4468_v61 = vld [vmem:[#allocation10 + $0x1b8] sm:$0xf0] }
 0x1cb   :  { %v4471_v0 = vor.u32 %v4894_v57, %v4468_v61  ;;  %v4906_v61 = vld [vmem:[#allocation11 + $0x10] sm:$0xff] }
 0x1cc   :  { %v2382_v18 = vadd.f32 %v2378_v54, %v2253_v1  ;;  %2884 = vmatpush.bf16.msrb.mxu3 %v4475_v16  ;;  %v4479_v54 = vor.u32 %v4896_v49, %v4476_v52  ;;  %v4892_v1 = vld [vmem:[#allocation10 + $0x1a4] sm:$0xf]  ;;  %v4919_v49 = vld [vmem:[#allocation11 + $0x78] sm:$0xff]  ;;  %v4910_v52 = vld [vmem:[#allocation11 + $0x30] sm:$0xff] }
 0x1cd   :  { %v5432_v4 = vpop.f32.mrf.mxu1  ;;  %3094 = vmatpush.bf16.msra.mxu1 %v4919_v49  ;;  %3082 = vmatpush.bf16.msrb.mxu0 %v4910_v52 }
 0x1ce   :  { %v2406_v14 = vadd.f32 %v2402_v3, %v2382_v18 }
 0x1d0   :  { %v2430_v12 = vadd.f32 %v2426_v5, %v2406_v14  ;;  %2885 = vmatpush.bf16.msrb.mxu3 %v4467_v25  ;;  %v4460_v5 = vld [vmem:[#allocation10 + $0x1a8] sm:$0xf0] }
 0x1d1   :  { %v2254_v62 = vpop.f32.mrf.mxu3  ;;  %v4463_v46 = vor.u32 %v4892_v1, %v4460_v5  ;;  %v4905_v1 = vld [vmem:[#allocation11 + $0x8] sm:$0xff] }
 0x1d2   :  { %v2443_v19 = vadd.f32 %v2435_v11, %v2430_v12  ;;  %v4890_v11 = vld [vmem:[#allocation10 + $0x194] sm:$0xf]  ;;  %v4452_v12 = vld [vmem:[#allocation10 + $0x198] sm:$0xf0]  ;;  %v4444_v62 = vld [vmem:[#allocation10 + $0x188] sm:$0xf0] }
 0x1d3   :  { %v4455_v22 = vor.u32 %v4890_v11, %v4452_v12  ;;  %v4917_v5 = vld [vmem:[#allocation11 + $0x68] sm:$0xff]  ;;  %v4912_v11 = vld [vmem:[#allocation11 + $0x40] sm:$0xff] }
 0x1d4   :  { %v2265_v13 = vpop.f32.mrf.mxu0  ;;  %v2447_v21 = vmax.f32 %v2443_v19, 0.0  ;;  %2886 = vmatpush.bf16.msrb.mxu3 %v4459_v29 }
 0x1d5   :  { %v2280_v17 = vpop.f32.mrf.mxu1  ;;  %v2266_v3 = vadd.f32 %v2265_v13, %v663_v9  ;;  %v2367_v13 = vperm.slane %v5419_v44, 5 }
 0x1d6   :  { %v2451_v59 = vpack.c.bf16 %v2447_v21, %v2447_v21  ;;  %v4447_v17 = vor.u32 %v4888_v15, %v4444_v62  ;;  %v2391_v21 = vperm.slane %v5419_v44, 6 }
 0x1d7   :  { %v2279_v8 = vadd.f32 %v5432_v4, %v2266_v3  ;;  %v2375_v41 = vperm.slane %v2367_v13, 1  ;;  %v2415_v4 = vperm.slane %v5419_v44, 7 }
 0x1d8   :  { %2876 = vmatmul.bf16.vlgmr.msra.gmra.mxu2 %v2451_v59  ;;  %2887 = vmatpush.bf16.msrb.mxu3 %v4451_v51  ;;  %v2399_v25 = vperm.slane %v2391_v21, 2  ;;  %v2436_v51 = vperm.slane %v5393_v10, 3 }
 0x1dc   :  { %v2291_v27 = vpop.f32.mrf.mxu2  ;;  %v2267_v31 = vpop.f32.mrf.mxu0  ;;  %2888 = vmatpush.bf16.msrb.mxu3 %v4443_v34 }
 0x1dd   :  { %v2292_v14 = vadd.f32 %v2291_v27, %v2279_v8  ;;  %v2379_v27 = vmul.f32 %v2375_v41, %v5371_v6  ;;  %v2403_v31 = vmul.f32 %v2399_v25, %v5367_v58  ;;  %v139_v6 = vld [vmem:[%s5466_s8 + $0xc] sm:$0x3]  ;;  %v4914_v8 = vld [vmem:[#allocation11 + $0x50] sm:$0xff] }
 0x1de   :  { %v2518_v39 = vperm.slane %v139_v6, 0  ;;  %v2519_v63 = vperm.slane %v139_v6, 1 }
 0x1e0   :  { %2933 = vmatpush.bf16.msra.mxu3 %v4503_v38 }
 0x1e4   :  { %v2293_v33 = vpop.f32.mrf.mxu2  ;;  %2934 = vmatpush.bf16.msra.mxu3 %v4495_v30 }
 0x1e8   :  { %2928 = vmatmul.bf16.vlgmr.msrb.gmra.mxu2 %v2451_v59  ;;  %2935 = vmatpush.bf16.msra.mxu3 %v4487_v48  ;;  %v2423_v59 = vperm.slane %v2415_v4, 3 }
 0x1e9   :  { %v2304_v24 = vpop.f32.mrf.mxu3 }
 0x1ea   :  { %v2305_v42 = vadd.f32 %v2304_v24, %v2292_v14  ;;  %v2427_v32 = vmul.f32 %v2423_v59, %v5386_v37  ;;  %v4913_v14 = vld [vmem:[#allocation11 + $0x48] sm:$0xff] }
 0x1ec   :  { %2936 = vmatpush.bf16.msra.mxu3 %v4479_v54  ;;  %v4909_v54 = vld [vmem:[#allocation11 + $0x28] sm:$0xff] }
 0x1ed   :  { %v2330_v43 = vpop.f32.mrf.mxu1  ;;  %3083 = vmatpush.bf16.msrb.mxu0 %v4909_v54 }
 0x1f0   :  { %2937 = vmatpush.bf16.msra.mxu3 %v4471_v0 }
 0x1f1   :  { %v2306_v55 = vpop.f32.mrf.mxu3 }
 0x1f2   :  { %v4908_v55 = vld [vmem:[#allocation11 + $0x20] sm:$0xff] }
 0x1f3   :  { %3084 = vmatpush.bf16.msrb.mxu0 %v4908_v55 }
 0x1f4   :  { %v2317_v53 = vpop.f32.mrf.mxu0  ;;  %2938 = vmatpush.bf16.msra.mxu3 %v4463_v46  ;;  %v4916_v46 = vld [vmem:[#allocation11 + $0x60] sm:$0xff] }
 0x1f5   :  { %v2332_v56 = vpop.f32.mrf.mxu1  ;;  %v2318_v19 = vadd.f32 %v2317_v53, %v2305_v42  ;;  %v4918_v53 = vld [vmem:[#allocation11 + $0x70] sm:$0xff] }
 0x1f6   :  { %3095 = vmatpush.bf16.msra.mxu1 %v4918_v53  ;;  %v4907_v56 = vld [vmem:[#allocation11 + $0x18] sm:$0xff] }
 0x1f7   :  { %v2331_v60 = vadd.f32 %v2330_v43, %v2318_v19  ;;  %3085 = vmatpush.bf16.msrb.mxu0 %v4907_v56 }
 0x1f8   :  { %2939 = vmatpush.bf16.msra.mxu3 %v4455_v22 }
 0x1fa   :  { %3096 = vmatpush.bf16.msra.mxu1 %v4917_v5 }
 0x1fb   :  { %3086 = vmatpush.bf16.msrb.mxu0 %v4906_v61 }
 0x1fc   :  { %v2343_v18 = vpop.f32.mrf.mxu2  ;;  %v2319_v7 = vpop.f32.mrf.mxu0  ;;  %2940 = vmatpush.bf16.msra.mxu3 %v4447_v17 }
 0x1fd   :  { %v2344_v40 = vadd.f32 %v2343_v18, %v2331_v60  ;;  %v4904_v18 = vld [vmem:[#allocation11] sm:$0xff]  ;;  %v4915_v7 = vld [vmem:[#allocation11 + $0x58] sm:$0xff] }
 0x1fe   :  { %3097 = vmatpush.bf16.msra.mxu1 %v4916_v46  ;;  %v141_v60 = vld [vmem:[%s5466_s8 + $0xf] sm:$0x1] }
 0x1ff   :  { %3087 = vmatpush.bf16.msrb.mxu0 %v4905_v1  ;;  %3125 = vperm.xlu2 %4944, %v141_v60  }
 0x202   :  { %3098 = vmatpush.bf16.msra.mxu1 %v4915_v7 }
 0x203   :  { %3088 = vmatpush.bf16.msrb.mxu0 %v4904_v18 }
 0x204   :  { %v2345_v16 = vpop.f32.mrf.mxu2 }
 0x206   :  { %3099 = vmatpush.bf16.msra.mxu1 %v4914_v8 }
 0x209   :  { %v2356_v23 = vpop.f32.mrf.mxu3 }
 0x20a   :  { %v2357_v29 = vadd.f32 %v2356_v23, %v2344_v40  ;;  %3100 = vmatpush.bf16.msra.mxu1 %v4913_v14  ;;  %v4946_v23 = vld [vmem:[%s5466_s8 + $0xe] ss:$0 sm:$0xff] }
 0x20c   :  { %v2383_v28 = vadd.f32 %v2379_v27, %v2357_v29 }
 0x20e   :  { %v2407_v20 = vadd.f32 %v2403_v31, %v2383_v28  ;;  %3101 = vmatpush.bf16.msra.mxu1 %v4912_v11 }
 0x210   :  { %v2431_v50 = vadd.f32 %v2427_v32, %v2407_v20  ;;  %v3108_v20 = vld [vmem:[#allocation13] sm:$0xf] }
 0x211   :  { %v2358_v34 = vpop.f32.mrf.mxu3 }
 0x212   :  { %v2444_v44 = vadd.f32 %v2436_v51, %v2431_v50 }
 0x214   :  { %v2851_v33 = vpop.f32.mrf.mxu0  ;;  %v2448_v36 = vmax.f32 %v2444_v44, 0.0 }
 0x215   :  { %v2852_v58 = vadd.f32 %v2851_v33, %v2518_v39 }
 0x216   :  { %v2452_v45 = vpack.c.bf16 %v2448_v36, %v2448_v36 }
 0x217   :  { %v2864_v26 = vpop.f32.mrf.mxu1 }
 0x218   :  { %2889 = vmatmul.bf16.vlgmr.msrb.gmra.mxu3 %v2452_v45  ;;  %v2865_v30 = vadd.f32 %v2864_v26, %v2852_v58 }
 0x21c   :  { %v2853_v38 = vpop.f32.mrf.mxu0 }
 0x21f   :  { %v2866_v37 = vpop.f32.mrf.mxu1 }
 0x228   :  { %2941 = vmatmul.bf16.vlgmr.msra.gmra.mxu3 %v2452_v45 }
 0x22d   :  { %v2916_v43 = vpop.f32.mrf.mxu1 }
 0x234   :  { %v2903_v10 = vpop.f32.mrf.mxu0 }
 0x235   :  { %v2904_v24 = vadd.f32 %v2903_v10, %v2519_v63  ;;  %v2918_v48 = vpop.f32.mrf.mxu1 }
 0x237   :  { %v2917_v47 = vadd.f32 %v2916_v43, %v2904_v24 }
 0x23c   :  { %v2905_v2 = vpop.f32.mrf.mxu0 }
 0x259   :  { %v3126_v51 = vpop.permute.xlu2 %3125 }
 0x25a   :  { %v3128_v50 = vperm.slane %v3126_v51, 0 }
 0x25b   :  { %v2877_v9 = vpop.f32.mrf.mxu2 }
 0x25c   :  { %v2878_v12 = vadd.f32 %v2877_v9, %v2865_v30 }
 0x263   :  { %v2879_v57 = vpop.f32.mrf.mxu2 }
 0x26b   :  { %v2929_v0 = vpop.f32.mrf.mxu2 }
 0x26c   :  { %v2930_v17 = vadd.f32 %v2929_v0, %v2917_v47 }
 0x273   :  { %v2931_v3 = vpop.f32.mrf.mxu2 }
 0x29b   :  { %v2890_v22 = vpop.f32.mrf.mxu3 }
 0x29c   :  { %v2891_v42 = vadd.f32 %v2890_v22, %v2878_v12 }
 0x29e   :  { %v2946_v15 = vmax.f32 %v2891_v42, 0.0 }
 0x2a0   :  { %v2948_v62 = vpack.c.bf16 %v2946_v15, %v2946_v15 }
 0x2a2   :  { %3089 = vmatmul.bf16.vlgmr.msrb.gmra.mxu0 %v2948_v62 }
 0x2a3   :  { %v2892_v16 = vpop.f32.mrf.mxu3 }
 0x2ab   :  { %v2942_v13 = vpop.f32.mrf.mxu3 }
 0x2ac   :  { %v2943_v19 = vadd.f32 %v2942_v13, %v2930_v17 }
 0x2ae   :  { %v2947_v21 = vmax.f32 %v2943_v19, 0.0 }
 0x2b0   :  { %v2949_v41 = vpack.c.bf16 %v2947_v21, %v2947_v21 }
 0x2b2   :  { %3102 = vmatmul.bf16.vlgmr.msra.gmra.mxu1 %v2949_v41 }
 0x2b3   :  { %v2944_v4 = vpop.f32.mrf.mxu3 }
 0x31f   :  { %v3090_v25 = vpop.f32.mrf.mxu0 }
 0x320   :  { %v3091_v27 = vadd.f32 %v4946_v23, %v3090_v25 }
 0x327   :  { %v3092_v40 = vpop.f32.mrf.mxu0 }
 0x32f   :  { %v3103_v59 = vpop.f32.mrf.mxu1 }
 0x330   :  { %v3104_v29 = vadd.f32 %v3103_v59, %v3091_v27 }
 0x332   :  { %v3107_v31 = vmax.f32 %v3104_v29, 0.0 }
 0x334   :  { %v3109_v28 = vpack.c.bf16 %v3107_v31, %v3107_v31 }
 0x336   :  { %3117 = vmatpush.bf16.xpose.msra.mxu2 %v3109_v28 }
 0x337   :  { %v3105_v32 = vpop.f32.mrf.mxu1 }
 0x33d   :  { %3118 = vmatmul.bf16.vlgmr.msra.gmra.mxu2 %v3108_v20 }
 0x3c0   :  { %v3119_v33 = vpop.f32.mrf.mxu2 }
 0x3c1   :  { %v3129_v34 = vadd.f32 %v3128_v50, %v3119_v33 }
 0x3c3   :  { %3131 = vst.msk [vmem:[#allocation14] sm:$0x1] %vm3130_vm1, %v3129_v34 }
 0x3c4   :  { %3142 = dma.vmem_to_hbm [thread:$0]  %s3138_s12, 16, %s3140_s15, [#allocation4]  }
 0x3c8   :  { %v3121_v44 = vpop.f32.mrf.mxu2 }
 0x3c9   :  { %5147 = dma.done.wait [#allocation4], 16  }
 0x3ca   :  { %5148 = vsyncadd [#allocation4], 4294967280 }
 0x3cb   :  { %3147 = vsyncpa [#allocation3], 1 }
 0x3cc   :  { %3148 = vsyncpa [#allocation6], 1 }
 0x3cd   :  { %3149 = vsyncpa [#allocation9], 1 }
 0x3ce   :  { %3150 = vsyncpa [#allocation12], 1 }
 0x3cf   :  { %3151 = vsyncpa [#allocation4], 1 }

// kernel: tpu_custom_call.1
= control target key start
LH: loop header
LB: loop body
LE: loop exit
PB: predicated region body
PF: predicated region fallthrough
CT: control target
= control target key end

     0   :  { %14 = vsyncpa [#allocation3], 0  ;;  %s5458_s0 = inlined_call_operand.hbm [shape: f32[8,32], index: 0, kind: input, shape index: {}]   ;;  %s5459_s1 = inlined_call_operand.vmem [shape: f32[8,4], index: 1, kind: input, shape index: {}]   ;;  %s5460_s2 = inlined_call_operand.hbm [shape: bf16[32,1024], index: 2, kind: input, shape index: {}]   ;;  %s5461_s3 = inlined_call_operand.hbm [shape: bf16[1024,512], index: 3, kind: input, shape index: {}]   ;;  %s5462_s4 = inlined_call_operand.hbm [shape: bf16[4,512], index: 4, kind: input, shape index: {}]   ;;  %s5463_s5 = inlined_call_operand.hbm [shape: bf16[512,256], index: 5, kind: input, shape index: {}]   ;;  %s5464_s6 = inlined_call_operand.hbm [shape: bf16[256,128], index: 6, kind: input, shape index: {}]   ;;  %s5465_s7 = inlined_call_operand.hbm [shape: bf16[8,128], index: 7, kind: input, shape index: {}]   ;;  %s5466_s8 = inlined_call_operand.vmem [shape: f32[1,1921], index: 8, kind: input, shape index: {}]   ;;  %s5467_s9 = inlined_call_operand.hbm [shape: f32[1,8], index: 9, kind: output, shape index: {}]  }
   0x1   :  { %15 = vsyncpa [#allocation6], 0 }
   0x2   :  { %16 = vsyncpa [#allocation9], 0 }
   0x3   :  { %17 = vsyncpa [#allocation12], 0  ;;  %s36_s11 = sshll.u32 %s5460_s2, 4  ;;  %s37_s11 = int_to_ptr.hbm [resolvable:$true] %s36_s11 }
   0x4   :  { %18 = vsyncpa [#allocation4], 0  ;;  %s5149_s12 = smov [#allocation5]   ;;  %s63_s16 = sshll.u32 %s5462_s4, 4  ;;  %s64_s16 = int_to_ptr.hbm [resolvable:$true] %s63_s16 }
   0x5   :  { %s38_s13 = sshll.u32 %s5149_s12, 4  ;;  %s5150_s17 = smov 512   ;;  %s39_s13 = int_to_ptr.vmem [resolvable:$true] %s38_s13 }
   0x6   :  { %s5151_s18 = smov 32   ;;  %s5152_s19 = smov [#allocation8]  }
   0x7   :  { %44 = dma.hbm_to_vmem [thread:$0]  %s37_s11, 2048, %s39_s13, [#allocation6], %s5150_s17, %s5150_s17, %s5151_s18  }
   0x8   :  { %s65_s20 = sshll.u32 %s5152_s19, 4  ;;  %s86_s23 = sshll.u32 %s5464_s6, 4  ;;  %s66_s20 = int_to_ptr.vmem [resolvable:$true] %s65_s20  ;;  %s87_s23 = int_to_ptr.hbm [resolvable:$true] %s86_s23 }
   0x9   :  { %68 = dma.hbm_to_vmem [thread:$0]  %s64_s16, 128, %s66_s20, [#allocation9]  }
   0xa   :  { %s5153_s2 = smov [#allocation11]   ;;  %s24_s4 = sshll.u32 %s5458_s0, 4  ;;  %s25_s4 = int_to_ptr.hbm [resolvable:$true] %s24_s4 }
   0xb   :  { %s88_s24 = sshll.u32 %s5153_s2, 4  ;;  %s5154_s27 = smov 64   ;;  %s89_s24 = int_to_ptr.vmem [resolvable:$true] %s88_s24 }
   0xc   :  { %s5155_s28 = smov 4   ;;  %s5156_s29 = smov [#allocation2]  }
   0xd   :  { %94 = dma.hbm_to_vmem [thread:$0]  %s87_s23, 2048, %s89_s24, [#allocation12], %s5154_s27, %s5154_s27, %s5155_s28  }
   0xe   :  { %s26_s30 = sshll.u32 %s5156_s29, 4  ;;  %s49_s6 = sshll.u32 %s5461_s3, 4  ;;  %s27_s30 = int_to_ptr.vmem [resolvable:$true] %s26_s30  ;;  %s50_s6 = int_to_ptr.hbm [resolvable:$true] %s49_s6 }
   0xf   :  { %29 = dma.hbm_to_vmem [thread:$0]  %s25_s4, 128, %s27_s30, [#allocation3]  }
  0x10   :  { %s5157_s12 = smov [#allocation7]   ;;  %s73_s0 = sshll.u32 %s5463_s5, 4  ;;  %s74_s0 = int_to_ptr.hbm [resolvable:$true] %s73_s0 }
  0x11   :  { %s51_s13 = sshll.u32 %s5157_s12, 4  ;;  %s5158_s16 = smov 256   ;;  %s52_s13 = int_to_ptr.vmem [resolvable:$true] %s51_s13 }
  0x12   :  { %s5159_s17 = smov 16   ;;  %s5160_s18 = smov [#allocation10]  }
  0x13   :  { %57 = dma.hbm_to_vmem [thread:$0]  %s50_s6, 32768, %s52_s13, [#allocation6], %s5158_s16, %s5158_s16, %s5159_s17  }
  0x14   :  { %s75_s19 = sshll.u32 %s5160_s18, 4  ;;  %s5161_s20 = smov 128   ;;  %s76_s19 = int_to_ptr.vmem [resolvable:$true] %s75_s19 }
  0x15   :  { %s5162_s21 = smov 8   ;;  %s100_s23 = sshll.u32 %s5465_s7, 4  ;;  %s101_s23 = int_to_ptr.hbm [resolvable:$true] %s100_s23 }
  0x16   :  { %81 = dma.hbm_to_vmem [thread:$0]  %s74_s0, 8192, %s76_s19, [#allocation9], %s5161_s20, %s5161_s20, %s5162_s21  }
  0x17   :  { %s5163_s2 = smov [#allocation13]  }
  0x18   :  { %s102_s24 = sshll.u32 %s5163_s2, 4  ;;  %s103_s24 = int_to_ptr.vmem [resolvable:$true] %s102_s24 }
  0x19   :  { %105 = dma.hbm_to_vmem [thread:$0]  %s101_s23, 64, %s103_s24, [#allocation12]  }
  0x1a   :  { %5139 = dma.done.wait [#allocation3], 128  }
  0x1b   :  { %5140 = vsyncadd [#allocation3], 4294967168 }
  0x1c   :  { %5141 = dma.done.wait [#allocation6], 34816  }
  0x1d   :  { %5142 = vsyncadd [#allocation6], 4294932480 }
  0x1e   :  { %5143 = dma.done.wait [#allocation9], 8320  }
  0x1f   :  { %5144 = vsyncadd [#allocation9], 4294958976 }
  0x20   :  { %5145 = dma.done.wait [#allocation12], 2112  }
  0x21   :  { %5146 = vsyncadd [#allocation12], 4294965184  ;;  %v3186_v0 = vld [vmem:[#allocation5 + $0x40] sm:$0xf]  ;;  %v4576_v2 = vld [vmem:[#allocation5 + $0x44] sm:$0xf] }
  0x22   :  { %v4580_v1 = vld [vmem:[#allocation5 + $0x5c] sm:$0xf0]  ;;  %v3188_v4 = vld [vmem:[#allocation5 + $0x60] sm:$0xf0]  ;;  %v3194_v5 = vld [vmem:[#allocation5 + $0x48] sm:$0xf] }
  0x23   :  { %v3187_v3 = vor.u32 %v4580_v1, %v3186_v0  ;;  %v4581_v6 = vld [vmem:[#allocation5 + $0x64] sm:$0xf0]  ;;  %v3191_v7 = vor.u32 %v4576_v2, %v3188_v4  ;;  %v3154_v9 = vld [vmem:[#allocation5] sm:$0xf]  ;;  %v4568_v11 = vld [vmem:[#allocation5 + $0x4] sm:$0xf] }
  0x24   :  { %v3195_v8 = vor.u32 %v4581_v6, %v3194_v5  ;;  %v4572_v10 = vld [vmem:[#allocation5 + $0x1c] sm:$0xf0]  ;;  %v3156_v13 = vld [vmem:[#allocation5 + $0x20] sm:$0xf0]  ;;  %v3162_v14 = vld [vmem:[#allocation5 + $0x8] sm:$0xf] }
  0x25   :  { %267 = vmatpush.bf16.msra.mxu3 %v3187_v3  ;;  %v3155_v12 = vor.u32 %v4572_v10, %v3154_v9  ;;  %v4573_v15 = vld [vmem:[#allocation5 + $0x24] sm:$0xf0]  ;;  %280 = vmatpush.bf16.msra.mxu1 %v3191_v7  ;;  %v3159_v16 = vor.u32 %v4568_v11, %v3156_v13  ;;  %v142_v18 = vld [vmem:[#allocation2] sm:$0xff]  ;;  %vm257_vm0 = vcmask 261120   ;;  %v4577_v19 = vld [vmem:[#allocation5 + $0x4c] sm:$0xf] }
  0x26   :  { %293 = vmatpush.bf16.msra.mxu2 %v3195_v8  ;;  %v3163_v17 = vor.u32 %v4573_v15, %v3162_v14  ;;  %v3196_v20 = vld [vmem:[#allocation5 + $0x68] sm:$0xf0]  ;;  %v4578_v22 = vld [vmem:[#allocation5 + $0x54] sm:$0xf]  ;;  %v3210_v24 = vld [vmem:[#allocation5 + $0x58] sm:$0xf]  ;;  %v5240_v25 = vpack.c.bf16 %v142_v18, %v142_v18 }
  0x27   :  { %v3199_v21 = vor.u32 %v4577_v19, %v3196_v20  ;;  %v3204_v23 = vld [vmem:[#allocation5 + $0x70] sm:$0xf0]  ;;  %v4583_v27 = vld [vmem:[#allocation5 + $0x74] sm:$0xf0]  ;;  %v4569_v28 = vld [vmem:[#allocation5 + $0xc] sm:$0xf] }
  0x28   :  { %v3207_v26 = vor.u32 %v4578_v22, %v3204_v23  ;;  %v3164_v29 = vld [vmem:[#allocation5 + $0x28] sm:$0xf0]  ;;  %v3211_v30 = vor.u32 %v4583_v27, %v3210_v24  ;;  %v4570_v31 = vld [vmem:[#allocation5 + $0x14] sm:$0xf]  ;;  %v3178_v33 = vld [vmem:[#allocation5 + $0x18] sm:$0xf] }
  0x29   :  { %268 = vmatpush.bf16.msra.mxu3 %v3155_v12  ;;  %v3172_v32 = vld [vmem:[#allocation5 + $0x30] sm:$0xf0]  ;;  %281 = vmatpush.bf16.msra.mxu1 %v3159_v16  ;;  %v4575_v34 = vld [vmem:[#allocation5 + $0x34] sm:$0xf0]  ;;  %v3202_v35 = vld [vmem:[#allocation5 + $0x50] sm:$0xf]  ;;  %v3167_v37 = vor.u32 %v4569_v28, %v3164_v29 }
  0x2a   :  { %294 = vmatpush.bf16.msra.mxu2 %v3163_v17  ;;  %v4582_v36 = vld [vmem:[#allocation5 + $0x6c] sm:$0xf0]  ;;  %v3175_v38 = vor.u32 %v4570_v31, %v3172_v32  ;;  %v4579_v42 = vld [vmem:[#allocation5 + $0x5c] sm:$0xf]  ;;  %v3179_v43 = vor.u32 %v4575_v34, %v3178_v33  ;;  %v3466_v48 = vld [vmem:[#allocation7 + $0x1e0] sm:$0xf] }
  0x2b   :  { %v3203_v39 = vor.u32 %v4582_v36, %v3202_v35  ;;  %v3170_v40 = vld [vmem:[#allocation5 + $0x10] sm:$0xf]  ;;  %v3212_v44 = vld [vmem:[#allocation5 + $0x78] sm:$0xf0]  ;;  %v3450_v50 = vld [vmem:[#allocation7 + $0x1c0] sm:$0xf] }
  0x2c   :  { %v4574_v41 = vld [vmem:[#allocation5 + $0x2c] sm:$0xf0]  ;;  %3216 = vmatmul.msk.bf16.vlgmr.msra.gmra.mxu3 %vm257_vm0, %v5240_v25  ;;  %v4571_v45 = vld [vmem:[#allocation5 + $0x1c] sm:$0xf]  ;;  %3217 = vmatmul.msk.bf16.vlgmr.msra.gmra.mxu1 %vm257_vm0, %v5240_v25  ;;  %v3215_v47 = vor.u32 %v4579_v42, %v3212_v44  ;;  %v3338_v54 = vld [vmem:[#allocation7 + $0xe0] sm:$0xf] }
  0x2d   :  { %306 = vmatpush.bf16.msrb.mxu3 %v3199_v21  ;;  %332 = vmatpush.bf16.msrb.mxu1 %v3207_v26  ;;  %v3180_v46 = vld [vmem:[#allocation5 + $0x38] sm:$0xf0]  ;;  %v4646_v49 = vld [vmem:[#allocation7 + $0x1ec] sm:$0xf0]  ;;  %v3171_v51 = vor.u32 %v4574_v41, %v3170_v40  ;;  %v3594_v57 = vld [vmem:[#allocation7 + $0x2e0] sm:$0xf] }
  0x2e   :  { %345 = vmatpush.bf16.msrb.mxu2 %v3211_v30  ;;  %319 = vmatpush.bf16.msra.mxu0 %v3203_v39  ;;  %v3467_v52 = vor.u32 %v4646_v49, %v3466_v48  ;;  %v4642_v53 = vld [vmem:[#allocation7 + $0x1cc] sm:$0xf0]  ;;  %v3183_v59 = vor.u32 %v4571_v45, %v3180_v46  ;;  %v3322_v61 = vld [vmem:[#allocation7 + $0xc0] sm:$0xf]  ;;  %s5168_s6 = smov [#allocation14]   ;;  %s3139_s15 = sshll.u32 %s5467_s9, 4  ;;  %s3140_s15 = int_to_ptr.hbm [resolvable:$true] %s3139_s15 }
  0x2f   :  { %3218 = vmatmul.msk.bf16.vlgmr.msra.gmra.mxu2 %vm257_vm0, %v5240_v25  ;;  %v4614_v55 = vld [vmem:[#allocation7 + $0xec] sm:$0xf0]  ;;  %v3451_v63 = vor.u32 %v4642_v53, %v3450_v50  ;;  %v3578_v0 = vld [vmem:[#allocation7 + $0x2c0] sm:$0xf]  ;;  %s3137_s12 = sshll.u32 %s5168_s6, 4  ;;  %vm3130_vm1 = vcmask 57344   ;;  %s3138_s12 = int_to_ptr.vmem [resolvable:$true] %s3137_s12 }
  0x30   :  { %v3339_v56 = vor.u32 %v4614_v55, %v3338_v54  ;;  %v4678_v58 = vld [vmem:[#allocation7 + $0x2ec] sm:$0xf0]  ;;  %v3434_v2 = vld [vmem:[#allocation7 + $0x1a0] sm:$0xf] }
  0x31   :  { %307 = vmatpush.bf16.msrb.mxu3 %v3167_v37  ;;  %333 = vmatpush.bf16.msrb.mxu1 %v3175_v38  ;;  %v3595_v60 = vor.u32 %v4678_v58, %v3594_v57  ;;  %v4610_v62 = vld [vmem:[#allocation7 + $0xcc] sm:$0xf0]  ;;  %v3562_v6 = vld [vmem:[#allocation7 + $0x2a0] sm:$0xf] }
  0x32   :  { %346 = vmatpush.bf16.msrb.mxu2 %v3179_v43  ;;  %v4674_v1 = vld [vmem:[#allocation7 + $0x2cc] sm:$0xf0]  ;;  %320 = vmatpush.bf16.msra.mxu0 %v3171_v51  ;;  %v3323_v5 = vor.u32 %v4610_v62, %v3322_v61  ;;  %v3306_v8 = vld [vmem:[#allocation7 + $0xa0] sm:$0xf] }
  0x33   :  { %v4638_v3 = vld [vmem:[#allocation7 + $0x1ac] sm:$0xf0]  ;;  %v3579_v4 = vor.u32 %v4674_v1, %v3578_v0  ;;  %v3418_v11 = vld [vmem:[#allocation7 + $0x180] sm:$0xf] }
  0x34   :  { %v4670_v7 = vld [vmem:[#allocation7 + $0x2ac] sm:$0xf0]  ;;  %v3435_v10 = vor.u32 %v4638_v3, %v3434_v2  ;;  %v3290_v15 = vld [vmem:[#allocation7 + $0x80] sm:$0xf] }
  0x35   :  { %358 = vmatpush.bf16.msra.mxu3 %v3215_v47  ;;  %1957 = vmatpush.bf16.msra.mxu1 %v3467_v52  ;;  %v4606_v9 = vld [vmem:[#allocation7 + $0xac] sm:$0xf0]  ;;  %v3563_v13 = vor.u32 %v4670_v7, %v3562_v6  ;;  %v3546_v16 = vld [vmem:[#allocation7 + $0x280] sm:$0xf] }
  0x36   :  { %1970 = vmatpush.bf16.msra.mxu2 %v3595_v60  ;;  %1944 = vmatpush.bf16.msrb.mxu0 %v3339_v56  ;;  %v4634_v12 = vld [vmem:[#allocation7 + $0x18c] sm:$0xf0]  ;;  %v3307_v14 = vor.u32 %v4606_v9, %v3306_v8  ;;  %v3722_v19 = vld [vmem:[#allocation7 + $0x3e0] sm:$0xf] }
  0x37   :  { %3220 = vmatmul.msk.bf16.vlgmr.msra.gmra.mxu0 %vm257_vm0, %v5240_v25  ;;  %v4666_v17 = vld [vmem:[#allocation7 + $0x28c] sm:$0xf0]  ;;  %v3419_v21 = vor.u32 %v4634_v12, %v3418_v11  ;;  %v3402_v22 = vld [vmem:[#allocation7 + $0x160] sm:$0xf] }
  0x38   :  { %v4602_v18 = vld [vmem:[#allocation7 + $0x8c] sm:$0xf0]  ;;  %v3547_v24 = vor.u32 %v4666_v17, %v3546_v16  ;;  %v3274_v27 = vld [vmem:[#allocation7 + $0x60] sm:$0xf] }
  0x39   :  { %359 = vmatpush.bf16.msra.mxu3 %v3183_v59  ;;  %1958 = vmatpush.bf16.msra.mxu1 %v3451_v63  ;;  %v4710_v20 = vld [vmem:[#allocation7 + $0x3ec] sm:$0xf0]  ;;  %v3291_v26 = vor.u32 %v4602_v18, %v3290_v15  ;;  %v3530_v28 = vld [vmem:[#allocation7 + $0x260] sm:$0xf] }
  0x3a   :  { %1971 = vmatpush.bf16.msra.mxu2 %v3579_v4  ;;  %1945 = vmatpush.bf16.msrb.mxu0 %v3323_v5  ;;  %v4630_v23 = vld [vmem:[#allocation7 + $0x16c] sm:$0xf0]  ;;  %v3723_v30 = vor.u32 %v4710_v20, %v3722_v19  ;;  %v3706_v32 = vld [vmem:[#allocation7 + $0x3c0] sm:$0xf] }
  0x3b   :  { %v4662_v29 = vld [vmem:[#allocation7 + $0x26c] sm:$0xf0]  ;;  %v3403_v34 = vor.u32 %v4630_v23, %v3402_v22  ;;  %v3386_v35 = vld [vmem:[#allocation7 + $0x140] sm:$0xf] }
  0x3c   :  { %3219 = vmatmul.msk.bf16.vlgmr.msrb.gmra.mxu3 %vm257_vm0, %v5240_v25  ;;  %v4598_v31 = vld [vmem:[#allocation7 + $0x6c] sm:$0xf0]  ;;  %3221 = vmatmul.msk.bf16.vlgmr.msrb.gmra.mxu1 %vm257_vm0, %v5240_v25  ;;  %v3531_v37 = vor.u32 %v4662_v29, %v3530_v28  ;;  %v3258_v39 = vld [vmem:[#allocation7 + $0x40] sm:$0xf] }
  0x3d   :  { %1959 = vmatpush.bf16.msra.mxu1 %v3435_v10  ;;  %v4706_v33 = vld [vmem:[#allocation7 + $0x3cc] sm:$0xf0]  ;;  %v3275_v38 = vor.u32 %v4598_v31, %v3274_v27  ;;  %1983 = vmatpush.bf16.msrb.mxu3 %v3723_v30  ;;  %v3514_v40 = vld [vmem:[#allocation7 + $0x240] sm:$0xf] }
  0x3e   :  { %1972 = vmatpush.bf16.msra.mxu2 %v3563_v13  ;;  %1946 = vmatpush.bf16.msrb.mxu0 %v3307_v14  ;;  %v4626_v36 = vld [vmem:[#allocation7 + $0x14c] sm:$0xf0]  ;;  %v3707_v42 = vor.u32 %v4706_v33, %v3706_v32  ;;  %v3690_v44 = vld [vmem:[#allocation7 + $0x3a0] sm:$0xf] }
  0x3f   :  { %3222 = vmatmul.msk.bf16.vlgmr.msrb.gmra.mxu2 %vm257_vm0, %v5240_v25  ;;  %v4658_v41 = vld [vmem:[#allocation7 + $0x24c] sm:$0xf0]  ;;  %v3387_v46 = vor.u32 %v4626_v36, %v3386_v35  ;;  %v3370_v47 = vld [vmem:[#allocation7 + $0x120] sm:$0xf] }
  0x40   :  { %v4594_v43 = vld [vmem:[#allocation7 + $0x4c] sm:$0xf0]  ;;  %v3515_v49 = vor.u32 %v4658_v41, %v3514_v40  ;;  %v3242_v51 = vld [vmem:[#allocation7 + $0x20] sm:$0xf] }
  0x41   :  { %1960 = vmatpush.bf16.msra.mxu1 %v3419_v21  ;;  %v4702_v45 = vld [vmem:[#allocation7 + $0x3ac] sm:$0xf0]  ;;  %v3259_v50 = vor.u32 %v4594_v43, %v3258_v39  ;;  %1984 = vmatpush.bf16.msrb.mxu3 %v3707_v42  ;;  %v3498_v52 = vld [vmem:[#allocation7 + $0x220] sm:$0xf] }
  0x42   :  { %1973 = vmatpush.bf16.msra.mxu2 %v3547_v24  ;;  %1947 = vmatpush.bf16.msrb.mxu0 %v3291_v26  ;;  %v4622_v48 = vld [vmem:[#allocation7 + $0x12c] sm:$0xf0]  ;;  %v3691_v54 = vor.u32 %v4702_v45, %v3690_v44  ;;  %v3674_v56 = vld [vmem:[#allocation7 + $0x380] sm:$0xf] }
  0x43   :  { %v4654_v53 = vld [vmem:[#allocation7 + $0x22c] sm:$0xf0]  ;;  %v3371_v58 = vor.u32 %v4622_v48, %v3370_v47  ;;  %v3354_v59 = vld [vmem:[#allocation7 + $0x100] sm:$0xf] }
  0x44   :  { %v4590_v55 = vld [vmem:[#allocation7 + $0x2c] sm:$0xf0]  ;;  %v3978_v61 = vld [vmem:[#allocation7 + $0x5e0] sm:$0xf]  ;;  %v3499_v62 = vor.u32 %v4654_v53, %v3498_v52 }
  0x45   :  { %1961 = vmatpush.bf16.msra.mxu1 %v3403_v34  ;;  %v4698_v57 = vld [vmem:[#allocation7 + $0x38c] sm:$0xf0]  ;;  %v3243_v0 = vor.u32 %v4590_v55, %v3242_v51  ;;  %1985 = vmatpush.bf16.msrb.mxu3 %v3691_v54  ;;  %v3482_v1 = vld [vmem:[#allocation7 + $0x200] sm:$0xf] }
  0x46   :  { %1974 = vmatpush.bf16.msra.mxu2 %v3531_v37  ;;  %1948 = vmatpush.bf16.msrb.mxu0 %v3275_v38  ;;  %v4618_v60 = vld [vmem:[#allocation7 + $0x10c] sm:$0xf0]  ;;  %v3675_v3 = vor.u32 %v4698_v57, %v3674_v56  ;;  %v3226_v4 = vld [vmem:[#allocation7] sm:$0xf] }
  0x47   :  { %v4774_v63 = vld [vmem:[#allocation7 + $0x5ec] sm:$0xf0]  ;;  %v3850_v6 = vld [vmem:[#allocation7 + $0x4e0] sm:$0xf]  ;;  %v3355_v10 = vor.u32 %v4618_v60, %v3354_v59 }
  0x48   :  { %v4650_v2 = vld [vmem:[#allocation7 + $0x20c] sm:$0xf0]  ;;  %v4106_v8 = vld [vmem:[#allocation7 + $0x6e0] sm:$0xf]  ;;  %v3979_v14 = vor.u32 %v4774_v63, %v3978_v61 }
  0x49   :  { %1962 = vmatpush.bf16.msra.mxu1 %v3387_v46  ;;  %v4586_v5 = vld [vmem:[#allocation7 + $0xc] sm:$0xf0]  ;;  %v3483_v11 = vor.u32 %v4650_v2, %v3482_v1  ;;  %v3658_v12 = vld [vmem:[#allocation7 + $0x360] sm:$0xf]  ;;  %1986 = vmatpush.bf16.msrb.mxu3 %v3675_v3 }
  0x4a   :  { %1975 = vmatpush.bf16.msra.mxu2 %v3515_v49  ;;  %1949 = vmatpush.bf16.msrb.mxu0 %v3259_v50  ;;  %v4742_v7 = vld [vmem:[#allocation7 + $0x4ec] sm:$0xf0]  ;;  %v3962_v15 = vld [vmem:[#allocation7 + $0x5c0] sm:$0xf]  ;;  %v3227_v16 = vor.u32 %v4586_v5, %v3226_v4 }
  0x4b   :  { %v4806_v9 = vld [vmem:[#allocation7 + $0x6ec] sm:$0xf0]  ;;  %v3851_v18 = vor.u32 %v4742_v7, %v3850_v6  ;;  %v3834_v20 = vld [vmem:[#allocation7 + $0x4c0] sm:$0xf] }
  0x4c   :  { %v4694_v13 = vld [vmem:[#allocation7 + $0x36c] sm:$0xf0]  ;;  %3223 = vmatmul.msk.bf16.vlgmr.msra.gmra.mxu3 %vm257_vm0, %v5240_v25  ;;  %v4107_v19 = vor.u32 %v4806_v9, %v4106_v8  ;;  %v4090_v23 = vld [vmem:[#allocation7 + $0x6c0] sm:$0xf] }
  0x4d   :  { %1963 = vmatpush.bf16.msra.mxu1 %v3371_v58  ;;  %v4770_v17 = vld [vmem:[#allocation7 + $0x5cc] sm:$0xf0]  ;;  %v3659_v21 = vor.u32 %v4694_v13, %v3658_v12  ;;  %v3642_v26 = vld [vmem:[#allocation7 + $0x340] sm:$0xf] }
  0x4e   :  { %1976 = vmatpush.bf16.msra.mxu2 %v3499_v62  ;;  %1950 = vmatpush.bf16.msrb.mxu0 %v3243_v0  ;;  %v4738_v22 = vld [vmem:[#allocation7 + $0x4cc] sm:$0xf0]  ;;  %v3963_v28 = vor.u32 %v4770_v17, %v3962_v15  ;;  %v3946_v29 = vld [vmem:[#allocation7 + $0x5a0] sm:$0xf] }
  0x4f   :  { %v4802_v24 = vld [vmem:[#allocation7 + $0x6cc] sm:$0xf0]  ;;  %v3835_v25 = vor.u32 %v4738_v22, %v3834_v20  ;;  %v3818_v32 = vld [vmem:[#allocation7 + $0x4a0] sm:$0xf]  ;;  %1987 = vmatpush.bf16.msrb.mxu3 %v3659_v21 }
  0x50   :  { %v4690_v27 = vld [vmem:[#allocation7 + $0x34c] sm:$0xf0]  ;;  %v4091_v31 = vor.u32 %v4802_v24, %v4090_v23  ;;  %v4074_v35 = vld [vmem:[#allocation7 + $0x6a0] sm:$0xf] }
  0x51   :  { %1964 = vmatpush.bf16.msra.mxu1 %v3355_v10  ;;  %v4766_v30 = vld [vmem:[#allocation7 + $0x5ac] sm:$0xf0]  ;;  %v3643_v33 = vor.u32 %v4690_v27, %v3642_v26  ;;  %v3626_v37 = vld [vmem:[#allocation7 + $0x320] sm:$0xf] }
  0x52   :  { %1977 = vmatpush.bf16.msra.mxu2 %v3483_v11  ;;  %1951 = vmatpush.bf16.msrb.mxu0 %v3227_v16  ;;  %v4734_v34 = vld [vmem:[#allocation7 + $0x4ac] sm:$0xf0]  ;;  %v3947_v39 = vor.u32 %v4766_v30, %v3946_v29  ;;  %v3930_v40 = vld [vmem:[#allocation7 + $0x580] sm:$0xf] }
  0x53   :  { %v4798_v36 = vld [vmem:[#allocation7 + $0x6ac] sm:$0xf0]  ;;  %v3819_v42 = vor.u32 %v4734_v34, %v3818_v32  ;;  %v3802_v44 = vld [vmem:[#allocation7 + $0x480] sm:$0xf]  ;;  %1988 = vmatpush.bf16.msrb.mxu3 %v3643_v33 }
  0x54   :  { %v4686_v38 = vld [vmem:[#allocation7 + $0x32c] sm:$0xf0]  ;;  %v4075_v43 = vor.u32 %v4798_v36, %v4074_v35  ;;  %v4058_v47 = vld [vmem:[#allocation7 + $0x680] sm:$0xf] }
  0x55   :  { %2009 = vmatpush.bf16.msrb.mxu1 %v3979_v14  ;;  %v4762_v41 = vld [vmem:[#allocation7 + $0x58c] sm:$0xf0]  ;;  %v3627_v45 = vor.u32 %v4686_v38, %v3626_v37  ;;  %v3610_v49 = vld [vmem:[#allocation7 + $0x300] sm:$0xf] }
  0x56   :  { %1996 = vmatpush.bf16.msra.mxu0 %v3851_v18  ;;  %2022 = vmatpush.bf16.msrb.mxu2 %v4107_v19  ;;  %v4730_v46 = vld [vmem:[#allocation7 + $0x48c] sm:$0xf0]  ;;  %v3931_v51 = vor.u32 %v4762_v41, %v3930_v40  ;;  %v3914_v52 = vld [vmem:[#allocation7 + $0x560] sm:$0xf] }
  0x57   :  { %v4794_v48 = vld [vmem:[#allocation7 + $0x68c] sm:$0xf0]  ;;  %v3803_v54 = vor.u32 %v4730_v46, %v3802_v44  ;;  %1989 = vmatpush.bf16.msrb.mxu3 %v3627_v45  ;;  %v3898_v58 = vld [vmem:[#allocation7 + $0x540] sm:$0xf]  ;;  %v5164_v45 = vmov 0   ;;  %v5262_v46 = vld [vmem:[%s5459_s1] sm:$0xff] }
  0x58   :  { %v4682_v50 = vld [vmem:[#allocation7 + $0x30c] sm:$0xf0]  ;;  %v4059_v55 = vor.u32 %v4794_v48, %v4058_v47  ;;  %v3786_v61 = vld [vmem:[#allocation7 + $0x460] sm:$0xf]  ;;  %4940 = vset.pattern.permute.xlu0 %v5164_v45  ;;  %4944 = vset.pattern.permute.xlu2 %v5164_v45 }
  0x59   :  { %2010 = vmatpush.bf16.msrb.mxu1 %v3963_v28  ;;  %v4758_v53 = vld [vmem:[#allocation7 + $0x56c] sm:$0xf0]  ;;  %v3611_v56 = vor.u32 %v4682_v50, %v3610_v49  ;;  %v4042_v63 = vld [vmem:[#allocation7 + $0x660] sm:$0xf]  ;;  %643 = vperm.xlu0 %4940, %v5262_v46   ;;  %v5269_v50 = vld [vmem:[%s5466_s8] sm:$0xff] }
  0x5a   :  { %1997 = vmatpush.bf16.msra.mxu0 %v3835_v25  ;;  %2023 = vmatpush.bf16.msrb.mxu2 %v4091_v31  ;;  %v3915_v57 = vor.u32 %v4758_v53, %v3914_v52  ;;  %v4754_v59 = vld [vmem:[#allocation7 + $0x54c] sm:$0xf0]  ;;  %v4234_v2 = vld [vmem:[#allocation7 + $0x7e0] sm:$0xf] }
  0x5b   :  { %1990 = vmatpush.bf16.msrb.mxu3 %v3611_v56  ;;  %v3899_v60 = vor.u32 %v4754_v59, %v3898_v58  ;;  %v4726_v62 = vld [vmem:[#allocation7 + $0x46c] sm:$0xf0]  ;;  %v3882_v6 = vld [vmem:[#allocation7 + $0x520] sm:$0xf]  ;;  %v3468_v58 = vld [vmem:[#allocation7 + $0x1f0] sm:$0xf0] }
  0x5c   :  { %v3787_v0 = vor.u32 %v4726_v62, %v3786_v61  ;;  %v4790_v1 = vld [vmem:[#allocation7 + $0x66c] sm:$0xf0]  ;;  %v3770_v9 = vld [vmem:[#allocation7 + $0x440] sm:$0xf]  ;;  %v161_v59 = vperm.slane %v5269_v50, 0  ;;  %v163_v61 = vperm.slane %v5269_v50, 2 }
  0x5d   :  { %2011 = vmatpush.bf16.msrb.mxu1 %v3947_v39  ;;  %v4838_v3 = vld [vmem:[#allocation7 + $0x7ec] sm:$0xf0]  ;;  %v4043_v4 = vor.u32 %v4790_v1, %v4042_v63  ;;  %v4026_v11 = vld [vmem:[#allocation7 + $0x640] sm:$0xf]  ;;  %v4640_v1 = vld [vmem:[#allocation7 + $0x1c4] sm:$0xf] }
  0x5e   :  { %1998 = vmatpush.bf16.msra.mxu0 %v3819_v42  ;;  %2024 = vmatpush.bf16.msrb.mxu2 %v4075_v43  ;;  %v4235_v5 = vor.u32 %v4838_v3, %v4234_v2  ;;  %v4750_v7 = vld [vmem:[#allocation7 + $0x52c] sm:$0xf0]  ;;  %v4218_v14 = vld [vmem:[#allocation7 + $0x7c0] sm:$0xf]  ;;  %v3452_v2 = vld [vmem:[#allocation7 + $0x1d0] sm:$0xf0] }
  0x5f   :  { %v3883_v8 = vor.u32 %v4750_v7, %v3882_v6  ;;  %v4722_v10 = vld [vmem:[#allocation7 + $0x44c] sm:$0xf0]  ;;  %v3866_v18 = vld [vmem:[#allocation7 + $0x500] sm:$0xf]  ;;  %v3340_v6 = vld [vmem:[#allocation7 + $0xf0] sm:$0xf0] }
  0x60   :  { %2035 = vmatpush.bf16.msra.mxu3 %v4235_v5  ;;  %v3771_v12 = vor.u32 %v4722_v10, %v3770_v9  ;;  %v4786_v13 = vld [vmem:[#allocation7 + $0x64c] sm:$0xf0]  ;;  %v3754_v21 = vld [vmem:[#allocation7 + $0x420] sm:$0xf]  ;;  %v4612_v5 = vld [vmem:[#allocation7 + $0xe4] sm:$0xf] }
  0x61   :  { %2012 = vmatpush.bf16.msrb.mxu1 %v3931_v51  ;;  %v4834_v15 = vld [vmem:[#allocation7 + $0x7cc] sm:$0xf0]  ;;  %v4027_v16 = vor.u32 %v4786_v13, %v4026_v11  ;;  %v4010_v23 = vld [vmem:[#allocation7 + $0x620] sm:$0xf]  ;;  %v3596_v9 = vld [vmem:[#allocation7 + $0x2f0] sm:$0xf0] }
  0x62   :  { %1999 = vmatpush.bf16.msra.mxu0 %v3803_v54  ;;  %2025 = vmatpush.bf16.msrb.mxu2 %v4059_v55  ;;  %v4219_v17 = vor.u32 %v4834_v15, %v4218_v14  ;;  %v4746_v19 = vld [vmem:[#allocation7 + $0x50c] sm:$0xf0]  ;;  %v4202_v27 = vld [vmem:[#allocation7 + $0x7a0] sm:$0xf]  ;;  %v162_v54 = vperm.slane %v5269_v50, 1  ;;  %v3343_v15 = vor.u32 %v4612_v5, %v3340_v6 }
  0x63   :  { %v3867_v20 = vor.u32 %v4746_v19, %v3866_v18  ;;  %v4718_v22 = vld [vmem:[#allocation7 + $0x42c] sm:$0xf0]  ;;  %v3738_v25 = vld [vmem:[#allocation7 + $0x400] sm:$0xf]  ;;  %v3276_v6 = vld [vmem:[#allocation7 + $0x70] sm:$0xf0] }
  0x64   :  { %2036 = vmatpush.bf16.msra.mxu3 %v4219_v17  ;;  %v3755_v24 = vor.u32 %v4718_v22, %v3754_v21  ;;  %v4782_v26 = vld [vmem:[#allocation7 + $0x62c] sm:$0xf0]  ;;  %v3994_v32 = vld [vmem:[#allocation7 + $0x600] sm:$0xf]  ;;  %v3436_v17 = vld [vmem:[#allocation7 + $0x1b0] sm:$0xf0] }
  0x65   :  { %2013 = vmatpush.bf16.msrb.mxu1 %v3915_v57  ;;  %v4830_v28 = vld [vmem:[#allocation7 + $0x7ac] sm:$0xf0]  ;;  %v4011_v29 = vor.u32 %v4782_v26, %v4010_v23  ;;  %v4186_v35 = vld [vmem:[#allocation7 + $0x780] sm:$0xf]  ;;  %v4644_v57 = vld [vmem:[#allocation7 + $0x1e4] sm:$0xf] }
  0x66   :  { %2000 = vmatpush.bf16.msra.mxu0 %v3787_v0  ;;  %2026 = vmatpush.bf16.msrb.mxu2 %v4043_v4  ;;  %v4203_v30 = vor.u32 %v4830_v28, %v4202_v27  ;;  %v4714_v31 = vld [vmem:[#allocation7 + $0x40c] sm:$0xf0]  ;;  %v4170_v39 = vld [vmem:[#allocation7 + $0x760] sm:$0xf]  ;;  %v3471_v62 = vor.u32 %v4644_v57, %v3468_v58  ;;  %v3324_v21 = vld [vmem:[#allocation7 + $0xd0] sm:$0xf0] }
  0x67   :  { %v3739_v33 = vor.u32 %v4714_v31, %v3738_v25  ;;  %v4778_v34 = vld [vmem:[#allocation7 + $0x60c] sm:$0xf0]  ;;  %v4154_v42 = vld [vmem:[#allocation7 + $0x740] sm:$0xf]  ;;  %v4672_v23 = vld [vmem:[#allocation7 + $0x2c4] sm:$0xf] }
  0x68   :  { %2037 = vmatpush.bf16.msra.mxu3 %v4203_v30  ;;  %v4826_v36 = vld [vmem:[#allocation7 + $0x78c] sm:$0xf0]  ;;  %v3995_v37 = vor.u32 %v4778_v34, %v3994_v32  ;;  %v4138_v47 = vld [vmem:[#allocation7 + $0x720] sm:$0xf]  ;;  %v166_v28 = vperm.slane %v5269_v50, 5  ;;  %v165_v31 = vperm.slane %v5269_v50, 4 }
  0x69   :  { %2014 = vmatpush.bf16.msrb.mxu1 %v3899_v60  ;;  %v4187_v38 = vor.u32 %v4826_v36, %v4186_v35  ;;  %v4822_v40 = vld [vmem:[#allocation7 + $0x76c] sm:$0xf0]  ;;  %v4122_v51 = vld [vmem:[#allocation7 + $0x700] sm:$0xf]  ;;  %v4632_v30 = vld [vmem:[#allocation7 + $0x184] sm:$0xf] }
  0x6a   :  { %2001 = vmatpush.bf16.msra.mxu0 %v3771_v12  ;;  %2027 = vmatpush.bf16.msrb.mxu2 %v4027_v16  ;;  %v4171_v41 = vor.u32 %v4822_v40, %v4170_v39  ;;  %v4818_v43 = vld [vmem:[#allocation7 + $0x74c] sm:$0xf0]  ;;  %v3455_v12 = vor.u32 %v4640_v1, %v3452_v2  ;;  %v4636_v16 = vld [vmem:[#allocation7 + $0x1a4] sm:$0xf]  ;;  %v3420_v25 = vld [vmem:[#allocation7 + $0x190] sm:$0xf0] }
  0x6b   :  { %v4155_v44 = vor.u32 %v4818_v43, %v4154_v42  ;;  %v4814_v48 = vld [vmem:[#allocation7 + $0x72c] sm:$0xf0]  ;;  %v3439_v26 = vor.u32 %v4636_v16, %v3436_v17  ;;  %v4604_v34 = vld [vmem:[#allocation7 + $0xa4] sm:$0xf]  ;;  %v3308_v35 = vld [vmem:[#allocation7 + $0xb0] sm:$0xf0]  ;;  %v3423_v39 = vor.u32 %v4632_v30, %v3420_v25 }
  0x6c   :  { %2038 = vmatpush.bf16.msra.mxu3 %v4187_v38  ;;  %v4139_v49 = vor.u32 %v4814_v48, %v4138_v47  ;;  %v4810_v52 = vld [vmem:[#allocation7 + $0x70c] sm:$0xf0]  ;;  %v4668_v36 = vld [vmem:[#allocation7 + $0x2a4] sm:$0xf]  ;;  %v3311_v42 = vor.u32 %v4604_v34, %v3308_v35  ;;  %v3404_v47 = vld [vmem:[#allocation7 + $0x170] sm:$0xf0] }
  0x6d   :  { %2015 = vmatpush.bf16.msrb.mxu1 %v3883_v8  ;;  %v4123_v53 = vor.u32 %v4810_v52, %v4122_v51  ;;  %v4676_v8 = vld [vmem:[#allocation7 + $0x2e4] sm:$0xf]  ;;  %v3292_v52 = vld [vmem:[#allocation7 + $0x90] sm:$0xf0] }
  0x6e   :  { %2002 = vmatpush.bf16.msra.mxu0 %v3755_v24  ;;  %2028 = vmatpush.bf16.msrb.mxu2 %v4011_v29  ;;  %v3599_v19 = vor.u32 %v4676_v8, %v3596_v9  ;;  %v3580_v24 = vld [vmem:[#allocation7 + $0x2d0] sm:$0xf0]  ;;  %v4600_v51 = vld [vmem:[#allocation7 + $0x84] sm:$0xf] }
  0x6f   :  { %v3532_v8 = vld [vmem:[#allocation7 + $0x270] sm:$0xf0]  ;;  %v4620_v16 = vld [vmem:[#allocation7 + $0x124] sm:$0xf] }
  0x70   :  { %2039 = vmatpush.bf16.msra.mxu3 %v4171_v41  ;;  %v3372_v17 = vld [vmem:[#allocation7 + $0x130] sm:$0xf0]  ;;  %v4616_v34 = vld [vmem:[#allocation7 + $0x104] sm:$0xf] }
  0x71   :  { %2016 = vmatpush.bf16.msrb.mxu1 %v3867_v20  ;;  %v4608_v20 = vld [vmem:[#allocation7 + $0xc4] sm:$0xf]  ;;  %v3516_v30 = vld [vmem:[#allocation7 + $0x250] sm:$0xf0]  ;;  %v3375_v25 = vor.u32 %v4620_v16, %v3372_v17 }
  0x72   :  { %2003 = vmatpush.bf16.msra.mxu0 %v3739_v33  ;;  %2029 = vmatpush.bf16.msrb.mxu2 %v3995_v37  ;;  %v3327_v29 = vor.u32 %v4608_v20, %v3324_v21  ;;  %v3583_v33 = vor.u32 %v4672_v23, %v3580_v24  ;;  %v3564_v37 = vld [vmem:[#allocation7 + $0x2b0] sm:$0xf0]  ;;  %v4592_v24 = vld [vmem:[#allocation7 + $0x44] sm:$0xf] }
  0x73   :  { %v3567_v48 = vor.u32 %v4668_v36, %v3564_v37  ;;  %v3356_v35 = vld [vmem:[#allocation7 + $0x110] sm:$0xf0] }
  0x74   :  { %2040 = vmatpush.bf16.msra.mxu3 %v4155_v44  ;;  %v4628_v44 = vld [vmem:[#allocation7 + $0x164] sm:$0xf] }
  0x75   :  { %v3407_v57 = vor.u32 %v4628_v44, %v3404_v47  ;;  %v4652_v44 = vld [vmem:[#allocation7 + $0x224] sm:$0xf]  ;;  %v3500_v47 = vld [vmem:[#allocation7 + $0x230] sm:$0xf0] }
  0x78   :  { %2041 = vmatpush.bf16.msra.mxu3 %v4139_v49  ;;  %v164_v49 = vperm.slane %v5269_v50, 3 }
  0x7c   :  { %2042 = vmatpush.bf16.msra.mxu3 %v4123_v53 }
  0xa9   :  { %v283_v55 = vpop.f32.mrf.mxu1 }
  0xaa   :  { %v284_v56 = vadd.f32 %v283_v55, %v162_v54  ;;  %v167_v54 = vperm.slane %v5269_v50, 6  ;;  %v4664_v55 = vld [vmem:[#allocation7 + $0x284] sm:$0xf] }
  0xac   :  { %v366_v60 = vmax.f32 %v284_v56, 0.0  ;;  %v3548_v56 = vld [vmem:[#allocation7 + $0x290] sm:$0xf0] }
  0xae   :  { %v5274_v63 = vpack.c.bf16 %v366_v60, %v366_v60 }
  0xaf   :  { %v270_v0 = vpop.f32.mrf.mxu3 }
  0xb0   :  { %v271_v3 = vadd.f32 %v270_v0, %v161_v59  ;;  %1965 = vmatmul.bf16.vlgmr.msra.gmra.mxu1 %v5274_v63  ;;  %v3388_v0 = vld [vmem:[#allocation7 + $0x150] sm:$0xf0] }
  0xb1   :  { %2061 = vmatpush.bf16.msra.mxu1 %v3471_v62  ;;  %v285_v11 = vpop.f32.mrf.mxu1  ;;  %v4624_v62 = vld [vmem:[#allocation7 + $0x144] sm:$0xf] }
  0xb2   :  { %v296_v4 = vpop.f32.mrf.mxu2  ;;  %v365_v10 = vmax.f32 %v271_v3, 0.0  ;;  %v3551_v3 = vor.u32 %v4664_v55, %v3548_v56  ;;  %v4708_v11 = vld [vmem:[#allocation7 + $0x3e4] sm:$0xf] }
  0xb3   :  { %v297_v7 = vadd.f32 %v296_v4, %v163_v61  ;;  %v3295_v61 = vor.u32 %v4600_v51, %v3292_v52  ;;  %v4596_v4 = vld [vmem:[#allocation7 + $0x64] sm:$0xf]  ;;  %v3692_v52 = vld [vmem:[#allocation7 + $0x3b0] sm:$0xf0] }
  0xb4   :  { %v322_v13 = vpop.f32.mrf.mxu0  ;;  %v5277_v18 = vpack.c.bf16 %v365_v10, %v365_v10  ;;  %v3391_v10 = vor.u32 %v4624_v62, %v3388_v0  ;;  %v3279_v21 = vor.u32 %v4596_v4, %v3276_v6  ;;  %v4700_v51 = vld [vmem:[#allocation7 + $0x3a4] sm:$0xf]  ;;  %v3676_v4 = vld [vmem:[#allocation7 + $0x390] sm:$0xf0] }
  0xb5   :  { %v367_v14 = vmax.f32 %v297_v7, 0.0  ;;  %2062 = vmatpush.bf16.msra.mxu1 %v3455_v12  ;;  %v323_v43 = vadd.f32 %v322_v13, %v165_v31  ;;  %v4660_v7 = vld [vmem:[#allocation7 + $0x264] sm:$0xf]  ;;  %v3724_v12 = vld [vmem:[#allocation7 + $0x3f0] sm:$0xf0]  ;;  %v3695_v62 = vor.u32 %v4700_v51, %v3692_v52 }
  0xb6   :  { %1952 = vmatmul.bf16.vlgmr.msrb.gmra.mxu0 %v5277_v18  ;;  %v3535_v23 = vor.u32 %v4660_v7, %v3532_v8  ;;  %v4704_v31 = vld [vmem:[#allocation7 + $0x3c4] sm:$0xf]  ;;  %v3852_v6 = vld [vmem:[#allocation7 + $0x4f0] sm:$0xf0] }
  0xb7   :  { %v5279_v22 = vpack.c.bf16 %v367_v14, %v367_v14  ;;  %2048 = vmatpush.bf16.msrb.mxu0 %v3343_v15  ;;  %v272_v27 = vpop.f32.mrf.mxu3  ;;  %v369_v60 = vmax.f32 %v323_v43, 0.0  ;;  %v3244_v43 = vld [vmem:[#allocation7 + $0x30] sm:$0xf0]  ;;  %v4768_v55 = vld [vmem:[#allocation7 + $0x5c4] sm:$0xf] }
  0xb8   :  { %v3727_v27 = vor.u32 %v4708_v11, %v3724_v12  ;;  %v4648_v0 = vld [vmem:[#allocation7 + $0x204] sm:$0xf]  ;;  %v3628_v52 = vld [vmem:[#allocation7 + $0x330] sm:$0xf0] }
  0xb9   :  { %1978 = vmatmul.bf16.vlgmr.msra.gmra.mxu2 %v5279_v22  ;;  %2063 = vmatpush.bf16.msra.mxu1 %v3439_v26  ;;  %v335_v38 = vpop.f32.mrf.mxu1  ;;  %v5290_v14 = vpack.c.bf16 %v369_v60, %v369_v60  ;;  %v4584_v60 = vld [vmem:[#allocation7 + $0x4] sm:$0xf] }
  0xba   :  { %2074 = vmatpush.bf16.msra.mxu2 %v3599_v19  ;;  %v298_v32 = vpop.f32.mrf.mxu2  ;;  %v336_v41 = vadd.f32 %v335_v38, %v166_v28  ;;  %v5165_v19 = vmov 2   ;;  %v3260_v28 = vld [vmem:[#allocation7 + $0x50] sm:$0xf0]  ;;  %v4772_v38 = vld [vmem:[#allocation7 + $0x5e4] sm:$0xf] }
  0xbb   :  { %2049 = vmatpush.bf16.msrb.mxu0 %v3327_v29  ;;  %4942 = vset.pattern.permute.xlu1 %v5165_v19  ;;  %v4656_v29 = vld [vmem:[#allocation7 + $0x244] sm:$0xf]  ;;  %v3708_v32 = vld [vmem:[#allocation7 + $0x3d0] sm:$0xf0]  ;;  %v3263_v36 = vor.u32 %v4592_v24, %v3260_v28 }
  0xbc   :  { %v324_v40 = vpop.f32.mrf.mxu0  ;;  %v370_v53 = vmax.f32 %v336_v41, 0.0  ;;  %2385 = vperm.xlu1 %4942, %v5262_v46   ;;  %v3519_v37 = vor.u32 %v4656_v29, %v3516_v30  ;;  %v4804_v8 = vld [vmem:[#allocation7 + $0x6e4] sm:$0xf]  ;;  %v4092_v30 = vld [vmem:[#allocation7 + $0x6d0] sm:$0xf0] }
  0xbd   :  { %2064 = vmatpush.bf16.msra.mxu1 %v3423_v39  ;;  %v3980_v39 = vld [vmem:[#allocation7 + $0x5f0] sm:$0xf0]  ;;  %v4588_v40 = vld [vmem:[#allocation7 + $0x24] sm:$0xf] }
  0xbe   :  { %2075 = vmatpush.bf16.msra.mxu2 %v3583_v33  ;;  %v5287_v58 = vpack.c.bf16 %v370_v53, %v370_v53  ;;  %v3983_v53 = vor.u32 %v4772_v38, %v3980_v39  ;;  %v3247_v56 = vor.u32 %v4588_v40, %v3244_v43  ;;  %v4692_v19 = vld [vmem:[#allocation7 + $0x364] sm:$0xf]  ;;  %v3820_v38 = vld [vmem:[#allocation7 + $0x4b0] sm:$0xf0] }
  0xbf   :  { %2050 = vmatpush.bf16.msrb.mxu0 %v3311_v42  ;;  %v309_v59 = vpop.f32.mrf.mxu3  ;;  %v3711_v42 = vor.u32 %v4704_v31, %v3708_v32  ;;  %v4736_v24 = vld [vmem:[#allocation7 + $0x4c4] sm:$0xf]  ;;  %v3932_v32 = vld [vmem:[#allocation7 + $0x590] sm:$0xf0] }
  0xc0   :  { %v310_v1 = vadd.f32 %v309_v59, %v164_v49  ;;  %2017 = vmatmul.bf16.vlgmr.msrb.gmra.mxu1 %v5287_v58  ;;  %v3359_v49 = vor.u32 %v4616_v34, %v3356_v35  ;;  %v3964_v59 = vld [vmem:[#allocation7 + $0x5d0] sm:$0xf0]  ;;  %v4800_v29 = vld [vmem:[#allocation7 + $0x6c4] sm:$0xf] }
  0xc1   :  { %2065 = vmatpush.bf16.msra.mxu1 %v3407_v57  ;;  %v337_v13 = vpop.f32.mrf.mxu1  ;;  %v3503_v57 = vor.u32 %v4652_v44, %v3500_v47  ;;  %v3967_v7 = vor.u32 %v4768_v55, %v3964_v59  ;;  %v4760_v31 = vld [vmem:[#allocation7 + $0x584] sm:$0xf]  ;;  %v3916_v44 = vld [vmem:[#allocation7 + $0x570] sm:$0xf0] }
  0xc2   :  { %2076 = vmatpush.bf16.msra.mxu2 %v3567_v48  ;;  %v348_v2 = vpop.f32.mrf.mxu2  ;;  %v368_v9 = vmax.f32 %v310_v1, 0.0  ;;  %v5166_v48 = vmov 1   ;;  %v3484_v1 = vld [vmem:[#allocation7 + $0x210] sm:$0xf0]  ;;  %v4764_v13 = vld [vmem:[#allocation7 + $0x5a4] sm:$0xf]  ;;  %v3935_v39 = vor.u32 %v4760_v31, %v3932_v32 }
  0xc3   :  { %v349_v5 = vadd.f32 %v348_v2, %v167_v54  ;;  %2051 = vmatpush.bf16.msrb.mxu0 %v3295_v61  ;;  %4941 = vset.pattern.permute.xlu0 %v5166_v48  ;;  %v168_v54 = vperm.slane %v5269_v50, 7  ;;  %v3228_v61 = vld [vmem:[#allocation7 + $0x10] sm:$0xf0]  ;;  %v4696_v2 = vld [vmem:[#allocation7 + $0x384] sm:$0xf]  ;;  %v3487_v12 = vor.u32 %v4648_v0, %v3484_v1 }
  0xc4   :  { %v5292_v20 = vpack.c.bf16 %v368_v9, %v368_v9  ;;  %2361 = vperm.xlu0 %4941, %v5262_v46   ;;  %v4108_v9 = vld [vmem:[#allocation7 + $0x6f0] sm:$0xf0]  ;;  %v3231_v11 = vor.u32 %v4584_v60, %v3228_v61  ;;  %v3679_v16 = vor.u32 %v4696_v2, %v3676_v4  ;;  %v4688_v35 = vld [vmem:[#allocation7 + $0x344] sm:$0xf]  ;;  %v4647_v31 = vld [vmem:[#allocation7 + $0x1f4] sm:$0xf0] }
  0xc5   :  { %v371_v15 = vmax.f32 %v349_v5, 0.0  ;;  %2066 = vmatpush.bf16.msra.mxu1 %v3391_v10  ;;  %v4740_v5 = vld [vmem:[#allocation7 + $0x4e4] sm:$0xf]  ;;  %v3900_v60 = vld [vmem:[#allocation7 + $0x550] sm:$0xf0] }
  0xc6   :  { %2077 = vmatpush.bf16.msra.mxu2 %v3551_v3  ;;  %1991 = vmatmul.bf16.vlgmr.msrb.gmra.mxu3 %v5292_v20  ;;  %v5167_v3 = vmov 3   ;;  %v3855_v17 = vor.u32 %v4740_v5, %v3852_v6  ;;  %v4796_v40 = vld [vmem:[#allocation7 + $0x6a4] sm:$0xf]  ;;  %v3612_v1 = vld [vmem:[#allocation7 + $0x310] sm:$0xf0] }
  0xc7   :  { %v5295_v26 = vpack.c.bf16 %v371_v15, %v371_v15  ;;  %2004 = vmatmul.bf16.vlgmr.msra.gmra.mxu0 %v5290_v14  ;;  %v311_v33 = vpop.f32.mrf.mxu3  ;;  %2087 = vmatpush.bf16.msrb.mxu3 %v3727_v27  ;;  %v3948_v15 = vld [vmem:[#allocation7 + $0x5b0] sm:$0xf0]  ;;  %v4756_v43 = vld [vmem:[#allocation7 + $0x564] sm:$0xf] }
  0xc8   :  { %2052 = vmatpush.bf16.msrb.mxu0 %v3279_v21  ;;  %4943 = vset.pattern.permute.xlu1 %v5167_v3  ;;  %v3660_v21 = vld [vmem:[#allocation7 + $0x370] sm:$0xf0]  ;;  %v3951_v28 = vor.u32 %v4764_v13, %v3948_v15  ;;  %v3919_v55 = vor.u32 %v4756_v43, %v3916_v44  ;;  %v4752_v59 = vld [vmem:[#allocation7 + $0x544] sm:$0xf]  ;;  %v4643_v43 = vld [vmem:[#allocation7 + $0x1d4] sm:$0xf0] }
  0xc9   :  { %2030 = vmatmul.bf16.vlgmr.msrb.gmra.mxu2 %v5295_v26  ;;  %2067 = vmatpush.bf16.msra.mxu1 %v3375_v25  ;;  %v3836_v27 = vld [vmem:[#allocation7 + $0x4d0] sm:$0xf0]  ;;  %v3663_v33 = vor.u32 %v4692_v19, %v3660_v21  ;;  %v4680_v0 = vld [vmem:[#allocation7 + $0x304] sm:$0xf]  ;;  %v3903_v6 = vor.u32 %v4752_v59, %v3900_v60  ;;  %v3602_v59 = vld [vmem:[#allocation7 + $0x2e8] sm:$0xf] }
  0xca   :  { %2078 = vmatpush.bf16.msra.mxu2 %v3535_v23  ;;  %v350_v41 = vpop.f32.mrf.mxu2  ;;  %2409 = vperm.xlu1 %4943, %v5262_v46   ;;  %v4111_v23 = vor.u32 %v4804_v8, %v4108_v9  ;;  %v3839_v34 = vor.u32 %v4736_v24, %v3836_v27  ;;  %v4724_v3 = vld [vmem:[#allocation7 + $0x464] sm:$0xf]  ;;  %v3788_v4 = vld [vmem:[#allocation7 + $0x470] sm:$0xf0]  ;;  %v4679_v60 = vld [vmem:[#allocation7 + $0x2f4] sm:$0xf0] }
  0xcb   :  { %2088 = vmatpush.bf16.msrb.mxu3 %v3711_v42  ;;  %v4076_v41 = vld [vmem:[#allocation7 + $0x6b0] sm:$0xf0]  ;;  %v4788_v5 = vld [vmem:[#allocation7 + $0x664] sm:$0xf] }
  0xcc   :  { %2053 = vmatpush.bf16.msrb.mxu0 %v3263_v36  ;;  %4945 = vset.pattern.permute.xlu0 %v5164_v45  ;;  %v4095_v36 = vor.u32 %v4800_v29, %v4092_v30  ;;  %v3644_v45 = vld [vmem:[#allocation7 + $0x350] sm:$0xf0]  ;;  %v4079_v51 = vor.u32 %v4796_v40, %v4076_v41  ;;  %v4748_v9 = vld [vmem:[#allocation7 + $0x524] sm:$0xf]  ;;  %v3474_v30 = vld [vmem:[#allocation7 + $0x1e8] sm:$0xf] }
  0xcd   :  { %2068 = vmatpush.bf16.msra.mxu1 %v3359_v49  ;;  %v3647_v47 = vor.u32 %v4688_v35, %v3644_v45  ;;  %v4684_v49 = vld [vmem:[#allocation7 + $0x324] sm:$0xf]  ;;  %v4236_v8 = vld [vmem:[#allocation7 + $0x7f0] sm:$0xf0]  ;;  %v3475_v40 = vor.u32 %v4647_v31, %v3474_v30 }
  0xce   :  { %2079 = vmatpush.bf16.msra.mxu2 %v3519_v37  ;;  %v4732_v37 = vld [vmem:[#allocation7 + $0x4a4] sm:$0xf]  ;;  %v3631_v61 = vor.u32 %v4684_v49, %v3628_v52  ;;  %v4220_v24 = vld [vmem:[#allocation7 + $0x7d0] sm:$0xf0] }
  0xcf   :  { %v361_v50 = vpop.f32.mrf.mxu3  ;;  %2089 = vmatpush.bf16.msrb.mxu3 %v3695_v62  ;;  %v3823_v48 = vor.u32 %v4732_v37, %v3820_v38  ;;  %v4784_v19 = vld [vmem:[#allocation7 + $0x644] sm:$0xf]  ;;  %v3756_v35 = vld [vmem:[#allocation7 + $0x430] sm:$0xf0] }
  0xd0   :  { %2054 = vmatpush.bf16.msrb.mxu0 %v3247_v56  ;;  %v362_v10 = vadd.f32 %v361_v50, %v168_v54  ;;  %2069 = vmatmul.bf16.vlgmr.msra.gmra.mxu1 %v5274_v63  ;;  %v3804_v54 = vld [vmem:[#allocation7 + $0x490] sm:$0xf0]  ;;  %v4792_v56 = vld [vmem:[#allocation7 + $0x684] sm:$0xf] }
  0xd1   :  { %2113 = vmatpush.bf16.msrb.mxu1 %v3983_v53  ;;  %v4728_v53 = vld [vmem:[#allocation7 + $0x484] sm:$0xf]  ;;  %v4044_v50 = vld [vmem:[#allocation7 + $0x670] sm:$0xf0] }
  0xd2   :  { %2080 = vmatpush.bf16.msra.mxu2 %v3503_v57  ;;  %v372_v46 = vmax.f32 %v362_v10, 0.0  ;;  %v4060_v57 = vld [vmem:[#allocation7 + $0x690] sm:$0xf0]  ;;  %v3807_v62 = vor.u32 %v4728_v53, %v3804_v54  ;;  %v4047_v13 = vor.u32 %v4788_v5, %v4044_v50  ;;  %v4744_v27 = vld [vmem:[#allocation7 + $0x504] sm:$0xf] }
  0xd3   :  { %2090 = vmatpush.bf16.msrb.mxu3 %v3679_v16  ;;  %v4063_v2 = vor.u32 %v4792_v56, %v4060_v57  ;;  %v3884_v10 = vld [vmem:[#allocation7 + $0x530] sm:$0xf0]  ;;  %v4720_v16 = vld [vmem:[#allocation7 + $0x444] sm:$0xf]  ;;  %v4615_v57 = vld [vmem:[#allocation7 + $0xf4] sm:$0xf0] }
  0xd4   :  { %v5305_v25 = vpack.c.bf16 %v372_v46, %v372_v46  ;;  %2055 = vmatpush.bf16.msrb.mxu0 %v3231_v11  ;;  %v3615_v11 = vor.u32 %v4680_v0, %v3612_v1  ;;  %v3887_v21 = vor.u32 %v4748_v9, %v3884_v10  ;;  %v4028_v46 = vld [vmem:[#allocation7 + $0x650] sm:$0xf0]  ;;  %v4828_v38 = vld [vmem:[#allocation7 + $0x7a4] sm:$0xf]  ;;  %v4639_v0 = vld [vmem:[#allocation7 + $0x1b4] sm:$0xf0] }
  0xd5   :  { %2114 = vmatpush.bf16.msrb.mxu1 %v3967_v7  ;;  %v4836_v7 = vld [vmem:[#allocation7 + $0x7e4] sm:$0xf]  ;;  %v4031_v32 = vor.u32 %v4784_v19, %v4028_v46  ;;  %v4012_v37 = vld [vmem:[#allocation7 + $0x630] sm:$0xf0]  ;;  %v3330_v50 = vld [vmem:[#allocation7 + $0xc8] sm:$0xf] }
  0xd6   :  { %2081 = vmatpush.bf16.msra.mxu2 %v3487_v12  ;;  %2043 = vmatmul.bf16.vlgmr.msra.gmra.mxu3 %v5305_v25  ;;  %v3791_v12 = vor.u32 %v4724_v3, %v3788_v4  ;;  %v4239_v15 = vor.u32 %v4836_v7, %v4236_v8  ;;  %v4712_v44 = vld [vmem:[#allocation7 + $0x404] sm:$0xf]  ;;  %v3740_v49 = vld [vmem:[#allocation7 + $0x410] sm:$0xf0]  ;;  %v3603_v4 = vor.u32 %v4679_v60, %v3602_v59  ;;  %v4611_v8 = vld [vmem:[#allocation7 + $0xd4] sm:$0xf0] }
  0xd7   :  { %2056 = vmatmul.bf16.vlgmr.msrb.gmra.mxu0 %v5277_v18  ;;  %v363_v42 = vpop.f32.mrf.mxu3  ;;  %2091 = vmatpush.bf16.msrb.mxu3 %v3663_v33  ;;  %v3996_v52 = vld [vmem:[#allocation7 + $0x610] sm:$0xf0]  ;;  %v4824_v53 = vld [vmem:[#allocation7 + $0x784] sm:$0xf]  ;;  %v3586_v9 = vld [vmem:[#allocation7 + $0x2c8] sm:$0xf] }
  0xd8   :  { %2100 = vmatpush.bf16.msra.mxu0 %v3855_v17  ;;  %v3772_v17 = vld [vmem:[#allocation7 + $0x450] sm:$0xf0]  ;;  %v3458_v42 = vld [vmem:[#allocation7 + $0x1c8] sm:$0xf]  ;;  %v4820_v5 = vld [vmem:[#allocation7 + $0x764] sm:$0xf] }
  0xd9   :  { %2115 = vmatpush.bf16.msrb.mxu1 %v3951_v28  ;;  %2082 = vmatmul.bf16.vlgmr.msra.gmra.mxu2 %v5279_v22  ;;  %v3868_v28 = vld [vmem:[#allocation7 + $0x510] sm:$0xf0]  ;;  %v3775_v29 = vor.u32 %v4720_v16, %v3772_v17  ;;  %v3459_v56 = vor.u32 %v4643_v43, %v3458_v42  ;;  %v4675_v10 = vld [vmem:[#allocation7 + $0x2d4] sm:$0xf0]  ;;  %v4816_v17 = vld [vmem:[#allocation7 + $0x744] sm:$0xf] }
  0xda   :  { %2126 = vmatpush.bf16.msrb.mxu2 %v4111_v23  ;;  %v4832_v23 = vld [vmem:[#allocation7 + $0x7c4] sm:$0xf]  ;;  %v3871_v45 = vor.u32 %v4744_v27, %v3868_v28  ;;  %v4188_v54 = vld [vmem:[#allocation7 + $0x790] sm:$0xf0]  ;;  %v3587_v16 = vor.u32 %v4675_v10, %v3586_v9  ;;  %v4671_v27 = vld [vmem:[#allocation7 + $0x2b4] sm:$0xf0] }
  0xdb   :  { %2092 = vmatpush.bf16.msrb.mxu3 %v3647_v47  ;;  %v4223_v33 = vor.u32 %v4832_v23, %v4220_v24  ;;  %v4156_v19 = vld [vmem:[#allocation7 + $0x750] sm:$0xf0]  ;;  %v4607_v23 = vld [vmem:[#allocation7 + $0xb4] sm:$0xf0]  ;;  %v3570_v24 = vld [vmem:[#allocation7 + $0x2a8] sm:$0xf] }
  0xdc   :  { %2101 = vmatpush.bf16.msra.mxu0 %v3839_v34  ;;  %v4716_v34 = vld [vmem:[#allocation7 + $0x424] sm:$0xf]  ;;  %v3410_v28 = vld [vmem:[#allocation7 + $0x168] sm:$0xf]  ;;  %v4159_v30 = vor.u32 %v4816_v17, %v4156_v19  ;;  %v4775_v9 = vld [vmem:[#allocation7 + $0x5f4] sm:$0xf0] }
  0xdd   :  { %2116 = vmatpush.bf16.msrb.mxu1 %v3935_v39  ;;  %v4204_v39 = vld [vmem:[#allocation7 + $0x7b0] sm:$0xf0]  ;;  %v3759_v41 = vor.u32 %v4716_v34, %v3756_v35  ;;  %v3298_v35 = vld [vmem:[#allocation7 + $0x88] sm:$0xf]  ;;  %v4808_v42 = vld [vmem:[#allocation7 + $0x704] sm:$0xf] }
  0xde   :  { %2127 = vmatpush.bf16.msrb.mxu2 %v4095_v36  ;;  %v4780_v36 = vld [vmem:[#allocation7 + $0x624] sm:$0xf]  ;;  %v4140_v34 = vld [vmem:[#allocation7 + $0x730] sm:$0xf0]  ;;  %v3506_v17 = vld [vmem:[#allocation7 + $0x228] sm:$0xf] }
  0xdf   :  { %2093 = vmatpush.bf16.msrb.mxu3 %v3631_v61  ;;  %v4015_v47 = vor.u32 %v4780_v36, %v4012_v37  ;;  %v3743_v61 = vor.u32 %v4712_v44, %v3740_v49  ;;  %v3554_v37 = vld [vmem:[#allocation7 + $0x288] sm:$0xf]  ;;  %v4599_v49 = vld [vmem:[#allocation7 + $0x74] sm:$0xf0] }
  0xe0   :  { %2102 = vmatpush.bf16.msra.mxu0 %v3823_v48  ;;  %v4207_v48 = vor.u32 %v4828_v38, %v4204_v39  ;;  %v4667_v38 = vld [vmem:[#allocation7 + $0x294] sm:$0xf0]  ;;  %v3394_v39 = vld [vmem:[#allocation7 + $0x148] sm:$0xf] }
  0xe1   :  { %2117 = vmatpush.bf16.msrb.mxu1 %v3919_v55  ;;  %v3346_v55 = vld [vmem:[#allocation7 + $0xe8] sm:$0xf]  ;;  %v3555_v44 = vor.u32 %v4667_v38, %v3554_v37  ;;  %v4655_v19 = vld [vmem:[#allocation7 + $0x234] sm:$0xf0] }
  0xe2   :  { %2128 = vmatpush.bf16.msrb.mxu2 %v4079_v51  ;;  %v4776_v51 = vld [vmem:[#allocation7 + $0x604] sm:$0xf]  ;;  %v3347_v3 = vor.u32 %v4615_v57, %v3346_v55  ;;  %v4711_v55 = vld [vmem:[#allocation7 + $0x3f4] sm:$0xf0]  ;;  %v3858_v37 = vld [vmem:[#allocation7 + $0x4e8] sm:$0xf] }
  0xe3   :  { %2094 = vmatpush.bf16.msrb.mxu3 %v3615_v11  ;;  %v3999_v1 = vor.u32 %v4776_v51, %v3996_v52  ;;  %v3426_v11 = vld [vmem:[#allocation7 + $0x188] sm:$0xf]  ;;  %v4623_v57 = vld [vmem:[#allocation7 + $0x134] sm:$0xf0] }
  0xe4   :  { %2103 = vmatpush.bf16.msra.mxu0 %v3807_v62  ;;  %v3442_v62 = vld [vmem:[#allocation7 + $0x1a8] sm:$0xf]  ;;  %v4743_v38 = vld [vmem:[#allocation7 + $0x4f4] sm:$0xf0] }
  0xe5   :  { %2118 = vmatpush.bf16.msrb.mxu1 %v3903_v6  ;;  %v4172_v6 = vld [vmem:[#allocation7 + $0x770] sm:$0xf0]  ;;  %v3443_v7 = vor.u32 %v4639_v0, %v3442_v62  ;;  %v3538_v52 = vld [vmem:[#allocation7 + $0x268] sm:$0xf]  ;;  %v4595_v0 = vld [vmem:[#allocation7 + $0x54] sm:$0xf0] }
  0xe6   :  { %2129 = vmatpush.bf16.msrb.mxu2 %v4063_v2  ;;  %2095 = vmatmul.bf16.vlgmr.msrb.gmra.mxu3 %v5292_v20  ;;  %v4191_v2 = vor.u32 %v4824_v53, %v4188_v54  ;;  %v4663_v53 = vld [vmem:[#allocation7 + $0x274] sm:$0xf0]  ;;  %v3730_v54 = vld [vmem:[#allocation7 + $0x3e8] sm:$0xf] }
  0xe7   :  { %2139 = vmatpush.bf16.msra.mxu3 %v4239_v15  ;;  %v3331_v15 = vor.u32 %v4611_v8, %v3330_v50  ;;  %v3266_v62 = vld [vmem:[#allocation7 + $0x48] sm:$0xf] }
  0xe8   :  { %2104 = vmatpush.bf16.msra.mxu0 %v3791_v12  ;;  %v4635_v12 = vld [vmem:[#allocation7 + $0x194] sm:$0xf0]  ;;  %v3362_v50 = vld [vmem:[#allocation7 + $0x108] sm:$0xf]  ;;  %v3267_v10 = vor.u32 %v4595_v0, %v3266_v62 }
  0xe9   :  { %2119 = vmatpush.bf16.msrb.mxu1 %v3887_v21  ;;  %v3314_v21 = vld [vmem:[#allocation7 + $0xa8] sm:$0xf]  ;;  %v3427_v46 = vor.u32 %v4635_v12, %v3426_v11 }
  0xea   :  { %2130 = vmatpush.bf16.msrb.mxu2 %v4047_v13  ;;  %v4175_v13 = vor.u32 %v4820_v5, %v4172_v6  ;;  %v3315_v31 = vor.u32 %v4607_v23, %v3314_v21  ;;  %v3714_v5 = vld [vmem:[#allocation7 + $0x3c8] sm:$0xf]  ;;  %v4707_v6 = vld [vmem:[#allocation7 + $0x3d4] sm:$0xf0] }
  0xeb   :  { %2140 = vmatpush.bf16.msra.mxu3 %v4223_v33  ;;  %v4812_v33 = vld [vmem:[#allocation7 + $0x724] sm:$0xf]  ;;  %v3986_v8 = vld [vmem:[#allocation7 + $0x5e8] sm:$0xf]  ;;  %v4703_v23 = vld [vmem:[#allocation7 + $0x3b4] sm:$0xf0] }
  0xec   :  { %2105 = vmatpush.bf16.msra.mxu0 %v3775_v29  ;;  %v4631_v29 = vld [vmem:[#allocation7 + $0x174] sm:$0xf0]  ;;  %v3250_v12 = vld [vmem:[#allocation7 + $0x28] sm:$0xf]  ;;  %v3987_v21 = vor.u32 %v4775_v9, %v3986_v8 }
  0xed   :  { %2120 = vmatpush.bf16.msrb.mxu1 %v3871_v45  ;;  %v3411_v36 = vor.u32 %v4631_v29, %v3410_v28  ;;  %v4603_v45 = vld [vmem:[#allocation7 + $0x94] sm:$0xf0]  ;;  %v3507_v29 = vor.u32 %v4655_v19, %v3506_v17  ;;  %v3650_v0 = vld [vmem:[#allocation7 + $0x348] sm:$0xf] }
  0xee   :  { %2131 = vmatpush.bf16.msrb.mxu2 %v4031_v32  ;;  %v3571_v32 = vor.u32 %v4671_v27, %v3570_v24  ;;  %v3299_v43 = vor.u32 %v4603_v45, %v3298_v35  ;;  %v3970_v24 = vld [vmem:[#allocation7 + $0x5c8] sm:$0xf]  ;;  %v4771_v27 = vld [vmem:[#allocation7 + $0x5d4] sm:$0xf0] }
  0xef   :  { %2141 = vmatpush.bf16.msra.mxu3 %v4207_v48  ;;  %v3282_v48 = vld [vmem:[#allocation7 + $0x68] sm:$0xf]  ;;  %v3971_v45 = vor.u32 %v4771_v27, %v3970_v24  ;;  %v4759_v8 = vld [vmem:[#allocation7 + $0x574] sm:$0xf0] }
  0xf0   :  { %2106 = vmatpush.bf16.msra.mxu0 %v3759_v41  ;;  %2121 = vmatmul.bf16.vlgmr.msrb.gmra.mxu1 %v5287_v58  ;;  %v4143_v41 = vor.u32 %v4812_v33, %v4140_v34  ;;  %v3283_v60 = vor.u32 %v4599_v49, %v3282_v48  ;;  %v4651_v34 = vld [vmem:[#allocation7 + $0x214] sm:$0xf0]  ;;  %v3682_v35 = vld [vmem:[#allocation7 + $0x388] sm:$0xf]  ;;  %v3859_v48 = vor.u32 %v4743_v38, %v3858_v37 }
  0xf1   :  { %2165 = vmatpush.bf16.msra.mxu1 %v3475_v40  ;;  %v4627_v40 = vld [vmem:[#allocation7 + $0x154] sm:$0xf0]  ;;  %v3666_v49 = vld [vmem:[#allocation7 + $0x368] sm:$0xf] }
  0xf2   :  { %2132 = vmatpush.bf16.msrb.mxu2 %v4015_v47  ;;  %v4124_v47 = vld [vmem:[#allocation7 + $0x710] sm:$0xf0]  ;;  %v3395_v51 = vor.u32 %v4627_v40, %v3394_v39  ;;  %v4114_v39 = vld [vmem:[#allocation7 + $0x6e8] sm:$0xf]  ;;  %v4807_v40 = vld [vmem:[#allocation7 + $0x6f4] sm:$0xf0] }
  0xf3   :  { %2142 = vmatpush.bf16.msra.mxu3 %v4191_v2  ;;  %v4127_v59 = vor.u32 %v4808_v42, %v4124_v47  ;;  %v4767_v42 = vld [vmem:[#allocation7 + $0x5b4] sm:$0xf0]  ;;  %v4066_v19 = vld [vmem:[#allocation7 + $0x688] sm:$0xf] }
  0xf4   :  { %2107 = vmatpush.bf16.msra.mxu0 %v3743_v61  ;;  %v3539_v61 = vor.u32 %v4663_v53, %v3538_v52  ;;  %v4115_v52 = vor.u32 %v4807_v40, %v4114_v39  ;;  %v4731_v17 = vld [vmem:[#allocation7 + $0x494] sm:$0xf0]  ;;  %v3890_v37 = vld [vmem:[#allocation7 + $0x528] sm:$0xf] }
  0xf5   :  { %2166 = vmatpush.bf16.msra.mxu1 %v3459_v56  ;;  %v3378_v56 = vld [vmem:[#allocation7 + $0x128] sm:$0xf]  ;;  %v4751_v38 = vld [vmem:[#allocation7 + $0x534] sm:$0xf0] }
  0xf6   :  { %2133 = vmatpush.bf16.msrb.mxu2 %v3999_v1  ;;  %v3731_v1 = vor.u32 %v4711_v55, %v3730_v54  ;;  %v3379_v2 = vor.u32 %v4623_v57, %v3378_v56  ;;  %v3842_v54 = vld [vmem:[#allocation7 + $0x4c8] sm:$0xf]  ;;  %v4739_v55 = vld [vmem:[#allocation7 + $0x4d4] sm:$0xf0] }
  0xf7   :  { %2108 = vmatmul.bf16.vlgmr.msra.gmra.mxu0 %v5290_v14  ;;  %2143 = vmatpush.bf16.msra.mxu3 %v4175_v13  ;;  %v3715_v13 = vor.u32 %v4707_v6, %v3714_v5  ;;  %v4098_v56 = vld [vmem:[#allocation7 + $0x6c8] sm:$0xf]  ;;  %v4803_v57 = vld [vmem:[#allocation7 + $0x6d4] sm:$0xf0]  ;;  %v3843_v62 = vor.u32 %v4739_v55, %v3842_v54 }
  0xf8   :  { %2152 = vmatpush.bf16.msrb.mxu0 %v3347_v3  ;;  %v3522_v3 = vld [vmem:[#allocation7 + $0x248] sm:$0xf]  ;;  %v4735_v5 = vld [vmem:[#allocation7 + $0x4b4] sm:$0xf0] }
  0xf9   :  { %2167 = vmatpush.bf16.msra.mxu1 %v3443_v7  ;;  %2134 = vmatmul.bf16.vlgmr.msrb.gmra.mxu2 %v5295_v26  ;;  %v4619_v7 = vld [vmem:[#allocation7 + $0x114] sm:$0xf0]  ;;  %v4082_v6 = vld [vmem:[#allocation7 + $0x6a8] sm:$0xf] }
  0xfa   :  { %2178 = vmatpush.bf16.msra.mxu2 %v3603_v4  ;;  %v4659_v4 = vld [vmem:[#allocation7 + $0x254] sm:$0xf0] }
  0xfb   :  { %2144 = vmatpush.bf16.msra.mxu3 %v4159_v30  ;;  %v3523_v11 = vor.u32 %v4659_v4, %v3522_v3  ;;  %v3234_v30 = vld [vmem:[#allocation7 + $0x8] sm:$0xf]  ;;  %v4747_v54 = vld [vmem:[#allocation7 + $0x514] sm:$0xf0] }
  0xfc   :  { %2153 = vmatpush.bf16.msrb.mxu0 %v3331_v15  ;;  %v3363_v15 = vor.u32 %v4619_v7, %v3362_v50  ;;  %v3826_v4 = vld [vmem:[#allocation7 + $0x4a8] sm:$0xf]  ;;  %v4799_v50 = vld [vmem:[#allocation7 + $0x6b4] sm:$0xf0] }
  0xfd   :  { %2168 = vmatpush.bf16.msra.mxu1 %v3427_v46  ;;  %v3698_v46 = vld [vmem:[#allocation7 + $0x3a8] sm:$0xf] }
  0xfe   :  { %2179 = vmatpush.bf16.msra.mxu2 %v3587_v16  ;;  %v4591_v16 = vld [vmem:[#allocation7 + $0x34] sm:$0xf0]  ;;  %v3699_v33 = vor.u32 %v4703_v23, %v3698_v46  ;;  %v3922_v7 = vld [vmem:[#allocation7 + $0x568] sm:$0xf] }
  0xff   :  { %2145 = vmatpush.bf16.msra.mxu3 %v4143_v41  ;;  %v3251_v28 = vor.u32 %v4591_v16, %v3250_v12  ;;  %v3954_v41 = vld [vmem:[#allocation7 + $0x5a8] sm:$0xf]  ;;  %v4687_v12 = vld [vmem:[#allocation7 + $0x334] sm:$0xf0] }
 0x100   :  { %2154 = vmatpush.bf16.msrb.mxu0 %v3315_v31  ;;  %v4587_v31 = vld [vmem:[#allocation7 + $0x14] sm:$0xf0]  ;;  %v3955_v53 = vor.u32 %v4767_v42, %v3954_v41  ;;  %v3810_v16 = vld [vmem:[#allocation7 + $0x488] sm:$0xf] }
 0x101   :  { %2169 = vmatpush.bf16.msra.mxu1 %v3411_v36  ;;  %v4699_v36 = vld [vmem:[#allocation7 + $0x394] sm:$0xf0]  ;;  %v3906_v46 = vld [vmem:[#allocation7 + $0x548] sm:$0xf]  ;;  %v3811_v27 = vor.u32 %v4731_v17, %v3810_v16  ;;  %v4613_v17 = vld [vmem:[#allocation7 + $0xec] sm:$0xf] }
 0x102   :  { %2180 = vmatpush.bf16.msra.mxu2 %v3571_v32  ;;  %v3490_v32 = vld [vmem:[#allocation7 + $0x208] sm:$0xf]  ;;  %v3683_v47 = vor.u32 %v4699_v36, %v3682_v35  ;;  %v4755_v23 = vld [vmem:[#allocation7 + $0x554] sm:$0xf0] }
 0x103   :  { %2146 = vmatpush.bf16.msra.mxu3 %v4127_v59  ;;  %v3938_v59 = vld [vmem:[#allocation7 + $0x588] sm:$0xf]  ;;  %v4791_v35 = vld [vmem:[#allocation7 + $0x674] sm:$0xf0] }
 0x104   :  { %2155 = vmatpush.bf16.msrb.mxu0 %v3299_v43  ;;  %v3235_v43 = vor.u32 %v4587_v31, %v3234_v30  ;;  %v3907_v31 = vor.u32 %v4755_v23, %v3906_v46  ;;  %v4242_v36 = vld [vmem:[#allocation7 + $0x7e8] sm:$0xf]  ;;  %v4827_v16 = vld [vmem:[#allocation7 + $0x794] sm:$0xf0]  ;;  %v4677_v46 = vld [vmem:[#allocation7 + $0x2ec] sm:$0xf] }
 0x105   :  { %2170 = vmatpush.bf16.msra.mxu1 %v3395_v51  ;;  %v4695_v51 = vld [vmem:[#allocation7 + $0x374] sm:$0xf0]  ;;  %v3604_v23 = vld [vmem:[#allocation7 + $0x2f8] sm:$0xf0] }
 0x106   :  { %2181 = vmatpush.bf16.msra.mxu2 %v3555_v44  ;;  %2147 = vmatmul.bf16.vlgmr.msra.gmra.mxu3 %v5305_v25  ;;  %v3491_v44 = vor.u32 %v4651_v34, %v3490_v32  ;;  %v3794_v32 = vld [vmem:[#allocation7 + $0x468] sm:$0xf] }
 0x107   :  { %2191 = vmatpush.bf16.msrb.mxu3 %v3731_v1  ;;  %v4691_v1 = vld [vmem:[#allocation7 + $0x354] sm:$0xf0]  ;;  %v4050_v34 = vld [vmem:[#allocation7 + $0x668] sm:$0xf] }
 0x108   :  { %2156 = vmatpush.bf16.msrb.mxu0 %v3283_v60  ;;  %v4763_v60 = vld [vmem:[#allocation7 + $0x594] sm:$0xf0]  ;;  %v3651_v9 = vor.u32 %v4691_v1, %v3650_v0  ;;  %v4051_v41 = vor.u32 %v4791_v35, %v4050_v34  ;;  %v4018_v0 = vld [vmem:[#allocation7 + $0x628] sm:$0xf]  ;;  %v4609_v35 = vld [vmem:[#allocation7 + $0xcc] sm:$0xf] }
 0x109   :  { %2171 = vmatpush.bf16.msra.mxu1 %v3379_v2  ;;  %v4099_v2 = vor.u32 %v4803_v57, %v4098_v56  ;;  %v3939_v3 = vor.u32 %v4763_v60, %v3938_v59  ;;  %v4645_v56 = vld [vmem:[#allocation7 + $0x1ec] sm:$0xf]  ;;  %v3476_v57 = vld [vmem:[#allocation7 + $0x1f8] sm:$0xf0]  ;;  %v4823_v34 = vld [vmem:[#allocation7 + $0x774] sm:$0xf0] }
 0x10a   :  { %2182 = vmatpush.bf16.msra.mxu2 %v3539_v61  ;;  %v3667_v61 = vor.u32 %v4695_v51, %v3666_v49  ;;  %v4787_v49 = vld [vmem:[#allocation7 + $0x654] sm:$0xf0]  ;;  %v4226_v51 = vld [vmem:[#allocation7 + $0x7c8] sm:$0xf] }
 0x10b   :  { %2192 = vmatpush.bf16.msrb.mxu3 %v3715_v13  ;;  %v4083_v13 = vor.u32 %v4799_v50, %v4082_v6  ;;  %v4641_v50 = vld [vmem:[#allocation7 + $0x1cc] sm:$0xf] }
 0x10c   :  { %2157 = vmatpush.bf16.msrb.mxu0 %v3267_v10  ;;  %v3827_v10 = vor.u32 %v4735_v5, %v3826_v4  ;;  %v4831_v4 = vld [vmem:[#allocation7 + $0x7b4] sm:$0xf0]  ;;  %v3479_v5 = vor.u32 %v4645_v56, %v3476_v57  ;;  %v3412_v56 = vld [vmem:[#allocation7 + $0x178] sm:$0xf0] }
 0x10d   :  { %2172 = vmatpush.bf16.msra.mxu1 %v3363_v15  ;;  %v3923_v15 = vor.u32 %v4759_v8, %v3922_v7  ;;  %v3460_v7 = vld [vmem:[#allocation7 + $0x1d8] sm:$0xf0]  ;;  %v3746_v8 = vld [vmem:[#allocation7 + $0x408] sm:$0xf] }
 0x10e   :  { %2183 = vmatpush.bf16.msra.mxu2 %v3523_v11  ;;  %v3634_v11 = vld [vmem:[#allocation7 + $0x328] sm:$0xf] }
 0x10f   :  { %2193 = vmatpush.bf16.msrb.mxu3 %v3699_v33  ;;  %v3635_v24 = vor.u32 %v4687_v12, %v3634_v11  ;;  %v4727_v33 = vld [vmem:[#allocation7 + $0x474] sm:$0xf0]  ;;  %v4002_v12 = vld [vmem:[#allocation7 + $0x608] sm:$0xf] }
 0x110   :  { %2158 = vmatpush.bf16.msrb.mxu0 %v3251_v28  ;;  %2173 = vmatmul.bf16.vlgmr.msra.gmra.mxu1 %v5274_v63  ;;  %v3618_v28 = vld [vmem:[#allocation7 + $0x308] sm:$0xf]  ;;  %v3795_v40 = vor.u32 %v4727_v33, %v3794_v32  ;;  %v4715_v11 = vld [vmem:[#allocation7 + $0x414] sm:$0xf0]  ;;  %v3607_v32 = vor.u32 %v4677_v46, %v3604_v23  ;;  %v3732_v46 = vld [vmem:[#allocation7 + $0x3f8] sm:$0xf0] }
 0x111   :  { %2217 = vmatpush.bf16.msrb.mxu1 %v3987_v21  ;;  %v4795_v21 = vld [vmem:[#allocation7 + $0x694] sm:$0xf0]  ;;  %v4178_v33 = vld [vmem:[#allocation7 + $0x768] sm:$0xf]  ;;  %v4621_v23 = vld [vmem:[#allocation7 + $0x12c] sm:$0xf] }
 0x112   :  { %2184 = vmatpush.bf16.msra.mxu2 %v3507_v29  ;;  %v4683_v29 = vld [vmem:[#allocation7 + $0x314] sm:$0xf0]  ;;  %v4067_v30 = vor.u32 %v4795_v21, %v4066_v19  ;;  %v3463_v19 = vor.u32 %v4641_v50, %v3460_v7  ;;  %v3348_v21 = vld [vmem:[#allocation7 + $0xf8] sm:$0xf0] }
 0x113   :  { %2194 = vmatpush.bf16.msrb.mxu3 %v3683_v47  ;;  %v3619_v39 = vor.u32 %v4683_v29, %v3618_v28  ;;  %v4034_v47 = vld [vmem:[#allocation7 + $0x648] sm:$0xf]  ;;  %v3444_v28 = vld [vmem:[#allocation7 + $0x1b8] sm:$0xf0] }
 0x114   :  { %2159 = vmatpush.bf16.msrb.mxu0 %v3235_v43  ;;  %v3778_v43 = vld [vmem:[#allocation7 + $0x448] sm:$0xf]  ;;  %v4035_v59 = vor.u32 %v4787_v49, %v4034_v47  ;;  %v4605_v49 = vld [vmem:[#allocation7 + $0xac] sm:$0xf]  ;;  %v3396_v50 = vld [vmem:[#allocation7 + $0x158] sm:$0xf0] }
 0x115   :  { %2218 = vmatpush.bf16.msrb.mxu1 %v3971_v45  ;;  %v4839_v45 = vld [vmem:[#allocation7 + $0x7f4] sm:$0xf0]  ;;  %v4162_v47 = vld [vmem:[#allocation7 + $0x748] sm:$0xf] }
 0x116   :  { %2185 = vmatpush.bf16.msra.mxu2 %v3491_v44  ;;  %v4243_v42 = vor.u32 %v4839_v45, %v4242_v36  ;;  %v4723_v44 = vld [vmem:[#allocation7 + $0x454] sm:$0xf0]  ;;  %v3332_v45 = vld [vmem:[#allocation7 + $0xd8] sm:$0xf0] }
 0x117   :  { %2160 = vmatmul.bf16.vlgmr.msrb.gmra.mxu0 %v5277_v18  ;;  %2195 = vmatpush.bf16.msrb.mxu3 %v3667_v61  ;;  %v3779_v55 = vor.u32 %v4723_v44, %v3778_v43  ;;  %v3762_v61 = vld [vmem:[#allocation7 + $0x428] sm:$0xf]  ;;  %v3335_v43 = vor.u32 %v4609_v35, %v3332_v45  ;;  %v3524_v45 = vld [vmem:[#allocation7 + $0x258] sm:$0xf0] }
 0x118   :  { %2204 = vmatpush.bf16.msra.mxu0 %v3859_v48  ;;  %v3891_v48 = vor.u32 %v4751_v38, %v3890_v37  ;;  %v4673_v37 = vld [vmem:[#allocation7 + $0x2cc] sm:$0xf]  ;;  %v3588_v38 = vld [vmem:[#allocation7 + $0x2d8] sm:$0xf0] }
 0x119   :  { %2219 = vmatpush.bf16.msrb.mxu1 %v3955_v53  ;;  %2186 = vmatmul.bf16.vlgmr.msra.gmra.mxu2 %v5279_v22  ;;  %v3874_v53 = vld [vmem:[#allocation7 + $0x508] sm:$0xf]  ;;  %v3591_v44 = vor.u32 %v4673_v37, %v3588_v38  ;;  %v4705_v37 = vld [vmem:[#allocation7 + $0x3cc] sm:$0xf]  ;;  %v3716_v38 = vld [vmem:[#allocation7 + $0x3d8] sm:$0xf0] }
 0x11a   :  { %2230 = vmatpush.bf16.msrb.mxu2 %v4115_v52  ;;  %v4835_v52 = vld [vmem:[#allocation7 + $0x7d4] sm:$0xf0]  ;;  %v3875_v1 = vor.u32 %v4747_v54, %v3874_v53  ;;  %v4669_v53 = vld [vmem:[#allocation7 + $0x2ac] sm:$0xf]  ;;  %v3572_v54 = vld [vmem:[#allocation7 + $0x2b8] sm:$0xf0] }
 0x11b   :  { %2196 = vmatpush.bf16.msrb.mxu3 %v3651_v9  ;;  %v4227_v60 = vor.u32 %v4835_v52, %v4226_v51  ;;  %v3316_v52 = vld [vmem:[#allocation7 + $0xb8] sm:$0xf0] }
 0x11c   :  { %2205 = vmatpush.bf16.msra.mxu0 %v3843_v62  ;;  %v4719_v62 = vld [vmem:[#allocation7 + $0x434] sm:$0xf0] }
 0x11d   :  { %2220 = vmatpush.bf16.msrb.mxu1 %v3939_v3  ;;  %v4210_v3 = vld [vmem:[#allocation7 + $0x7a8] sm:$0xf]  ;;  %v3763_v6 = vor.u32 %v4719_v62, %v3762_v61  ;;  %v4815_v62 = vld [vmem:[#allocation7 + $0x734] sm:$0xf0] }
 0x11e   :  { %2231 = vmatpush.bf16.msrb.mxu2 %v4099_v2  ;;  %v4783_v2 = vld [vmem:[#allocation7 + $0x634] sm:$0xf0]  ;;  %v4146_v61 = vld [vmem:[#allocation7 + $0x728] sm:$0xf] }
 0x11f   :  { %2197 = vmatpush.bf16.msrb.mxu3 %v3635_v24  ;;  %v4019_v9 = vor.u32 %v4783_v2, %v4018_v0  ;;  %v3747_v24 = vor.u32 %v4715_v11, %v3746_v8  ;;  %v4601_v0 = vld [vmem:[#allocation7 + $0x8c] sm:$0xf]  ;;  %v4147_v7 = vor.u32 %v4815_v62, %v4146_v61  ;;  %v4130_v8 = vld [vmem:[#allocation7 + $0x708] sm:$0xf]  ;;  %v3972_v61 = vld [vmem:[#allocation7 + $0x5d8] sm:$0xf0] }
 0x120   :  { %2206 = vmatpush.bf16.msra.mxu0 %v3827_v10  ;;  %v4211_v10 = vor.u32 %v4831_v4, %v4210_v3  ;;  %v3300_v3 = vld [vmem:[#allocation7 + $0x98] sm:$0xf0]  ;;  %v4665_v4 = vld [vmem:[#allocation7 + $0x28c] sm:$0xf]  ;;  %v5331_v62 = vld [vmem:[#allocation8] sm:$0xff] }
 0x121   :  { %2221 = vmatpush.bf16.msrb.mxu1 %v3923_v15  ;;  %v4194_v15 = vld [vmem:[#allocation7 + $0x788] sm:$0xf] }
 0x122   :  { %2232 = vmatpush.bf16.msrb.mxu2 %v4083_v13  ;;  %v4779_v13 = vld [vmem:[#allocation7 + $0x614] sm:$0xf0] }
 0x123   :  { %2198 = vmatpush.bf16.msrb.mxu3 %v3619_v39  ;;  %v4003_v29 = vor.u32 %v4779_v13, %v4002_v12  ;;  %v4633_v39 = vld [vmem:[#allocation7 + $0x18c] sm:$0xf]  ;;  %v4811_v12 = vld [vmem:[#allocation7 + $0x714] sm:$0xf0] }
 0x124   :  { %2207 = vmatpush.bf16.msra.mxu0 %v3811_v27  ;;  %v4637_v27 = vld [vmem:[#allocation7 + $0x1ac] sm:$0xf] }
 0x125   :  { %2222 = vmatpush.bf16.msrb.mxu1 %v3907_v31  ;;  %v3351_v31 = vor.u32 %v4613_v17, %v3348_v21  ;;  %v3447_v36 = vor.u32 %v4637_v27, %v3444_v28  ;;  %v4597_v13 = vld [vmem:[#allocation7 + $0x6c] sm:$0xf]  ;;  %v4131_v27 = vor.u32 %v4811_v12, %v4130_v8 }
 0x126   :  { %2233 = vmatpush.bf16.msrb.mxu2 %v4067_v30  ;;  %2199 = vmatmul.bf16.vlgmr.msrb.gmra.mxu3 %v5292_v20  ;;  %v4195_v30 = vor.u32 %v4827_v16, %v4194_v15  ;;  %v3284_v15 = vld [vmem:[#allocation7 + $0x78] sm:$0xf0]  ;;  %v4661_v17 = vld [vmem:[#allocation7 + $0x26c] sm:$0xf] }
 0x127   :  { %2243 = vmatpush.bf16.msra.mxu3 %v4243_v42  ;;  %v4709_v21 = vld [vmem:[#allocation7 + $0x3ec] sm:$0xf] }
 0x128   :  { %2208 = vmatpush.bf16.msra.mxu0 %v3795_v40  ;;  %v3428_v40 = vld [vmem:[#allocation7 + $0x198] sm:$0xf0]  ;;  %v4697_v8 = vld [vmem:[#allocation7 + $0x38c] sm:$0xf] }
 0x129   :  { %2223 = vmatpush.bf16.msrb.mxu1 %v3891_v48  ;;  %v4819_v48 = vld [vmem:[#allocation7 + $0x754] sm:$0xf0]  ;;  %v3431_v51 = vor.u32 %v4633_v39, %v3428_v40  ;;  %v4617_v39 = vld [vmem:[#allocation7 + $0x10c] sm:$0xf]  ;;  %v3364_v40 = vld [vmem:[#allocation7 + $0x118] sm:$0xf0] }
 0x12a   :  { %2234 = vmatpush.bf16.msrb.mxu2 %v4051_v41  ;;  %v4179_v41 = vor.u32 %v4823_v34, %v4178_v33  ;;  %v4163_v57 = vor.u32 %v4819_v48, %v4162_v47  ;;  %v3735_v33 = vor.u32 %v4709_v21, %v3732_v46  ;;  %v4741_v12 = vld [vmem:[#allocation7 + $0x4ec] sm:$0xf] }
 0x12b   :  { %2244 = vmatpush.bf16.msra.mxu3 %v4227_v60  ;;  %v3575_v60 = vor.u32 %v4669_v53, %v3572_v54  ;;  %v3252_v53 = vld [vmem:[#allocation7 + $0x38] sm:$0xf0]  ;;  %v4653_v54 = vld [vmem:[#allocation7 + $0x22c] sm:$0xf] }
 0x12c   :  { %2209 = vmatpush.bf16.msra.mxu0 %v3779_v55  ;;  %v4629_v55 = vld [vmem:[#allocation7 + $0x16c] sm:$0xf] }
 0x12d   :  { %2224 = vmatpush.bf16.msrb.mxu1 %v3875_v1  ;;  %v5320_v42 = vpop.f32.mrf.mxu1  ;;  %v3415_v2 = vor.u32 %v4629_v55, %v3412_v56  ;;  %v3508_v55 = vld [vmem:[#allocation7 + $0x238] sm:$0xf0] }
 0x12e   :  { %2235 = vmatpush.bf16.msrb.mxu2 %v4035_v59  ;;  %v3319_v59 = vor.u32 %v4605_v49, %v3316_v52  ;;  %v4589_v49 = vld [vmem:[#allocation7 + $0x2c] sm:$0xf]  ;;  %v3367_v52 = vor.u32 %v4617_v39, %v3364_v40  ;;  %v3940_v39 = vld [vmem:[#allocation7 + $0x598] sm:$0xf0] }
 0x12f   :  { %2245 = vmatpush.bf16.msra.mxu3 %v4211_v10  ;;  %v3303_v10 = vor.u32 %v4601_v0, %v3300_v3  ;;  %v3511_v3 = vor.u32 %v4653_v54, %v3508_v55  ;;  %v3828_v54 = vld [vmem:[#allocation7 + $0x4b8] sm:$0xf0]  ;;  %v4797_v55 = vld [vmem:[#allocation7 + $0x6ac] sm:$0xf] }
 0x130   :  { %2210 = vmatpush.bf16.msra.mxu0 %v3763_v6  ;;  %2225 = vmatmul.bf16.vlgmr.msrb.gmra.mxu1 %v5287_v58  ;;  %v4625_v6 = vld [vmem:[#allocation7 + $0x14c] sm:$0xf] }
 0x131   :  { %2269 = vmatpush.bf16.msra.mxu1 %v3479_v5  ;;  %v3556_v5 = vld [vmem:[#allocation7 + $0x298] sm:$0xf0]  ;;  %v3399_v16 = vor.u32 %v4625_v6, %v3396_v50  ;;  %v4649_v6 = vld [vmem:[#allocation7 + $0x20c] sm:$0xf] }
 0x132   :  { %2236 = vmatpush.bf16.msrb.mxu2 %v4019_v9  ;;  %v3559_v11 = vor.u32 %v4665_v4, %v3556_v5  ;;  %v4585_v4 = vld [vmem:[#allocation7 + $0xc] sm:$0xf]  ;;  %v3236_v5 = vld [vmem:[#allocation7 + $0x18] sm:$0xf0] }
 0x133   :  { %2246 = vmatpush.bf16.msra.mxu3 %v4195_v30  ;;  %v5324_v1 = vpop.f32.mrf.mxu0  ;;  %v3239_v46 = vor.u32 %v4585_v4, %v3236_v5  ;;  %v3636_v4 = vld [vmem:[#allocation7 + $0x338] sm:$0xf0] }
 0x134   :  { %2211 = vmatpush.bf16.msra.mxu0 %v3747_v24  ;;  %v3380_v24 = vld [vmem:[#allocation7 + $0x138] sm:$0xf0] }
 0x135   :  { %2270 = vmatpush.bf16.msra.mxu1 %v3463_v19  ;;  %v1968_v9 = vpop.f32.mrf.mxu1  ;;  %v3540_v19 = vld [vmem:[#allocation7 + $0x278] sm:$0xf0]  ;;  %v3383_v35 = vor.u32 %v4621_v23, %v3380_v24  ;;  %v5336_v24 = vunpack.c.l.bf16 %v5331_v62 }
 0x136   :  { %2237 = vmatpush.bf16.msrb.mxu2 %v4003_v29  ;;  %v3287_v29 = vor.u32 %v4597_v13, %v3284_v15  ;;  %v3543_v30 = vor.u32 %v4661_v17, %v3540_v19  ;;  %v3684_v9 = vld [vmem:[#allocation7 + $0x398] sm:$0xf0]  ;;  %v4805_v15 = vld [vmem:[#allocation7 + $0x6ec] sm:$0xf] }
 0x137   :  { %2212 = vmatmul.bf16.vlgmr.msra.gmra.mxu0 %v5290_v14  ;;  %2247 = vmatpush.bf16.msra.mxu3 %v4179_v41  ;;  %v4773_v41 = vld [vmem:[#allocation7 + $0x5ec] sm:$0xf]  ;;  %v3860_v13 = vld [vmem:[#allocation7 + $0x4f8] sm:$0xf0] }
 0x138   :  { %2256 = vmatpush.bf16.msrb.mxu0 %v3351_v31  ;;  %v4593_v31 = vld [vmem:[#allocation7 + $0x4c] sm:$0xf]  ;;  %v3956_v19 = vld [vmem:[#allocation7 + $0x5b8] sm:$0xf0] }
 0x139   :  { %2271 = vmatpush.bf16.msra.mxu1 %v3447_v36  ;;  %2238 = vmatmul.bf16.vlgmr.msrb.gmra.mxu2 %v5295_v26  ;;  %v4657_v36 = vld [vmem:[#allocation7 + $0x24c] sm:$0xf] }
 0x13a   :  { %2282 = vmatpush.bf16.msra.mxu2 %v3607_v32  ;;  %v3268_v32 = vld [vmem:[#allocation7 + $0x58] sm:$0xf0]  ;;  %v3527_v48 = vor.u32 %v4657_v36, %v3524_v45  ;;  %v4765_v17 = vld [vmem:[#allocation7 + $0x5ac] sm:$0xf] }
 0x13b   :  { %2248 = vmatpush.bf16.msra.mxu3 %v4163_v57  ;;  %v1955_v34 = vpop.f32.mrf.mxu0  ;;  %v3271_v47 = vor.u32 %v4593_v31, %v3268_v32  ;;  %v4701_v57 = vld [vmem:[#allocation7 + $0x3ac] sm:$0xf]  ;;  %v3668_v31 = vld [vmem:[#allocation7 + $0x378] sm:$0xf0] }
 0x13c   :  { %2257 = vmatpush.bf16.msrb.mxu0 %v3335_v43  ;;  %v5326_v28 = vpop.f32.mrf.mxu2  ;;  %v3988_v43 = vld [vmem:[#allocation7 + $0x5f8] sm:$0xf0]  ;;  %v4737_v34 = vld [vmem:[#allocation7 + $0x4cc] sm:$0xf] }
 0x13d   :  { %2272 = vmatpush.bf16.msra.mxu1 %v3431_v51  ;;  %v3719_v51 = vor.u32 %v4705_v37, %v3716_v38  ;;  %v3991_v56 = vor.u32 %v4773_v41, %v3988_v43  ;;  %v4801_v36 = vld [vmem:[#allocation7 + $0x6cc] sm:$0xf]  ;;  %v4100_v37 = vld [vmem:[#allocation7 + $0x6d8] sm:$0xf0] }
 0x13e   :  { %2283 = vmatpush.bf16.msra.mxu2 %v3591_v44  ;;  %v5328_v44 = vpop.f32.mrf.mxu1  ;;  %v4761_v38 = vld [vmem:[#allocation7 + $0x58c] sm:$0xf] }
 0x13f   :  { %2249 = vmatpush.bf16.msra.mxu3 %v4147_v7  ;;  %v3492_v7 = vld [vmem:[#allocation7 + $0x218] sm:$0xf0] }
 0x140   :  { %2258 = vmatpush.bf16.msrb.mxu0 %v3319_v59  ;;  %v3700_v59 = vld [vmem:[#allocation7 + $0x3b8] sm:$0xf0]  ;;  %v3495_v23 = vor.u32 %v4649_v6, %v3492_v7  ;;  %v4793_v7 = vld [vmem:[#allocation7 + $0x68c] sm:$0xf] }
 0x141   :  { %2273 = vmatpush.bf16.msra.mxu1 %v3415_v2  ;;  %v3255_v2 = vor.u32 %v4589_v49, %v3252_v53  ;;  %v3703_v50 = vor.u32 %v4701_v57, %v3700_v59  ;;  %v4733_v53 = vld [vmem:[#allocation7 + $0x4ac] sm:$0xf]  ;;  %v3924_v59 = vld [vmem:[#allocation7 + $0x578] sm:$0xf0] }
 0x142   :  { %2284 = vmatpush.bf16.msra.mxu2 %v3575_v60  ;;  %v4769_v60 = vld [vmem:[#allocation7 + $0x5cc] sm:$0xf] }
 0x143   :  { %2250 = vmatpush.bf16.msra.mxu3 %v4131_v27  ;;  %v3687_v27 = vor.u32 %v4697_v8, %v3684_v9  ;;  %v4757_v57 = vld [vmem:[#allocation7 + $0x56c] sm:$0xf]  ;;  %v4068_v9 = vld [vmem:[#allocation7 + $0x698] sm:$0xf0] }
 0x144   :  { %2259 = vmatpush.bf16.msrb.mxu0 %v3303_v10  ;;  %v1981_v0 = vpop.f32.mrf.mxu2  ;;  %v5333_v10 = vpop.f32.mrf.mxu0  ;;  %v3927_v6 = vor.u32 %v4757_v57, %v3924_v59  ;;  %v3876_v57 = vld [vmem:[#allocation7 + $0x518] sm:$0xf0] }
 0x145   :  { %2274 = vmatpush.bf16.msra.mxu1 %v3399_v16  ;;  %v4116_v16 = vld [vmem:[#allocation7 + $0x6f8] sm:$0xf0] }
 0x146   :  { %2285 = vmatpush.bf16.msra.mxu2 %v3559_v11  ;;  %2251 = vmatmul.bf16.vlgmr.msra.gmra.mxu3 %v5305_v25  ;;  %v3975_v11 = vor.u32 %v4769_v60, %v3972_v61  ;;  %v2020_v21 = vpop.f32.mrf.mxu1  ;;  %v4119_v32 = vor.u32 %v4805_v15, %v4116_v16 }
 0x147   :  { %2295 = vmatpush.bf16.msrb.mxu3 %v3735_v33  ;;  %v3959_v33 = vor.u32 %v4765_v17, %v3956_v19  ;;  %v4681_v17 = vld [vmem:[#allocation7 + $0x30c] sm:$0xf]  ;;  %v3620_v19 = vld [vmem:[#allocation7 + $0x318] sm:$0xf0] }
 0x148   :  { %2260 = vmatpush.bf16.msrb.mxu0 %v3287_v29  ;;  %v3863_v29 = vor.u32 %v4741_v12, %v3860_v13  ;;  %v3908_v12 = vld [vmem:[#allocation7 + $0x558] sm:$0xf0] }
 0x149   :  { %2275 = vmatpush.bf16.msra.mxu1 %v3383_v35  ;;  %v3844_v35 = vld [vmem:[#allocation7 + $0x4d8] sm:$0xf0]  ;;  %v5339_v45 = vpop.f32.mrf.mxu3 }
 0x14a   :  { %2286 = vmatpush.bf16.msra.mxu2 %v3543_v30  ;;  %v4693_v30 = vld [vmem:[#allocation7 + $0x36c] sm:$0xf]  ;;  %v3847_v43 = vor.u32 %v4737_v34, %v3844_v35  ;;  %v4244_v34 = vld [vmem:[#allocation7 + $0x7f8] sm:$0xf0] }
 0x14b   :  { %2296 = vmatpush.bf16.msrb.mxu3 %v3719_v51  ;;  %v3671_v41 = vor.u32 %v4693_v30, %v3668_v31  ;;  %v4103_v51 = vor.u32 %v4801_v36, %v4100_v37  ;;  %v3796_v30 = vld [vmem:[#allocation7 + $0x478] sm:$0xf0]  ;;  %v4789_v31 = vld [vmem:[#allocation7 + $0x66c] sm:$0xf] }
 0x14c   :  { %2261 = vmatpush.bf16.msrb.mxu0 %v3271_v47  ;;  %v5341_v40 = vpop.f32.mrf.mxu2  ;;  %v4689_v47 = vld [vmem:[#allocation7 + $0x34c] sm:$0xf]  ;;  %v2007_v49 = vpop.f32.mrf.mxu0  ;;  %v3892_v37 = vld [vmem:[#allocation7 + $0x538] sm:$0xf0] }
 0x14d   :  { %2276 = vmatpush.bf16.msra.mxu1 %v3367_v52  ;;  %v3943_v52 = vor.u32 %v4761_v38, %v3940_v39  ;;  %v4749_v36 = vld [vmem:[#allocation7 + $0x52c] sm:$0xf]  ;;  %v3623_v38 = vor.u32 %v4681_v17, %v3620_v19 }
 0x14e   :  { %2287 = vmatpush.bf16.msra.mxu2 %v3527_v48  ;;  %v3652_v48 = vld [vmem:[#allocation7 + $0x358] sm:$0xf0]  ;;  %v5346_v60 = vpop.f32.mrf.mxu1  ;;  %v4785_v49 = vld [vmem:[#allocation7 + $0x64c] sm:$0xf] }
 0x14f   :  { %2297 = vmatpush.bf16.msrb.mxu3 %v3703_v50  ;;  %v3655_v0 = vor.u32 %v4689_v47, %v3652_v48  ;;  %v4729_v50 = vld [vmem:[#allocation7 + $0x48c] sm:$0xf]  ;;  %v3780_v48 = vld [vmem:[#allocation7 + $0x458] sm:$0xf0] }
 0x150   :  { %2262 = vmatpush.bf16.msrb.mxu0 %v3255_v2  ;;  %2277 = vmatmul.bf16.vlgmr.msra.gmra.mxu1 %v5274_v63  ;;  %v648_v63 = vperm.slane %v5336_v24, 0  ;;  %v3831_v2 = vor.u32 %v4733_v53, %v3828_v54  ;;  %v4721_v47 = vld [vmem:[#allocation7 + $0x44c] sm:$0xf]  ;;  %v4036_v53 = vld [vmem:[#allocation7 + $0x658] sm:$0xf0] }
 0x151   :  { %2321 = vmatpush.bf16.msrb.mxu1 %v3991_v56  ;;  %v4084_v56 = vld [vmem:[#allocation7 + $0x6b8] sm:$0xf0]  ;;  %v1994_v8 = vpop.f32.mrf.mxu3  ;;  %v4833_v54 = vld [vmem:[#allocation7 + $0x7cc] sm:$0xf] }
 0x152   :  { %2288 = vmatpush.bf16.msra.mxu2 %v3511_v3  ;;  %v656_v61 = vperm.slane %v648_v63, 0  ;;  %v4685_v3 = vld [vmem:[#allocation7 + $0x32c] sm:$0xf]  ;;  %v4087_v5 = vor.u32 %v4797_v55, %v4084_v56  ;;  %v4228_v55 = vld [vmem:[#allocation7 + $0x7d8] sm:$0xf0] }
 0x153   :  { %2298 = vmatpush.bf16.msrb.mxu3 %v3687_v27  ;;  %v3639_v15 = vor.u32 %v4685_v3, %v3636_v4  ;;  %v4745_v56 = vld [vmem:[#allocation7 + $0x50c] sm:$0xf]  ;;  %v4039_v4 = vor.u32 %v4785_v49, %v4036_v53  ;;  %v4020_v8 = vld [vmem:[#allocation7 + $0x638] sm:$0xf0]  ;;  %v4298_v49 = vld [vmem:[#allocation10 + $0x60] sm:$0xf] }
 0x154   :  { %2263 = vmatpush.bf16.msrb.mxu0 %v3239_v46  ;;  %v2033_v13 = vpop.f32.mrf.mxu2  ;;  %v5351_v46 = vpop.f32.mrf.mxu0 }
 0x155   :  { %2322 = vmatpush.bf16.msrb.mxu1 %v3975_v11  ;;  %v4753_v11 = vld [vmem:[#allocation7 + $0x54c] sm:$0xf] }
 0x156   :  { %2289 = vmatpush.bf16.msra.mxu2 %v3495_v23  ;;  %v4071_v23 = vor.u32 %v4793_v7, %v4068_v9  ;;  %v3911_v27 = vor.u32 %v4753_v11, %v3908_v12  ;;  %v2072_v35 = vpop.f32.mrf.mxu1  ;;  %v3879_v7 = vor.u32 %v4745_v56, %v3876_v57  ;;  %v4829_v9 = vld [vmem:[#allocation7 + $0x7ac] sm:$0xf]  ;;  %v4212_v11 = vld [vmem:[#allocation7 + $0x7b8] sm:$0xf0]  ;;  %v2388_v57 = vperm.slane %v5336_v24, 2 }
 0x157   :  { %2264 = vmatmul.bf16.vlgmr.msrb.gmra.mxu0 %v5277_v18  ;;  %2299 = vmatpush.bf16.msrb.mxu3 %v3671_v41  ;;  %v3812_v18 = vld [vmem:[#allocation7 + $0x498] sm:$0xf0] }
 0x158   :  { %2308 = vmatpush.bf16.msra.mxu0 %v3863_v29  ;;  %v3815_v16 = vor.u32 %v4729_v50, %v3812_v18  ;;  %v4725_v29 = vld [vmem:[#allocation7 + $0x46c] sm:$0xf]  ;;  %v3764_v50 = vld [vmem:[#allocation7 + $0x438] sm:$0xf0] }
 0x159   :  { %2323 = vmatpush.bf16.msrb.mxu1 %v3959_v33  ;;  %2290 = vmatmul.bf16.vlgmr.msra.gmra.mxu2 %v5279_v22  ;;  %v5348_v22 = vpop.permute.xlu0 %643  ;;  %v4837_v33 = vld [vmem:[#allocation7 + $0x7ec] sm:$0xf]  ;;  %v3799_v39 = vor.u32 %v4725_v29, %v3796_v30 }
 0x15a   :  { %2334 = vmatpush.bf16.msrb.mxu2 %v4119_v32  ;;  %v660_v21 = vmul.f32 %v656_v61, %v5348_v22  ;;  %v4052_v32 = vld [vmem:[#allocation7 + $0x678] sm:$0xf0]  ;;  %v4370_v61 = vld [vmem:[#allocation10 + $0xf0] sm:$0xf]  ;;  %v4781_v18 = vld [vmem:[#allocation7 + $0x62c] sm:$0xf] }
 0x15b   :  { %2300 = vmatpush.bf16.msrb.mxu3 %v3655_v0  ;;  %v4055_v41 = vor.u32 %v4789_v31, %v4052_v32  ;;  %v4871_v0 = vld [vmem:[#allocation10 + $0xf4] sm:$0xf0]  ;;  %v4023_v19 = vor.u32 %v4781_v18, %v4020_v8  ;;  %v4777_v29 = vld [vmem:[#allocation7 + $0x60c] sm:$0xf]  ;;  %v4004_v31 = vld [vmem:[#allocation7 + $0x618] sm:$0xf0] }
 0x15c   :  { %2309 = vmatpush.bf16.msra.mxu0 %v3847_v43  ;;  %v1954_v63 = vadd.f32 %v5324_v1, %v660_v21  ;;  %v4247_v43 = vor.u32 %v4837_v33, %v4244_v34  ;;  %v5356_v59 = vpop.f32.mrf.mxu2  ;;  %v3783_v1 = vor.u32 %v4721_v47, %v3780_v48  ;;  %v2059_v3 = vpop.f32.mrf.mxu0  ;;  %v4371_v13 = vor.u32 %v4871_v0, %v4370_v61  ;;  %v4196_v32 = vld [vmem:[#allocation7 + $0x798] sm:$0xf0]  ;;  %v4855_v33 = vld [vmem:[#allocation10 + $0x74] sm:$0xf0]  ;;  %v4817_v61 = vld [vmem:[#allocation7 + $0x74c] sm:$0xf] }
 0x15d   :  { %2324 = vmatpush.bf16.msrb.mxu1 %v3943_v52  ;;  %v3895_v52 = vor.u32 %v4749_v36, %v3892_v37  ;;  %v4215_v21 = vor.u32 %v4829_v9, %v4212_v11  ;;  %v4867_v37 = vld [vmem:[#allocation10 + $0xd4] sm:$0xf0]  ;;  %v4180_v47 = vld [vmem:[#allocation7 + $0x778] sm:$0xf0]  ;;  %v2364_v48 = vperm.slane %v5336_v24, 1  ;;  %v2396_v11 = vperm.slane %v2388_v57, 2 }
 0x15e   :  { %2335 = vmatpush.bf16.msrb.mxu2 %v4103_v51  ;;  %v5354_v51 = vpop.f32.mrf.mxu3  ;;  %v4164_v0 = vld [vmem:[#allocation7 + $0x758] sm:$0xf0]  ;;  %v4290_v3 = vld [vmem:[#allocation10 + $0x50] sm:$0xf]  ;;  %v4857_v57 = vld [vmem:[#allocation10 + $0x84] sm:$0xf0] }
 0x15f   :  { %2301 = vmatpush.bf16.msrb.mxu3 %v3639_v15  ;;  %v4362_v15 = vld [vmem:[#allocation10 + $0xe0] sm:$0xf]  ;;  %v4338_v18 = vld [vmem:[#allocation10 + $0xb0] sm:$0xf] }
 0x160   :  { %2310 = vmatpush.bf16.msra.mxu0 %v3831_v2  ;;  %v1967_v2 = vadd.f32 %v5320_v42, %v1954_v63 }
 0x161   :  { %2325 = vmatpush.bf16.msrb.mxu1 %v3927_v6  ;;  %v4717_v6 = vld [vmem:[#allocation7 + $0x42c] sm:$0xf] }
 0x162   :  { %2336 = vmatpush.bf16.msrb.mxu2 %v4087_v5  ;;  %v4231_v5 = vor.u32 %v4833_v54, %v4228_v55  ;;  %v1980_v12 = vadd.f32 %v5326_v28, %v1967_v2  ;;  %v3767_v42 = vor.u32 %v4717_v6, %v3764_v50  ;;  %v4825_v28 = vld [vmem:[#allocation7 + $0x78c] sm:$0xf]  ;;  %v4346_v54 = vld [vmem:[#allocation10 + $0xc0] sm:$0xf]  ;;  %v4865_v55 = vld [vmem:[#allocation10 + $0xc4] sm:$0xf0]  ;;  %v5371_v6 = vpop.permute.xlu0 %2361 }
 0x163   :  { %2302 = vmatpush.bf16.msrb.mxu3 %v3623_v38  ;;  %v4199_v63 = vor.u32 %v4825_v28, %v4196_v32  ;;  %v2372_v2 = vperm.slane %v2364_v48, 1  ;;  %v4809_v28 = vld [vmem:[#allocation7 + $0x70c] sm:$0xf]  ;;  %v4132_v32 = vld [vmem:[#allocation7 + $0x718] sm:$0xf0] }
 0x164   :  { %2311 = vmatpush.bf16.msra.mxu0 %v3815_v16  ;;  %v4869_v16 = vld [vmem:[#allocation10 + $0xe4] sm:$0xf0]  ;;  %v1993_v17 = vadd.f32 %v5339_v45, %v1980_v12  ;;  %v2085_v35 = vpop.f32.mrf.mxu2  ;;  %v4354_v45 = vld [vmem:[#allocation10 + $0xd0] sm:$0xf] }
 0x165   :  { %2326 = vmatpush.bf16.msrb.mxu1 %v3911_v27  ;;  %v3748_v27 = vld [vmem:[#allocation7 + $0x418] sm:$0xf0]  ;;  %v4363_v34 = vor.u32 %v4869_v16, %v4362_v15  ;;  %v4355_v53 = vor.u32 %v4867_v37, %v4354_v45  ;;  %v2376_v15 = vmul.f32 %v2372_v2, %v5371_v6  ;;  %v4847_v35 = vld [vmem:[#allocation10 + $0x34] sm:$0xf0] }
 0x166   :  { %2337 = vmatpush.bf16.msrb.mxu2 %v4071_v23  ;;  %2303 = vmatmul.bf16.vlgmr.msrb.gmra.mxu3 %v5292_v20  ;;  %v4713_v23 = vld [vmem:[#allocation7 + $0x40c] sm:$0xf]  ;;  %v2046_v30 = vpop.f32.mrf.mxu3  ;;  %v4306_v20 = vld [vmem:[#allocation10 + $0x70] sm:$0xf]  ;;  %v2006_v38 = vadd.f32 %v5333_v10, %v1993_v17  ;;  %v4282_v17 = vld [vmem:[#allocation10 + $0x40] sm:$0xf] }
 0x167   :  { %2347 = vmatpush.bf16.msra.mxu3 %v4247_v43  ;;  %v3751_v36 = vor.u32 %v4713_v23, %v3748_v27  ;;  %v4821_v43 = vld [vmem:[#allocation7 + $0x76c] sm:$0xf]  ;;  %v4330_v23 = vld [vmem:[#allocation10 + $0xa0] sm:$0xf]  ;;  %v4861_v27 = vld [vmem:[#allocation10 + $0xa4] sm:$0xf0] }
 0x168   :  { %2312 = vmatpush.bf16.msra.mxu0 %v3799_v39  ;;  %v4007_v39 = vor.u32 %v4777_v29, %v4004_v31  ;;  %v2019_v10 = vadd.f32 %v5328_v44, %v2006_v38  ;;  %v4183_v56 = vor.u32 %v4821_v43, %v4180_v47  ;;  %v649_v44 = vperm.slane %v5336_v24, 4 }
 0x169   :  { %2327 = vmatpush.bf16.msrb.mxu1 %v3895_v52  ;;  %v4853_v52 = vld [vmem:[#allocation10 + $0x64] sm:$0xf0]  ;;  %v4135_v43 = vor.u32 %v4809_v28, %v4132_v32  ;;  %v2413_v28 = vperm.slane %v5336_v24, 7 }
 0x16a   :  { %2338 = vmatpush.bf16.msrb.mxu2 %v4055_v41  ;;  %v4307_v41 = vor.u32 %v4855_v33, %v4306_v20  ;;  %v2032_v8 = vadd.f32 %v5341_v40, %v2019_v10  ;;  %v657_v40 = vperm.slane %v649_v44, 0  ;;  %v5393_v10 = vld [vmem:[%s5466_s8 + $0x8] sm:$0xf]  ;;  %v4258_v44 = vld [vmem:[#allocation10 + $0x10] sm:$0xf] }
 0x16b   :  { %2348 = vmatpush.bf16.msra.mxu3 %v4231_v5  ;;  %v4347_v5 = vor.u32 %v4865_v55, %v4346_v54 }
 0x16c   :  { %2313 = vmatpush.bf16.msra.mxu0 %v3783_v1  ;;  %v4299_v1 = vor.u32 %v4853_v52, %v4298_v49  ;;  %v2045_v16 = vadd.f32 %v5354_v51, %v2032_v8  ;;  %v661_v45 = vmul.f32 %v657_v40, %v5348_v22  ;;  %v4266_v52 = vld [vmem:[#allocation10 + $0x20] sm:$0xf]  ;;  %v4866_v40 = vld [vmem:[#allocation10 + $0xd4] sm:$0xf] }
 0x16d   :  { %2328 = vmatpush.bf16.msrb.mxu1 %v3879_v7  ;;  %v4863_v7 = vld [vmem:[#allocation10 + $0xb4] sm:$0xf0]  ;;  %v5377_v9 = vpop.f32.mrf.mxu1 }
 0x16e   :  { %2339 = vmatpush.bf16.msrb.mxu2 %v4039_v4  ;;  %v4851_v4 = vld [vmem:[#allocation10 + $0x54] sm:$0xf0]  ;;  %v5374_v50 = vpop.f32.mrf.mxu3  ;;  %v2380_v51 = vadd.f32 %v2376_v15, %v2045_v16  ;;  %v2058_v55 = vadd.f32 %v5351_v46, %v661_v45  ;;  %v4250_v16 = vld [vmem:[#allocation10] sm:$0xf] }
 0x16f   :  { %2349 = vmatpush.bf16.msra.mxu3 %v4215_v21  ;;  %v4291_v12 = vor.u32 %v4851_v4, %v4290_v3  ;;  %v4339_v21 = vor.u32 %v4863_v7, %v4338_v18  ;;  %v4843_v18 = vld [vmem:[#allocation10 + $0x14] sm:$0xf0] }
 0x170   :  { %2314 = vmatpush.bf16.msra.mxu0 %v3767_v42  ;;  %2329 = vmatmul.bf16.vlgmr.msrb.gmra.mxu1 %v5287_v58  ;;  %v5367_v58 = vpop.permute.xlu1 %2385  ;;  %v4148_v42 = vld [vmem:[#allocation7 + $0x738] sm:$0xf0]  ;;  %v2071_v7 = vadd.f32 %v5346_v60, %v2058_v55  ;;  %v4887_v45 = vld [vmem:[#allocation10 + $0x174] sm:$0xf0] }
 0x171   :  { %2855 = vmatpush.bf16.msra.mxu1 %v4371_v13  ;;  %v4813_v13 = vld [vmem:[#allocation7 + $0x72c] sm:$0xf]  ;;  %v2400_v20 = vmul.f32 %v2396_v11, %v5367_v58  ;;  %v4364_v11 = vld [vmem:[#allocation10 + $0xe8] sm:$0xf0]  ;;  %v4862_v55 = vld [vmem:[#allocation10 + $0xb4] sm:$0xf] }
 0x172   :  { %2340 = vmatpush.bf16.msrb.mxu2 %v4023_v19  ;;  %v4849_v19 = vld [vmem:[#allocation10 + $0x44] sm:$0xf0]  ;;  %v4151_v29 = vor.u32 %v4813_v13, %v4148_v42  ;;  %v4259_v13 = vor.u32 %v4843_v18, %v4258_v44  ;;  %v2365_v42 = vperm.slane %v5336_v24, 5  ;;  %v4284_v44 = vld [vmem:[#allocation10 + $0x48] sm:$0xf0] }
 0x173   :  { %2350 = vmatpush.bf16.msra.mxu3 %v4199_v63  ;;  %v4283_v31 = vor.u32 %v4849_v19, %v4282_v17  ;;  %v4859_v63 = vld [vmem:[#allocation10 + $0x94] sm:$0xf0]  ;;  %v2404_v48 = vadd.f32 %v2400_v20, %v2380_v51  ;;  %v4854_v19 = vld [vmem:[#allocation10 + $0x74] sm:$0xf]  ;;  %v4852_v51 = vld [vmem:[#allocation10 + $0x64] sm:$0xf] }
 0x174   :  { %2315 = vmatpush.bf16.msra.mxu0 %v3751_v36  ;;  %v5382_v30 = vpop.f32.mrf.mxu0  ;;  %v4331_v36 = vor.u32 %v4861_v27, %v4330_v23  ;;  %v4356_v23 = vld [vmem:[#allocation10 + $0xd8] sm:$0xf0]  ;;  %v2389_v27 = vperm.slane %v5336_v24, 6 }
 0x175   :  { %2856 = vmatpush.bf16.msra.mxu1 %v4363_v34  ;;  %v4274_v34 = vld [vmem:[#allocation10 + $0x30] sm:$0xf] }
 0x176   :  { %2341 = vmatpush.bf16.msrb.mxu2 %v4007_v39  ;;  %v2098_v38 = vpop.f32.mrf.mxu3  ;;  %v4322_v39 = vld [vmem:[#allocation10 + $0x90] sm:$0xf]  ;;  %v4275_v47 = vor.u32 %v4847_v35, %v4274_v34  ;;  %v4864_v34 = vld [vmem:[#allocation10 + $0xc4] sm:$0xf]  ;;  %v4348_v35 = vld [vmem:[#allocation10 + $0xc8] sm:$0xf0] }
 0x177   :  { %2316 = vmatmul.bf16.vlgmr.msra.gmra.mxu0 %v5290_v14  ;;  %2351 = vmatpush.bf16.msra.mxu3 %v4183_v56  ;;  %v4167_v14 = vor.u32 %v4817_v61, %v4164_v0  ;;  %v4323_v54 = vor.u32 %v4859_v63, %v4322_v39  ;;  %v4314_v56 = vld [vmem:[#allocation10 + $0x80] sm:$0xf]  ;;  %v4870_v61 = vld [vmem:[#allocation10 + $0xf4] sm:$0xf]  ;;  %v4372_v0 = vld [vmem:[#allocation10 + $0xf8] sm:$0xf0] }
 0x178   :  { %2842 = vmatpush.bf16.msrb.mxu0 %v4307_v41  ;;  %v5386_v37 = vpop.permute.xlu1 %2409  ;;  %v2124_v41 = vpop.f32.mrf.mxu1  ;;  %v4315_v46 = vor.u32 %v4857_v57, %v4314_v56  ;;  %v4375_v8 = vor.u32 %v4870_v61, %v4372_v0  ;;  %v2397_v38 = vperm.slane %v2389_v27, 2  ;;  %v2421_v63 = vperm.slane %v2413_v28, 3  ;;  %v4340_v56 = vld [vmem:[#allocation10 + $0xb8] sm:$0xf0] }
 0x179   :  { %2857 = vmatpush.bf16.msra.mxu1 %v4355_v53  ;;  %2342 = vmatmul.bf16.vlgmr.msrb.gmra.mxu2 %v5295_v26  ;;  %v2412_v26 = vperm.slane %v5336_v24, 3  ;;  %v4845_v53 = vld [vmem:[#allocation10 + $0x24] sm:$0xf0]  ;;  %v4343_v18 = vor.u32 %v4862_v55, %v4340_v56  ;;  %v4875_v55 = vld [vmem:[#allocation10 + $0x114] sm:$0xf0] }
 0x17a   :  { %v4267_v3 = vor.u32 %v4845_v53, %v4266_v52  ;;  %v4351_v52 = vor.u32 %v4864_v34, %v4348_v35  ;;  %v4426_v53 = vld [vmem:[#allocation10 + $0x160] sm:$0xf]  ;;  %v2401_v61 = vmul.f32 %v2397_v38, %v5367_v58  ;;  %v4316_v38 = vld [vmem:[#allocation10 + $0x88] sm:$0xf0] }
 0x17b   :  { %2352 = vmatpush.bf16.msra.mxu3 %v4167_v14  ;;  %v2420_v33 = vperm.slane %v2412_v26, 3  ;;  %v4868_v14 = vld [vmem:[#allocation10 + $0xe4] sm:$0xf]  ;;  %v4841_v26 = vld [vmem:[#allocation10 + $0x4] sm:$0xf0] }
 0x17c   :  { %2843 = vmatpush.bf16.msrb.mxu0 %v4299_v1  ;;  %v2135_v1 = vpop.f32.mrf.mxu2  ;;  %v2111_v2 = vpop.f32.mrf.mxu0  ;;  %v4367_v60 = vor.u32 %v4868_v14, %v4364_v11  ;;  %v4883_v14 = vld [vmem:[#allocation10 + $0x154] sm:$0xf0]  ;;  %v4394_v34 = vld [vmem:[#allocation10 + $0x120] sm:$0xf] }
 0x17d   :  { %2858 = vmatpush.bf16.msra.mxu1 %v4347_v5  ;;  %v2424_v49 = vmul.f32 %v2420_v33, %v5386_v37  ;;  %v2433_v5 = vperm.slane %v5393_v10, 0  ;;  %v4359_v33 = vor.u32 %v4866_v40, %v4356_v23 }
 0x17f   :  { %2353 = vmatpush.bf16.msra.mxu3 %v4151_v29  ;;  %v2428_v4 = vadd.f32 %v2424_v49, %v2404_v48  ;;  %v4251_v29 = vor.u32 %v4841_v26, %v4250_v16  ;;  %v4292_v49 = vld [vmem:[#allocation10 + $0x58] sm:$0xf0] }
 0x180   :  { %2844 = vmatpush.bf16.msrb.mxu0 %v4291_v12  ;;  %v2084_v12 = vadd.f32 %v5356_v59, %v2071_v7  ;;  %v4332_v7 = vld [vmem:[#allocation10 + $0xa8] sm:$0xf0] }
 0x181   :  { %2859 = vmatpush.bf16.msra.mxu1 %v4339_v21  ;;  %v2441_v15 = vadd.f32 %v2433_v5, %v2428_v4  ;;  %v4308_v21 = vld [vmem:[#allocation10 + $0x78] sm:$0xf0]  ;;  %v4848_v5 = vld [vmem:[#allocation10 + $0x44] sm:$0xf] }
 0x182   :  { %v2097_v17 = vadd.f32 %v5374_v50, %v2084_v12  ;;  %v4311_v32 = vor.u32 %v4854_v19, %v4308_v21  ;;  %v4300_v50 = vld [vmem:[#allocation10 + $0x68] sm:$0xf0]  ;;  %v2434_v12 = vperm.slane %v5393_v10, 1  ;;  %v4410_v21 = vld [vmem:[#allocation10 + $0x140] sm:$0xf] }
 0x183   :  { %2354 = vmatpush.bf16.msra.mxu3 %v4135_v43  ;;  %v2445_v20 = vmax.f32 %v2441_v15, 0.0  ;;  %v4303_v24 = vor.u32 %v4852_v51, %v4300_v50  ;;  %v4850_v43 = vld [vmem:[#allocation10 + $0x54] sm:$0xf]  ;;  %v4402_v50 = vld [vmem:[#allocation10 + $0x130] sm:$0xf] }
 0x184   :  { %2845 = vmatpush.bf16.msrb.mxu0 %v4283_v31  ;;  %v2110_v59 = vadd.f32 %v5382_v30, %v2097_v17  ;;  %v2373_v31 = vperm.slane %v2365_v42, 1  ;;  %v4287_v42 = vor.u32 %v4848_v5, %v4284_v44  ;;  %v4846_v15 = vld [vmem:[#allocation10 + $0x34] sm:$0xf]  ;;  %v4276_v17 = vld [vmem:[#allocation10 + $0x38] sm:$0xf0]  ;;  %v5419_v44 = vunpack.c.h.bf16 %v5331_v62 }
 0x185   :  { %2860 = vmatpush.bf16.msra.mxu1 %v4331_v36  ;;  %v4434_v36 = vld [vmem:[#allocation10 + $0x170] sm:$0xf]  ;;  %v5405_v41 = vpack.c.bf16 %v2445_v20, %v2445_v20  ;;  %v4268_v20 = vld [vmem:[#allocation10 + $0x28] sm:$0xf0]  ;;  %v4436_v5 = vld [vmem:[#allocation10 + $0x178] sm:$0xf0] }
 0x186   :  { %2355 = vmatmul.bf16.vlgmr.msra.gmra.mxu3 %v5305_v25  ;;  %v2137_v25 = vpop.f32.mrf.mxu2  ;;  %v2123_v39 = vadd.f32 %v5377_v9, %v2110_v59  ;;  %v4435_v30 = vor.u32 %v4887_v45, %v4434_v36  ;;  %v4858_v59 = vld [vmem:[#allocation10 + $0x94] sm:$0xf]  ;;  %v4856_v45 = vld [vmem:[#allocation10 + $0x84] sm:$0xf] }
 0x188   :  { %2846 = vmatpush.bf16.msrb.mxu0 %v4275_v47  ;;  %v2377_v47 = vmul.f32 %v2373_v31, %v5371_v6  ;;  %v2136_v48 = vadd.f32 %v2135_v1, %v2123_v39  ;;  %2868 = vmatpush.bf16.msra.mxu2 %v4435_v30  ;;  %v2425_v1 = vmul.f32 %v2421_v63, %v5386_v37  ;;  %v4877_v30 = vld [vmem:[#allocation10 + $0x124] sm:$0xf0] }
 0x189   :  { %2861 = vmatpush.bf16.msra.mxu1 %v4323_v54  ;;  %v4885_v54 = vld [vmem:[#allocation10 + $0x164] sm:$0xf0]  ;;  %v2148_v9 = vpop.f32.mrf.mxu3  ;;  %v4279_v31 = vor.u32 %v4846_v15, %v4276_v17  ;;  %v4880_v17 = vld [vmem:[#allocation10 + $0x144] sm:$0xf] }
 0x18a   :  { %v4427_v57 = vor.u32 %v4885_v54, %v4426_v53  ;;  %v2149_v0 = vadd.f32 %v2148_v9, %v2136_v48  ;;  %v4395_v48 = vor.u32 %v4877_v30, %v4394_v34  ;;  %v4840_v53 = vld [vmem:[#allocation10 + $0x4] sm:$0xf]  ;;  %v4252_v54 = vld [vmem:[#allocation10 + $0x8] sm:$0xf0]  ;;  %v4386_v9 = vld [vmem:[#allocation10 + $0x110] sm:$0xf] }
 0x18b   :  { %v4387_v56 = vor.u32 %v4875_v55, %v4386_v9  ;;  %v4388_v34 = vld [vmem:[#allocation10 + $0x118] sm:$0xf0] }
 0x18c   :  { %2847 = vmatpush.bf16.msrb.mxu0 %v4267_v3  ;;  %v4295_v3 = vor.u32 %v4850_v43, %v4292_v49  ;;  %v2381_v4 = vadd.f32 %v2377_v47, %v2149_v0  ;;  %2869 = vmatpush.bf16.msra.mxu2 %v4427_v57  ;;  %v4842_v43 = vld [vmem:[#allocation10 + $0x14] sm:$0xf]  ;;  %v4260_v47 = vld [vmem:[#allocation10 + $0x18] sm:$0xf0]  ;;  %v4319_v49 = vor.u32 %v4856_v45, %v4316_v38  ;;  %v4378_v57 = vld [vmem:[#allocation10 + $0x100] sm:$0xf] }
 0x18d   :  { %2862 = vmatpush.bf16.msra.mxu1 %v4315_v46  ;;  %v5410_v2 = vpop.f32.mrf.mxu1  ;;  %v4860_v46 = vld [vmem:[#allocation10 + $0xa4] sm:$0xf]  ;;  %v4380_v38 = vld [vmem:[#allocation10 + $0x108] sm:$0xf0] }
 0x18e   :  { %v2405_v11 = vadd.f32 %v2401_v61, %v2381_v4  ;;  %v4335_v19 = vor.u32 %v4860_v46, %v4332_v7  ;;  %v4873_v61 = vld [vmem:[#allocation10 + $0x104] sm:$0xf0]  ;;  %v4886_v4 = vld [vmem:[#allocation10 + $0x174] sm:$0xf]  ;;  %v4884_v46 = vld [vmem:[#allocation10 + $0x164] sm:$0xf] }
 0x18f   :  { %v4428_v7 = vld [vmem:[#allocation10 + $0x168] sm:$0xf0]  ;;  %v4872_v45 = vld [vmem:[#allocation10 + $0x104] sm:$0xf] }
 0x190   :  { %2848 = vmatpush.bf16.msrb.mxu0 %v4259_v13  ;;  %v2429_v16 = vadd.f32 %v2425_v1, %v2405_v11  ;;  %v4379_v1 = vor.u32 %v4873_v61, %v4378_v57  ;;  %v4431_v11 = vor.u32 %v4884_v46, %v4428_v7  ;;  %v4901_v57 = vld [vmem:[#allocation10 + $0x1e4] sm:$0xf0]  ;;  %v4482_v46 = vld [vmem:[#allocation10 + $0x1d0] sm:$0xf]  ;;  %v4899_v7 = vld [vmem:[#allocation10 + $0x1d4] sm:$0xf0] }
 0x191   :  { %2907 = vmatpush.bf16.msrb.mxu1 %v4375_v8  ;;  %v4418_v8 = vld [vmem:[#allocation10 + $0x150] sm:$0xf]  ;;  %v2150_v25 = vpop.f32.mrf.mxu3 }
 0x192   :  { %v4419_v13 = vor.u32 %v4883_v14, %v4418_v8  ;;  %v2442_v27 = vadd.f32 %v2434_v12, %v2429_v16  ;;  %v650_v8 = vperm.slane %v5419_v44, 0 }
 0x194   :  { %2849 = vmatpush.bf16.msrb.mxu0 %v4251_v29  ;;  %v5414_v26 = vpop.f32.mrf.mxu0  ;;  %2870 = vmatpush.bf16.msra.mxu2 %v4419_v13  ;;  %v4324_v29 = vld [vmem:[#allocation10 + $0x98] sm:$0xf0]  ;;  %v2446_v28 = vmax.f32 %v2442_v27, 0.0  ;;  %v4882_v13 = vld [vmem:[#allocation10 + $0x154] sm:$0xf]  ;;  %v658_v15 = vperm.slane %v650_v8, 0  ;;  %v4483_v8 = vor.u32 %v4899_v7, %v4482_v46 }
 0x195   :  { %2908 = vmatpush.bf16.msrb.mxu1 %v4367_v60  ;;  %v4881_v60 = vld [vmem:[#allocation10 + $0x144] sm:$0xf0]  ;;  %v2176_v23 = vpop.f32.mrf.mxu1  ;;  %v4327_v51 = vor.u32 %v4858_v59, %v4324_v29  ;;  %v4876_v29 = vld [vmem:[#allocation10 + $0x124] sm:$0xf] }
 0x196   :  { %v4411_v40 = vor.u32 %v4881_v60, %v4410_v21  ;;  %v2450_v36 = vpack.c.bf16 %v2446_v28, %v2446_v28  ;;  %v4404_v23 = vld [vmem:[#allocation10 + $0x138] sm:$0xf0] }
 0x197   :  { %2850 = vmatmul.bf16.vlgmr.msrb.gmra.mxu0 %v5405_v41 }
 0x198   :  { %2894 = vmatpush.bf16.msra.mxu0 %v4311_v32  ;;  %v4844_v32 = vld [vmem:[#allocation10 + $0x24] sm:$0xf]  ;;  %2871 = vmatpush.bf16.msra.mxu2 %v4411_v40  ;;  %v4878_v40 = vld [vmem:[#allocation10 + $0x134] sm:$0xf] }
 0x199   :  { %2909 = vmatpush.bf16.msrb.mxu1 %v4359_v33  ;;  %v4879_v33 = vld [vmem:[#allocation10 + $0x134] sm:$0xf0]  ;;  %v4271_v63 = vor.u32 %v4844_v32, %v4268_v20  ;;  %v4407_v59 = vor.u32 %v4878_v40, %v4404_v23  ;;  %v4458_v40 = vld [vmem:[#allocation10 + $0x1a0] sm:$0xf]  ;;  %v4893_v23 = vld [vmem:[#allocation10 + $0x1a4] sm:$0xf0] }
 0x19a   :  { %v4403_v39 = vor.u32 %v4879_v33, %v4402_v50  ;;  %2863 = vmatmul.bf16.vlgmr.msra.gmra.mxu1 %v2450_v36  ;;  %v4874_v33 = vld [vmem:[#allocation10 + $0x114] sm:$0xf] }
 0x19c   :  { %2895 = vmatpush.bf16.msra.mxu0 %v4303_v24  ;;  %v5416_v35 = vpop.f32.mrf.mxu2  ;;  %v2163_v24 = vpop.f32.mrf.mxu0  ;;  %2872 = vmatpush.bf16.msra.mxu2 %v4403_v39  ;;  %v2366_v39 = vperm.slane %v5419_v44, 1 }
 0x19d   :  { %2910 = vmatpush.bf16.msrb.mxu1 %v4351_v52  ;;  %v4263_v52 = vor.u32 %v4842_v43, %v4260_v47  ;;  %v4383_v43 = vor.u32 %v4872_v45, %v4380_v38  ;;  %v4500_v45 = vld [vmem:[#allocation10 + $0x1f8] sm:$0xf0] }
 0x19e   :  { %v2374_v47 = vperm.slane %v2366_v39, 1  ;;  %v4900_v39 = vld [vmem:[#allocation10 + $0x1e4] sm:$0xf] }
 0x1a0   :  { %2896 = vmatpush.bf16.msra.mxu0 %v4295_v3  ;;  %2873 = vmatpush.bf16.msra.mxu2 %v4395_v48  ;;  %v4255_v3 = vor.u32 %v4840_v53, %v4252_v54  ;;  %v4498_v48 = vld [vmem:[#allocation10 + $0x1f0] sm:$0xf]  ;;  %v2378_v54 = vmul.f32 %v2374_v47, %v5371_v6  ;;  %v4898_v47 = vld [vmem:[#allocation10 + $0x1d4] sm:$0xf] }
 0x1a1   :  { %2911 = vmatpush.bf16.msrb.mxu1 %v4343_v18  ;;  %v4439_v18 = vor.u32 %v4886_v4, %v4436_v5 }
 0x1a4   :  { %2897 = vmatpush.bf16.msra.mxu0 %v4287_v42  ;;  %v2189_v0 = vpop.f32.mrf.mxu2  ;;  %2874 = vmatpush.bf16.msra.mxu2 %v4387_v56  ;;  %v4420_v42 = vld [vmem:[#allocation10 + $0x158] sm:$0xf0]  ;;  %v4490_v56 = vld [vmem:[#allocation10 + $0x1e0] sm:$0xf] }
 0x1a5   :  { %2912 = vmatpush.bf16.msrb.mxu1 %v4335_v19  ;;  %v4423_v62 = vor.u32 %v4882_v13, %v4420_v42  ;;  %v4412_v19 = vld [vmem:[#allocation10 + $0x148] sm:$0xf0]  ;;  %v4491_v0 = vor.u32 %v4901_v57, %v4490_v56  ;;  %v4474_v42 = vld [vmem:[#allocation10 + $0x1c0] sm:$0xf]  ;;  %v4894_v57 = vld [vmem:[#allocation10 + $0x1b4] sm:$0xf] }
 0x1a6   :  { %v4415_v21 = vor.u32 %v4880_v17, %v4412_v19 }
 0x1a8   :  { %2898 = vmatpush.bf16.msra.mxu0 %v4279_v31  ;;  %2875 = vmatpush.bf16.msra.mxu2 %v4379_v1  ;;  %v4396_v31 = vld [vmem:[#allocation10 + $0x128] sm:$0xf0] }
 0x1a9   :  { %2913 = vmatpush.bf16.msrb.mxu1 %v4327_v51  ;;  %v2200_v14 = vpop.f32.mrf.mxu3  ;;  %v4399_v20 = vor.u32 %v4876_v29, %v4396_v31  ;;  %v4459_v29 = vor.u32 %v4893_v23, %v4458_v40 }
 0x1ac   :  { %2899 = vmatpush.bf16.msra.mxu0 %v4271_v63  ;;  %2920 = vmatpush.bf16.msrb.mxu2 %v4439_v18  ;;  %v2390_v63 = vperm.slane %v5419_v44, 2 }
 0x1ad   :  { %2914 = vmatpush.bf16.msrb.mxu1 %v4319_v49  ;;  %v2226_v12 = vpop.f32.mrf.mxu1 }
 0x1b0   :  { %2900 = vmatpush.bf16.msra.mxu0 %v4263_v52  ;;  %2915 = vmatmul.bf16.vlgmr.msrb.gmra.mxu1 %v2450_v36  ;;  %v4391_v36 = vor.u32 %v4874_v33, %v4388_v34  ;;  %v2398_v52 = vperm.slane %v2390_v63, 2  ;;  %v651_v63 = vperm.slane %v5419_v44, 4 }
 0x1b1   :  { %2921 = vmatpush.bf16.msrb.mxu2 %v4431_v11  ;;  %v2202_v60 = vpop.f32.mrf.mxu3  ;;  %v2435_v11 = vperm.slane %v5393_v10, 2 }
 0x1b2   :  { %v4895_v60 = vld [vmem:[#allocation10 + $0x1b4] sm:$0xf0] }
 0x1b4   :  { %2901 = vmatpush.bf16.msra.mxu0 %v4255_v3  ;;  %v2213_v16 = vpop.f32.mrf.mxu0  ;;  %v2402_v3 = vmul.f32 %v2398_v52, %v5367_v58  ;;  %v4476_v52 = vld [vmem:[#allocation10 + $0x1c8] sm:$0xf0] }
 0x1b5   :  { %2922 = vmatpush.bf16.msrb.mxu2 %v4423_v62  ;;  %v2228_v25 = vpop.f32.mrf.mxu1 }
 0x1b7   :  { %2902 = vmatmul.bf16.vlgmr.msra.gmra.mxu0 %v5405_v41  ;;  %v662_v41 = vmul.f32 %v658_v15, %v5348_v22  ;;  %v4897_v15 = vld [vmem:[#allocation10 + $0x1c4] sm:$0xf0] }
 0x1b9   :  { %2923 = vmatpush.bf16.msrb.mxu2 %v4415_v21  ;;  %v2162_v27 = vadd.f32 %v5414_v26, %v662_v41  ;;  %v4466_v41 = vld [vmem:[#allocation10 + $0x1b0] sm:$0xf] }
 0x1ba   :  { %v4467_v25 = vor.u32 %v4895_v60, %v4466_v41 }
 0x1bb   :  { %v2175_v51 = vadd.f32 %v5410_v2, %v2162_v27  ;;  %v2414_v2 = vperm.slane %v5419_v44, 3 }
 0x1bc   :  { %v2239_v28 = vpop.f32.mrf.mxu2  ;;  %v2215_v32 = vpop.f32.mrf.mxu0 }
 0x1bd   :  { %2924 = vmatpush.bf16.msrb.mxu2 %v4407_v59  ;;  %v2188_v50 = vadd.f32 %v5416_v35, %v2175_v51  ;;  %v4903_v35 = vld [vmem:[#allocation10 + $0x1f4] sm:$0xf0]  ;;  %v2422_v9 = vperm.slane %v2414_v2, 3  ;;  %v4484_v2 = vld [vmem:[#allocation10 + $0x1d8] sm:$0xf0] }
 0x1be   :  { %v4499_v49 = vor.u32 %v4903_v35, %v4498_v48  ;;  %v4891_v32 = vld [vmem:[#allocation10 + $0x194] sm:$0xf0]  ;;  %v4487_v48 = vor.u32 %v4898_v47, %v4484_v2  ;;  %v659_v35 = vperm.slane %v651_v63, 0 }
 0x1bf   :  { %v2201_v26 = vadd.f32 %v2200_v14, %v2188_v50  ;;  %v2426_v5 = vmul.f32 %v2422_v9, %v5386_v37  ;;  %v4889_v50 = vld [vmem:[#allocation10 + $0x184] sm:$0xf0] }
 0x1c0   :  { %2881 = vmatpush.bf16.msrb.mxu3 %v4499_v49  ;;  %v4896_v49 = vld [vmem:[#allocation10 + $0x1c4] sm:$0xf]  ;;  %v663_v9 = vmul.f32 %v659_v35, %v5348_v22  ;;  %v4911_v35 = vld [vmem:[#allocation11 + $0x38] sm:$0xff] }
 0x1c1   :  { %2925 = vmatpush.bf16.msrb.mxu2 %v4399_v20  ;;  %v2214_v24 = vadd.f32 %v2213_v16, %v2201_v26  ;;  %v4475_v16 = vor.u32 %v4897_v15, %v4474_v42  ;;  %v4442_v20 = vld [vmem:[#allocation10 + $0x180] sm:$0xf]  ;;  %v4492_v26 = vld [vmem:[#allocation10 + $0x1e8] sm:$0xf0]  ;;  %v4888_v15 = vld [vmem:[#allocation10 + $0x184] sm:$0xf]  ;;  %3081 = vmatpush.bf16.msrb.mxu0 %v4911_v35 }
 0x1c2   :  { %v4443_v34 = vor.u32 %v4889_v50, %v4442_v20 }
 0x1c3   :  { %v2227_v53 = vadd.f32 %v2226_v12, %v2214_v24 }
 0x1c4   :  { %v2241_v30 = vpop.f32.mrf.mxu2  ;;  %2882 = vmatpush.bf16.msrb.mxu3 %v4491_v0 }
 0x1c5   :  { %2926 = vmatpush.bf16.msrb.mxu2 %v4391_v36  ;;  %v2240_v55 = vadd.f32 %v2239_v28, %v2227_v53  ;;  %v4450_v28 = vld [vmem:[#allocation10 + $0x190] sm:$0xf]  ;;  %v4902_v36 = vld [vmem:[#allocation10 + $0x1f4] sm:$0xf]  ;;  %v4495_v30 = vor.u32 %v4900_v39, %v4492_v26 }
 0x1c6   :  { %v4451_v51 = vor.u32 %v4891_v32, %v4450_v28  ;;  %v4503_v38 = vor.u32 %v4902_v36, %v4500_v45 }
 0x1c8   :  { %2883 = vmatpush.bf16.msrb.mxu3 %v4483_v8 }
 0x1c9   :  { %2927 = vmatpush.bf16.msrb.mxu2 %v4383_v43  ;;  %v2252_v61 = vpop.f32.mrf.mxu3 }
 0x1ca   :  { %v2253_v1 = vadd.f32 %v2252_v61, %v2240_v55  ;;  %v4468_v61 = vld [vmem:[#allocation10 + $0x1b8] sm:$0xf0] }
 0x1cb   :  { %v4471_v0 = vor.u32 %v4894_v57, %v4468_v61  ;;  %v4906_v61 = vld [vmem:[#allocation11 + $0x10] sm:$0xff] }
 0x1cc   :  { %v2382_v18 = vadd.f32 %v2378_v54, %v2253_v1  ;;  %2884 = vmatpush.bf16.msrb.mxu3 %v4475_v16  ;;  %v4479_v54 = vor.u32 %v4896_v49, %v4476_v52  ;;  %v4892_v1 = vld [vmem:[#allocation10 + $0x1a4] sm:$0xf]  ;;  %v4919_v49 = vld [vmem:[#allocation11 + $0x78] sm:$0xff]  ;;  %v4910_v52 = vld [vmem:[#allocation11 + $0x30] sm:$0xff] }
 0x1cd   :  { %v5432_v4 = vpop.f32.mrf.mxu1  ;;  %3094 = vmatpush.bf16.msra.mxu1 %v4919_v49  ;;  %3082 = vmatpush.bf16.msrb.mxu0 %v4910_v52 }
 0x1ce   :  { %v2406_v14 = vadd.f32 %v2402_v3, %v2382_v18 }
 0x1d0   :  { %v2430_v12 = vadd.f32 %v2426_v5, %v2406_v14  ;;  %2885 = vmatpush.bf16.msrb.mxu3 %v4467_v25  ;;  %v4460_v5 = vld [vmem:[#allocation10 + $0x1a8] sm:$0xf0] }
 0x1d1   :  { %v2254_v62 = vpop.f32.mrf.mxu3  ;;  %v4463_v46 = vor.u32 %v4892_v1, %v4460_v5  ;;  %v4905_v1 = vld [vmem:[#allocation11 + $0x8] sm:$0xff] }
 0x1d2   :  { %v2443_v19 = vadd.f32 %v2435_v11, %v2430_v12  ;;  %v4890_v11 = vld [vmem:[#allocation10 + $0x194] sm:$0xf]  ;;  %v4452_v12 = vld [vmem:[#allocation10 + $0x198] sm:$0xf0]  ;;  %v4444_v62 = vld [vmem:[#allocation10 + $0x188] sm:$0xf0] }
 0x1d3   :  { %v4455_v22 = vor.u32 %v4890_v11, %v4452_v12  ;;  %v4917_v5 = vld [vmem:[#allocation11 + $0x68] sm:$0xff]  ;;  %v4912_v11 = vld [vmem:[#allocation11 + $0x40] sm:$0xff] }
 0x1d4   :  { %v2265_v13 = vpop.f32.mrf.mxu0  ;;  %v2447_v21 = vmax.f32 %v2443_v19, 0.0  ;;  %2886 = vmatpush.bf16.msrb.mxu3 %v4459_v29 }
 0x1d5   :  { %v2280_v17 = vpop.f32.mrf.mxu1  ;;  %v2266_v3 = vadd.f32 %v2265_v13, %v663_v9  ;;  %v2367_v13 = vperm.slane %v5419_v44, 5 }
 0x1d6   :  { %v2451_v59 = vpack.c.bf16 %v2447_v21, %v2447_v21  ;;  %v4447_v17 = vor.u32 %v4888_v15, %v4444_v62  ;;  %v2391_v21 = vperm.slane %v5419_v44, 6 }
 0x1d7   :  { %v2279_v8 = vadd.f32 %v5432_v4, %v2266_v3  ;;  %v2375_v41 = vperm.slane %v2367_v13, 1  ;;  %v2415_v4 = vperm.slane %v5419_v44, 7 }
 0x1d8   :  { %2876 = vmatmul.bf16.vlgmr.msra.gmra.mxu2 %v2451_v59  ;;  %2887 = vmatpush.bf16.msrb.mxu3 %v4451_v51  ;;  %v2399_v25 = vperm.slane %v2391_v21, 2  ;;  %v2436_v51 = vperm.slane %v5393_v10, 3 }
 0x1dc   :  { %v2291_v27 = vpop.f32.mrf.mxu2  ;;  %v2267_v31 = vpop.f32.mrf.mxu0  ;;  %2888 = vmatpush.bf16.msrb.mxu3 %v4443_v34 }
 0x1dd   :  { %v2292_v14 = vadd.f32 %v2291_v27, %v2279_v8  ;;  %v2379_v27 = vmul.f32 %v2375_v41, %v5371_v6  ;;  %v2403_v31 = vmul.f32 %v2399_v25, %v5367_v58  ;;  %v139_v6 = vld [vmem:[%s5466_s8 + $0xc] sm:$0x3]  ;;  %v4914_v8 = vld [vmem:[#allocation11 + $0x50] sm:$0xff] }
 0x1de   :  { %v2518_v39 = vperm.slane %v139_v6, 0  ;;  %v2519_v63 = vperm.slane %v139_v6, 1 }
 0x1e0   :  { %2933 = vmatpush.bf16.msra.mxu3 %v4503_v38 }
 0x1e4   :  { %v2293_v33 = vpop.f32.mrf.mxu2  ;;  %2934 = vmatpush.bf16.msra.mxu3 %v4495_v30 }
 0x1e8   :  { %2928 = vmatmul.bf16.vlgmr.msrb.gmra.mxu2 %v2451_v59  ;;  %2935 = vmatpush.bf16.msra.mxu3 %v4487_v48  ;;  %v2423_v59 = vperm.slane %v2415_v4, 3 }
 0x1e9   :  { %v2304_v24 = vpop.f32.mrf.mxu3 }
 0x1ea   :  { %v2305_v42 = vadd.f32 %v2304_v24, %v2292_v14  ;;  %v2427_v32 = vmul.f32 %v2423_v59, %v5386_v37  ;;  %v4913_v14 = vld [vmem:[#allocation11 + $0x48] sm:$0xff] }
 0x1ec   :  { %2936 = vmatpush.bf16.msra.mxu3 %v4479_v54  ;;  %v4909_v54 = vld [vmem:[#allocation11 + $0x28] sm:$0xff] }
 0x1ed   :  { %v2330_v43 = vpop.f32.mrf.mxu1  ;;  %3083 = vmatpush.bf16.msrb.mxu0 %v4909_v54 }
 0x1f0   :  { %2937 = vmatpush.bf16.msra.mxu3 %v4471_v0 }
 0x1f1   :  { %v2306_v55 = vpop.f32.mrf.mxu3 }
 0x1f2   :  { %v4908_v55 = vld [vmem:[#allocation11 + $0x20] sm:$0xff] }
 0x1f3   :  { %3084 = vmatpush.bf16.msrb.mxu0 %v4908_v55 }
 0x1f4   :  { %v2317_v53 = vpop.f32.mrf.mxu0  ;;  %2938 = vmatpush.bf16.msra.mxu3 %v4463_v46  ;;  %v4916_v46 = vld [vmem:[#allocation11 + $0x60] sm:$0xff] }
 0x1f5   :  { %v2332_v56 = vpop.f32.mrf.mxu1  ;;  %v2318_v19 = vadd.f32 %v2317_v53, %v2305_v42  ;;  %v4918_v53 = vld [vmem:[#allocation11 + $0x70] sm:$0xff] }
 0x1f6   :  { %3095 = vmatpush.bf16.msra.mxu1 %v4918_v53  ;;  %v4907_v56 = vld [vmem:[#allocation11 + $0x18] sm:$0xff] }
 0x1f7   :  { %v2331_v60 = vadd.f32 %v2330_v43, %v2318_v19  ;;  %3085 = vmatpush.bf16.msrb.mxu0 %v4907_v56 }
 0x1f8   :  { %2939 = vmatpush.bf16.msra.mxu3 %v4455_v22 }
 0x1fa   :  { %3096 = vmatpush.bf16.msra.mxu1 %v4917_v5 }
 0x1fb   :  { %3086 = vmatpush.bf16.msrb.mxu0 %v4906_v61 }
 0x1fc   :  { %v2343_v18 = vpop.f32.mrf.mxu2  ;;  %v2319_v7 = vpop.f32.mrf.mxu0  ;;  %2940 = vmatpush.bf16.msra.mxu3 %v4447_v17 }
 0x1fd   :  { %v2344_v40 = vadd.f32 %v2343_v18, %v2331_v60  ;;  %v4904_v18 = vld [vmem:[#allocation11] sm:$0xff]  ;;  %v4915_v7 = vld [vmem:[#allocation11 + $0x58] sm:$0xff] }
 0x1fe   :  { %3097 = vmatpush.bf16.msra.mxu1 %v4916_v46  ;;  %v141_v60 = vld [vmem:[%s5466_s8 + $0xf] sm:$0x1] }
 0x1ff   :  { %3087 = vmatpush.bf16.msrb.mxu0 %v4905_v1  ;;  %3125 = vperm.xlu2 %4944, %v141_v60  }
 0x202   :  { %3098 = vmatpush.bf16.msra.mxu1 %v4915_v7 }
 0x203   :  { %3088 = vmatpush.bf16.msrb.mxu0 %v4904_v18 }
 0x204   :  { %v2345_v16 = vpop.f32.mrf.mxu2 }
 0x206   :  { %3099 = vmatpush.bf16.msra.mxu1 %v4914_v8 }
 0x209   :  { %v2356_v23 = vpop.f32.mrf.mxu3 }
 0x20a   :  { %v2357_v29 = vadd.f32 %v2356_v23, %v2344_v40  ;;  %3100 = vmatpush.bf16.msra.mxu1 %v4913_v14  ;;  %v4946_v23 = vld [vmem:[%s5466_s8 + $0xe] ss:$0 sm:$0xff] }
 0x20c   :  { %v2383_v28 = vadd.f32 %v2379_v27, %v2357_v29 }
 0x20e   :  { %v2407_v20 = vadd.f32 %v2403_v31, %v2383_v28  ;;  %3101 = vmatpush.bf16.msra.mxu1 %v4912_v11 }
 0x210   :  { %v2431_v50 = vadd.f32 %v2427_v32, %v2407_v20  ;;  %v3108_v20 = vld [vmem:[#allocation13] sm:$0xf] }
 0x211   :  { %v2358_v34 = vpop.f32.mrf.mxu3 }
 0x212   :  { %v2444_v44 = vadd.f32 %v2436_v51, %v2431_v50 }
 0x214   :  { %v2851_v33 = vpop.f32.mrf.mxu0  ;;  %v2448_v36 = vmax.f32 %v2444_v44, 0.0 }
 0x215   :  { %v2852_v58 = vadd.f32 %v2851_v33, %v2518_v39 }
 0x216   :  { %v2452_v45 = vpack.c.bf16 %v2448_v36, %v2448_v36 }
 0x217   :  { %v2864_v26 = vpop.f32.mrf.mxu1 }
 0x218   :  { %2889 = vmatmul.bf16.vlgmr.msrb.gmra.mxu3 %v2452_v45  ;;  %v2865_v30 = vadd.f32 %v2864_v26, %v2852_v58 }
 0x21c   :  { %v2853_v38 = vpop.f32.mrf.mxu0 }
 0x21f   :  { %v2866_v37 = vpop.f32.mrf.mxu1 }
 0x228   :  { %2941 = vmatmul.bf16.vlgmr.msra.gmra.mxu3 %v2452_v45 }
 0x22d   :  { %v2916_v43 = vpop.f32.mrf.mxu1 }
 0x234   :  { %v2903_v10 = vpop.f32.mrf.mxu0 }
 0x235   :  { %v2904_v24 = vadd.f32 %v2903_v10, %v2519_v63  ;;  %v2918_v48 = vpop.f32.mrf.mxu1 }
 0x237   :  { %v2917_v47 = vadd.f32 %v2916_v43, %v2904_v24 }
 0x23c   :  { %v2905_v2 = vpop.f32.mrf.mxu0 }
 0x259   :  { %v3126_v51 = vpop.permute.xlu2 %3125 }
 0x25a   :  { %v3128_v50 = vperm.slane %v3126_v51, 0 }
 0x25b   :  { %v2877_v9 = vpop.f32.mrf.mxu2 }
 0x25c   :  { %v2878_v12 = vadd.f32 %v2877_v9, %v2865_v30 }
 0x263   :  { %v2879_v57 = vpop.f32.mrf.mxu2 }
 0x26b   :  { %v2929_v0 = vpop.f32.mrf.mxu2 }
 0x26c   :  { %v2930_v17 = vadd.f32 %v2929_v0, %v2917_v47 }
 0x273   :  { %v2931_v3 = vpop.f32.mrf.mxu2 }
 0x29b   :  { %v2890_v22 = vpop.f32.mrf.mxu3 }
 0x29c   :  { %v2891_v42 = vadd.f32 %v2890_v22, %v2878_v12 }
 0x29e   :  { %v2946_v15 = vmax.f32 %v2891_v42, 0.0 }
 0x2a0   :  { %v2948_v62 = vpack.c.bf16 %v2946_v15, %v2946_v15 }
 0x2a2   :  { %3089 = vmatmul.bf16.vlgmr.msrb.gmra.mxu0 %v2948_v62 }
 0x2a3   :  { %v2892_v16 = vpop.f32.mrf.mxu3 }
 0x2ab   :  { %v2942_v13 = vpop.f32.mrf.mxu3 }
 0x2ac   :  { %v2943_v19 = vadd.f32 %v2942_v13, %v2930_v17 }
 0x2ae   :  { %v2947_v21 = vmax.f32 %v2943_v19, 0.0 }
 0x2b0   :  { %v2949_v41 = vpack.c.bf16 %v2947_v21, %v2947_v21 }
 0x2b2   :  { %3102 = vmatmul.bf16.vlgmr.msra.gmra.mxu1 %v2949_v41 }
 0x2b3   :  { %v2944_v4 = vpop.f32.mrf.mxu3 }
 0x31f   :  { %v3090_v25 = vpop.f32.mrf.mxu0 }
 0x320   :  { %v3091_v27 = vadd.f32 %v4946_v23, %v3090_v25 }
 0x327   :  { %v3092_v40 = vpop.f32.mrf.mxu0 }
 0x32f   :  { %v3103_v59 = vpop.f32.mrf.mxu1 }
 0x330   :  { %v3104_v29 = vadd.f32 %v3103_v59, %v3091_v27 }
 0x332   :  { %v3107_v31 = vmax.f32 %v3104_v29, 0.0 }
 0x334   :  { %v3109_v28 = vpack.c.bf16 %v3107_v31, %v3107_v31 }
 0x336   :  { %3117 = vmatpush.bf16.xpose.msra.mxu2 %v3109_v28 }
 0x337   :  { %v3105_v32 = vpop.f32.mrf.mxu1 }
 0x33d   :  { %3118 = vmatmul.bf16.vlgmr.msra.gmra.mxu2 %v3108_v20 }
 0x3c0   :  { %v3119_v33 = vpop.f32.mrf.mxu2 }
 0x3c1   :  { %v3129_v34 = vadd.f32 %v3128_v50, %v3119_v33 }
 0x3c3   :  { %3131 = vst.msk [vmem:[#allocation14] sm:$0x1] %vm3130_vm1, %v3129_v34 }
 0x3c4   :  { %3142 = dma.vmem_to_hbm [thread:$0]  %s3138_s12, 16, %s3140_s15, [#allocation4]  }
 0x3c8   :  { %v3121_v44 = vpop.f32.mrf.mxu2 }
 0x3c9   :  { %5147 = dma.done.wait [#allocation4], 16  }
 0x3ca   :  { %5148 = vsyncadd [#allocation4], 4294967280 }
 0x3cb   :  { %3147 = vsyncpa [#allocation3], 1 }
 0x3cc   :  { %3148 = vsyncpa [#allocation6], 1 }
 0x3cd   :  { %3149 = vsyncpa [#allocation9], 1 }
 0x3ce   :  { %3150 = vsyncpa [#allocation12], 1 }
 0x3cf   :  { %3151 = vsyncpa [#allocation4], 1 }

</bundles_post_ra>
